<compile_context>
chip_gen: v5e
topology: v5e:2x2
jax: 0.10.0
libtpu: 0.0.40
codegen_flags: <defaults>
</compile_context>

<pallas_src>
from functools import partial

import jax
import jax.numpy as jnp
from jax.experimental import pallas as pl
from jax.experimental.pallas import tpu as pltpu

EXPANSION_RATIO = 4
BN_EPS = 1e-5
ACT_DTYPE = jnp.bfloat16        # inter-stage / block-interface activation dtype


# ---------------------------------------------------------------------------
# small helpers
# ---------------------------------------------------------------------------
def _vmem_limit_bytes():
    """Generation-aware VMEM request (don't ask for all of v7x's 64 MiB)."""
    try:
        cap = int(pltpu.get_tpu_info().vmem_capacity_bytes)
    except Exception:
        cap = 64 * 1024 * 1024
    return min((cap * 3) // 4, 96 * 1024 * 1024)


def _round_up(x, m):
    return ((x + m - 1) // m) * m


def _pick_tm(m, cap=512, target_steps=4):
    """M tile: multiple of 8, <= cap, and >= target_steps grid steps if possible."""
    tm = max(64, _round_up(pl.cdiv(m, target_steps), 8))
    return min(cap, tm, _round_up(m, 8))


# ---------------------------------------------------------------------------
# kernel A: conv1(1x1)+BN1+ReLU  fused with  conv2(3x3)+BN2+ReLU
# ---------------------------------------------------------------------------
def _conv12_s1_kernel(x_ref, w1_ref, b1_ref, w2_ref, b2_ref, o_ref,
                      pad_ref, acc_ref, *, H, W):
    """stride-1 variant.

    x_ref   : (1, H*W, Cin) bf16 -- one image, flat row-major spatial.
    pad_ref : ((H+2)*(W+2)+2, Cmid) f32 -- flat zero-padded y1; the flat layout
              makes every 3x3 tap a contiguous 2-D slab (no relayout copies).
    acc_ref : (H*(W+2), Cmid) f32 -- conv2 accumulator incl. 2 junk columns per
              output row, dropped at store time.
    """
    Ho, Wo = H, W
    Wj = W + 2
    pad_ref[...] = jnp.zeros_like(pad_ref)

    w1 = w1_ref[...]
    b1 = b1_ref[...]
    # conv1 + BN1 + ReLU, row by row, scattered into the padded flat scratch.
    for i in range(H):
        row = jnp.dot(x_ref[0, pl.ds(i * W, W), :], w1,
                      preferred_element_type=jnp.float32) + b1
        pad_ref[pl.ds((i + 1) * Wj + 1, W), :] = jnp.maximum(row, 0.0)

    # conv2: each of the 9 taps is a contiguous slab of the flat padded y1.
    nrows = Ho * Wj
    for ky in range(3):
        for kx in range(3):
            slab = pad_ref[pl.ds(ky * Wj + kx, nrows), :].astype(jnp.bfloat16)
            part = jnp.dot(slab, w2_ref[ky * 3 + kx],
                           preferred_element_type=jnp.float32)
            if ky == 0 and kx == 0:
                acc_ref[...] = part
            else:
                acc_ref[...] += part

    # BN2 shift + ReLU; skip the junk columns at store time.
    b2 = b2_ref[...]
    for i in range(Ho):
        row = jnp.maximum(acc_ref[pl.ds(i * Wj, Wo), :] + b2, 0.0)
        o_ref[0, pl.ds(i * Wo, Wo), :] = row.astype(o_ref.dtype)


def _conv12_s2_kernel(x_ref, w1_ref, b1_ref, w2_ref, b2_ref, o_ref,
                      pad_ref, acc_ref, *, Hp, Wp):
    """stride-2 variant.

    x_ref   : (1, 4, Hp*Wp, Cin) bf16 -- parity planes of one image,
              plane p = py*2+px holds x[py::2, px::2].
    pad_ref : (4, (Hp+1)*(Wp+1)+1, Cmid) f32 -- flat zero-padded parity planes
              of y1; tap (ky,kx) is a contiguous slab of plane (ky%2, kx%2).
    acc_ref : (Hp*(Wp+1), Cmid) f32.
    """
    Ho, Wo = Hp, Wp
    Wj = Wo + 1
    pad_ref[...] = jnp.zeros_like(pad_ref)

    w1 = w1_ref[...]
    b1 = b1_ref[...]
    # conv1 + BN1 + ReLU per input parity plane; input parity (py,px) lands in
    # padded parity plane (1-py, 1-px) at row/col offset (py, px).
    for py in range(2):
        for px in range(2):
            src = py * 2 + px
            dst = (1 - py) * 2 + (1 - px)
            for a in range(Hp):
                row = jnp.dot(x_ref[0, src, pl.ds(a * Wp, Wp), :], w1,
                              preferred_element_type=jnp.float32) + b1
                pad_ref[dst, pl.ds((a + py) * Wj + px, Wp), :] = (
                    jnp.maximum(row, 0.0))

    nrows = Ho * Wj
    for ky in range(3):
        for kx in range(3):
            q = (ky % 2) * 2 + (kx % 2)
            off = (ky // 2) * Wj + (kx // 2)
            slab = pad_ref[q, pl.ds(off, nrows), :].astype(jnp.bfloat16)
            part = jnp.dot(slab, w2_ref[ky * 3 + kx],
                           preferred_element_type=jnp.float32)
            if ky == 0 and kx == 0:
                acc_ref[...] = part
            else:
                acc_ref[...] += part

    b2 = b2_ref[...]
    for i in range(Ho):
        row = jnp.maximum(acc_ref[pl.ds(i * Wj, Wo), :] + b2, 0.0)
        o_ref[0, pl.ds(i * Wo, Wo), :] = row.astype(o_ref.dtype)


def conv12_fused(x_nhwc, w1, b1, w2, b2, *, stride):
    """Fused conv1(1x1)+BN1+ReLU + conv2(3x3, stride, pad 1)+BN2+ReLU.

    Returns (y2 flat (Nb*Ho*Wo, Cmid) bf16, Ho, Wo, x_parity_or_None).
    """
    Nb, H, W, Cin = x_nhwc.shape
    Cmid = w1.shape[1]
    x_nhwc = x_nhwc.astype(jnp.bfloat16)

    if stride == 1:
        Ho, Wo = H, W
        Wj = W + 2
        x_in = x_nhwc.reshape(Nb, H * W, Cin)               # free (contiguous)
        x_par = None
        x_spec = pl.BlockSpec((1, H * W, Cin), lambda n: (n, 0, 0))
        pad_shape = ((H + 2) * Wj + 2, Cmid)
        kernel = partial(_conv12_s1_kernel, H=H, W=W)
    else:
        assert stride == 2 and H % 2 == 0 and W % 2 == 0
        Hp, Wp = H // 2, W // 2
        Ho, Wo = Hp, Wp
        Wj = Wo + 1
        # single repack pass: parity planes (also reused as the stride-2
        # shortcut input, so no separate x[:, ::2, ::2] slice pass).
        x_par = (x_nhwc.reshape(Nb, Hp, 2, Wp, 2, Cin)
                 .transpose(0, 2, 4, 1, 3, 5)
                 .reshape(Nb, 4, Hp * Wp, Cin))
        x_in = x_par
        x_spec = pl.BlockSpec((1, 4, Hp * Wp, Cin), lambda n: (n, 0, 0, 0))
        pad_shape = (4, (Ho + 1) * Wj + 1, Cmid)
        kernel = partial(_conv12_s2_kernel, Hp=Hp, Wp=Wp)

    cost = pl.CostEstimate(
        flops=int(2 * Nb * H * W * Cin * Cmid
                  + 2 * Nb * Ho * Wo * 9 * Cmid * Cmid),
        transcendentals=0,
        bytes_accessed=int(x_in.size * 2 + w1.size * 2 + w2.size * 2
                           + (b1.size + b2.size) * 4 + Nb * Ho * Wo * Cmid * 2),
    )
    y2 = pl.pallas_call(
        kernel,
        out_shape=jax.ShapeDtypeStruct((Nb, Ho * Wo, Cmid), ACT_DTYPE),
        grid=(Nb,),
        in_specs=[
            x_spec,
            pl.BlockSpec(w1.shape, lambda n: (0, 0)),        # grid-invariant
            pl.BlockSpec((1, Cmid), lambda n: (0, 0)),
            pl.BlockSpec(w2.shape, lambda n: (0, 0, 0)),
            pl.BlockSpec((1, Cmid), lambda n: (0, 0)),
        ],
        out_specs=pl.BlockSpec((1, Ho * Wo, Cmid), lambda n: (n, 0, 0)),
        scratch_shapes=[
            pltpu.VMEM(pad_shape, jnp.float32),
            pltpu.VMEM((Ho * Wj, Cmid), jnp.float32),
        ],
        compiler_params=pltpu.CompilerParams(
            dimension_semantics=("parallel",),
            vmem_limit_bytes=_vmem_limit_bytes(),
        ),
        cost_estimate=cost,
    )(x_in, w1, b1, w2, b2)
    return y2.reshape(Nb * Ho * Wo, Cmid), Ho, Wo, x_par


# ---------------------------------------------------------------------------
# kernel B: conv3(1x1)+BN3+ReLU fused with shortcut + residual add + final ReLU
# ---------------------------------------------------------------------------
def _conv3_proj_kernel(y2_ref, xs_ref, w3_ref, wsc_ref, b3_ref, bsc_ref, o_ref):
    """out = ReLU( ReLU(y2@w3 + b3) + (xs@wsc + bsc) )   (projection shortcut)."""
    y3 = jnp.dot(y2_ref[...], w3_ref[...],
                 preferred_element_type=jnp.float32) + b3_ref[...]
    y3 = jnp.maximum(y3, 0.0)                    # ReLU(n3(conv3(.)))  (per spec)
    sc = jnp.dot(xs_ref[...], wsc_ref[...],
                 preferred_element_type=jnp.float32) + bsc_ref[...]
    o_ref[...] = jnp.maximum(y3 + sc, 0.0).astype(o_ref.dtype)


def _conv3_ident_kernel(y2_ref, res_ref, w3_ref, b3_ref, o_ref):
    """out = ReLU( ReLU(y2@w3 + b3) + res )   (identity shortcut)."""
    y3 = jnp.dot(y2_ref[...], w3_ref[...],
                 preferred_element_type=jnp.float32) + b3_ref[...]
    y3 = jnp.maximum(y3, 0.0)
    o_ref[...] = jnp.maximum(y3 + res_ref[...].astype(jnp.float32),
                             0.0).astype(o_ref.dtype)


def conv3_residual_fused(y2_2d, res_2d, w3, b3, wsc=None, bsc=None):
    """conv3 + BN3 + ReLU fused with shortcut (+projection), add, final ReLU."""
    M, Cmid = y2_2d.shape
    Cout = w3.shape[1]
    Cres = res_2d.shape[1]
    projection = wsc is not None

    tm = _pick_tm(M)
    tn = Cout if Cout <= 512 else 512            # N tiling bounds weight VMEM
    grid = (pl.cdiv(M, tm), pl.cdiv(Cout, tn))

    in_specs = [pl.BlockSpec((tm, Cmid), lambda i, j: (i, 0))]
    args = [y2_2d]
    if projection:
        kernel = _conv3_proj_kernel
        in_specs += [
            pl.BlockSpec((tm, Cres), lambda i, j: (i, 0)),   # xs (shortcut lhs)
            pl.BlockSpec((Cmid, tn), lambda i, j: (0, j)),   # w3
            pl.BlockSpec((Cres, tn), lambda i, j: (0, j)),   # wsc
            pl.BlockSpec((1, tn), lambda i, j: (0, j)),      # b3
            pl.BlockSpec((1, tn), lambda i, j: (0, j)),      # bsc
        ]
        args += [res_2d, w3, wsc, b3, bsc]
        flops = 2 * M * (Cmid + Cres) * Cout
        wbytes = (w3.size + wsc.size) * 2
    else:
        kernel = _conv3_ident_kernel
        in_specs += [
            pl.BlockSpec((tm, tn), lambda i, j: (i, j)),     # identity residual
            pl.BlockSpec((Cmid, tn), lambda i, j: (0, j)),   # w3
            pl.BlockSpec((1, tn), lambda i, j: (0, j)),      # b3
        ]
        args += [res_2d, w3, b3]
        flops = 2 * M * Cmid * Cout
        wbytes = w3.size * 2

    cost = pl.CostEstimate(
        flops=int(flops),
        transcendentals=0,
        bytes_accessed=int(y2_2d.size * 2 + res_2d.size * 2 + wbytes
                           + M * Cout * 2),
    )
    return pl.pallas_call(
        kernel,
        out_shape=jax.ShapeDtypeStruct((M, Cout), ACT_DTYPE),
        grid=grid,
        in_specs=in_specs,
        out_specs=pl.BlockSpec((tm, tn), lambda i, j: (i, j)),
        compiler_params=pltpu.CompilerParams(
            dimension_semantics=("parallel", "parallel"),
            vmem_limit_bytes=_vmem_limit_bytes(),
        ),
        cost_estimate=cost,
    )(*args)


# ---------------------------------------------------------------------------
# Parameter setup (deterministic, synthetic) + BN/bias folding
# ---------------------------------------------------------------------------
def init_params(key, cin, cmid):
    cout = cmid * EXPANSION_RATIO
    ks = jax.random.split(key, 12)

    def conv_w(k, co, ci, kh, kw):
        return jax.random.normal(k, (co, ci, kh, kw), jnp.float32) * 0.1

    def bn(k, c):
        k1, k2, k3, k4 = jax.random.split(k, 4)
        return dict(
            gamma=jax.random.uniform(k1, (c,), jnp.float32, 0.5, 1.5),
            beta=jax.random.normal(k2, (c,), jnp.float32) * 0.1,
            mean=jax.random.normal(k3, (c,), jnp.float32) * 0.1,
            var=jax.random.uniform(k4, (c,), jnp.float32, 0.5, 1.5),
        )

    return {
        "conv1_w": conv_w(ks[0], cmid, cin, 1, 1),
        "conv1_b": jax.random.normal(ks[1], (cmid,), jnp.float32) * 0.1,
        "conv2_w": conv_w(ks[2], cmid, cmid, 3, 3),
        "conv2_b": jax.random.normal(ks[3], (cmid,), jnp.float32) * 0.1,
        "conv3_w": conv_w(ks[4], cout, cmid, 1, 1),
        "conv3_b": jax.random.normal(ks[5], (cout,), jnp.float32) * 0.1,
        "sc_w": conv_w(ks[6], cout, cin, 1, 1),
        "sc_b": jax.random.normal(ks[7], (cout,), jnp.float32) * 0.1,
        "n1": bn(ks[8], cmid),
        "n2": bn(ks[9], cmid),
        "n3": bn(ks[10], cout),
        "nsc": bn(ks[11], cout),
    }


def prepare_params(p):
    """Fold conv bias + eval-mode BN: scale goes into the bf16 weights, the
    remaining per-channel shift stays f32 (review: fold scale before cast)."""
    def fold(conv_b, n):
        s = n["gamma"] * jax.lax.rsqrt(n["var"] + BN_EPS)
        return s, (conv_b - n["mean"]) * s + n["beta"]

    cmid = p["conv1_w"].shape[0]
    s1, b1 = fold(p["conv1_b"], p["n1"])
    s2, b2 = fold(p["conv2_b"], p["n2"])
    s3, b3 = fold(p["conv3_b"], p["n3"])
    ssc, bsc = fold(p["sc_b"], p["nsc"])

    w1 = (jnp.transpose(p["conv1_w"][:, :, 0, 0]) * s1[None, :]).astype(jnp.bfloat16)
    w2 = (jnp.transpose(p["conv2_w"], (2, 3, 1, 0)).reshape(9, cmid, cmid)
          * s2[None, None, :]).astype(jnp.bfloat16)
    w3 = (jnp.transpose(p["conv3_w"][:, :, 0, 0]) * s3[None, :]).astype(jnp.bfloat16)
    wsc = (jnp.transpose(p["sc_w"][:, :, 0, 0]) * ssc[None, :]).astype(jnp.bfloat16)

    f32 = jnp.float32
    return dict(
        w1=w1, b1=b1.reshape(1, -1).astype(f32),
        w2=w2, b2=b2.reshape(1, -1).astype(f32),
        w3=w3, b3=b3.reshape(1, -1).astype(f32),
        wsc=wsc, bsc=bsc.reshape(1, -1).astype(f32),
    )


# ---------------------------------------------------------------------------
# BottleneckBlock forward (Pallas path)
# ---------------------------------------------------------------------------
def bottleneck_forward_nhwc(x_nhwc, p, downsample):
    """Block forward on NHWC/bf16 activations (network-internal interface)."""
    Nb, H, W, Cin = x_nhwc.shape
    Cout = p["conv3_w"].shape[0]
    stride = 2 if downsample else 1
    q = prepare_params(p)
    x_nhwc = x_nhwc.astype(ACT_DTYPE)

    y2, Ho, Wo, x_par = conv12_fused(
        x_nhwc, q["w1"], q["b1"], q["w2"], q["b2"], stride=stride)

    projection = downsample or (Cin != Cout)
    if projection:
        if stride == 2:
            # parity plane (0,0) == x[:, ::2, ::2, :] -- reuse the conv2 repack.
            xs = x_par[:, 0].reshape(Nb * Ho * Wo, Cin)
        else:
            xs = x_nhwc.reshape(Nb * Ho * Wo, Cin)            # free reshape
        out2d = conv3_residual_fused(y2, xs, q["w3"], q["b3"],
                                     q["wsc"], q["bsc"])
    else:
        res = x_nhwc.reshape(Nb * Ho * Wo, Cout)              # identity (bf16)
        out2d = conv3_residual_fused(y2, res, q["w3"], q["b3"])
    return out2d.reshape(Nb, Ho, Wo, Cout)


def bottleneck_forward(x_nchw, p, downsample):
    """PyTorch-interface wrapper: NCHW f32 in / NCHW f32 out."""
    x = jnp.transpose(x_nchw, (0, 2, 3, 1))
    out = bottleneck_forward_nhwc(x, p, downsample)
    return jnp.transpose(out.astype(jnp.float32), (0, 3, 1, 2))


# ---------------------------------------------------------------------------
# Pure-JAX f32 reference (true module semantics, for correctness check)
# ---------------------------------------------------------------------------
def reference_forward(x_nchw, p, downsample):
    x = jnp.transpose(x_nchw, (0, 2, 3, 1)).astype(jnp.float32)

    def conv(h, w_oihw, b, stride, pad):
        wh = jnp.transpose(w_oihw, (2, 3, 1, 0))              # HWIO
        y = jax.lax.conv_general_dilated(
            h, wh, (stride, stride), [(pad, pad), (pad, pad)],
            dimension_numbers=("NHWC", "HWIO", "NHWC"),
            precision=jax.lax.Precision.HIGHEST,
        )
        return y + b.reshape(1, 1, 1, -1)

    def bn(y, n):
        return (y - n["mean"]) / jnp.sqrt(n["var"] + BN_EPS) * n["gamma"] + n["beta"]

    stride = 2 if downsample else 1
    Cin = x.shape[-1]
    Cout = p["conv3_w"].shape[0]
    if downsample or Cin != Cout:
        sc = bn(conv(x, p["sc_w"], p["sc_b"], stride, 0), p["nsc"])
    else:
        sc = x
    h = jax.nn.relu(bn(conv(x, p["conv1_w"], p["conv1_b"], 1, 0), p["n1"]))
    h = jax.nn.relu(bn(conv(h, p["conv2_w"], p["conv2_b"], stride, 1), p["n2"]))
    h = jax.nn.relu(bn(conv(h, p["conv3_w"], p["conv3_b"], 1, 0), p["n3"]))
    out = jax.nn.relu(sc + h)
    return jnp.transpose(out, (0, 3, 1, 2))


# ---------------------------------------------------------------------------
if __name__ == "__main__":
    key = jax.random.PRNGKey(0)
    fwd = jax.jit(bottleneck_forward, static_argnames=("downsample",))

    def check(name, k, nb, cin, cmid, hw, downsample):
        kp, kx = jax.random.split(k)
        params = init_params(kp, cin, cmid)
        x = jax.random.normal(kx, (nb, cin, hw, hw), jnp.float32)
        out = jax.block_until_ready(fwd(x, params, downsample=downsample))
        ref = reference_forward(x, params, downsample)
        assert out.shape == ref.shape, (name, out.shape, ref.shape)
        # bf16 MXU path vs f32 reference: loose tolerance, but far below any
        # error an indexing / stride / padding / BN-folding bug would produce.
        scale = max(1.0, float(jnp.max(jnp.abs(ref))))
        max_err = float(jnp.max(jnp.abs(out - ref)))
        mean_err = float(jnp.mean(jnp.abs(out - ref)))
        assert max_err < 0.10 * scale, (name, max_err, scale)
        assert mean_err < 0.02 * scale, (name, mean_err, scale)

    k1, k2 = jax.random.split(key)
    # downsample block: stride-2 conv2 + 1x1-projection shortcut
    check("downsample", k1, nb=2, cin=8, cmid=4, hw=16, downsample=True)
    # identity block: stride-1 conv2 + identity shortcut (cin == cmid*4)
    check("identity", k2, nb=2, cin=16, cmid=4, hw=16, downsample=False)

    print("KERNEL_OK")
</pallas_src>

<mosaic_0001>
module attributes {stable_mosaic.version = 11 : i64} {
  func.func @_conv3_proj_kernel(%arg0: i32, %arg1: i32, %arg2: memref<64x4xbf16, #tpu.memory_space<vmem>>, %arg3: memref<64x8xbf16, #tpu.memory_space<vmem>>, %arg4: memref<4x16xbf16, #tpu.memory_space<vmem>>, %arg5: memref<8x16xbf16, #tpu.memory_space<vmem>>, %arg6: memref<1x16xf32, #tpu.memory_space<vmem>>, %arg7: memref<1x16xf32, #tpu.memory_space<vmem>>, %arg8: memref<64x16xbf16, #tpu.memory_space<vmem>>) attributes {dimension_semantics = [#tpu.dimension_semantics<parallel>, #tpu.dimension_semantics<parallel>], iteration_bounds = array<i64: 2, 1>, scalar_prefetch = 0 : i64, scratch_operands = 0 : i64, tpu.core_type = #tpu.core_type<tc>, window_params = [{transform_indices = @transform_0, window_bounds = array<i64: 64, 4>}, {transform_indices = @transform_1, window_bounds = array<i64: 64, 8>}, {transform_indices = @transform_2, window_bounds = array<i64: 4, 16>}, {transform_indices = @transform_3, window_bounds = array<i64: 8, 16>}, {transform_indices = @transform_4, window_bounds = array<i64: 1, 16>}, {transform_indices = @transform_5, window_bounds = array<i64: 1, 16>}, {transform_indices = @transform_6, window_bounds = array<i64: 64, 16>}]} {
    %c0 = arith.constant 0 : index
    %c0_0 = arith.constant 0 : index
    %0 = vector.load %arg2[%c0, %c0_0] : memref<64x4xbf16, #tpu.memory_space<vmem>>, vector<64x4xbf16>
    %c0_1 = arith.constant 0 : index
    %c0_2 = arith.constant 0 : index
    %1 = vector.load %arg4[%c0_1, %c0_2] : memref<4x16xbf16, #tpu.memory_space<vmem>>, vector<4x16xbf16>
    %cst = arith.constant dense<0.000000e+00> : vector<64x16xf32>
    %2 = tpu.matmul %0, %1, %cst {dimension_numbers = #tpu.dot_dimension_numbers<[1], [0], [0], [1], [0, 0, 1, 1], [], []>} : vector<64x4xbf16>, vector<4x16xbf16>, vector<64x16xf32> -> vector<64x16xf32>
    %c0_3 = arith.constant 0 : index
    %c0_4 = arith.constant 0 : index
    %3 = vector.load %arg6[%c0_3, %c0_4] : memref<1x16xf32, #tpu.memory_space<vmem>>, vector<1x16xf32>
    %4 = vector.broadcast %3 : vector<1x16xf32> to vector<64x16xf32>
    %5 = arith.addf %2, %4 : vector<64x16xf32>
    %cst_5 = arith.constant 0.000000e+00 : f32
    %6 = vector.broadcast %cst_5 : f32 to vector<64x16xf32>
    %7 = arith.maximumf %5, %6 : vector<64x16xf32>
    %c0_6 = arith.constant 0 : index
    %c0_7 = arith.constant 0 : index
    %8 = vector.load %arg3[%c0_6, %c0_7] : memref<64x8xbf16, #tpu.memory_space<vmem>>, vector<64x8xbf16>
    %c0_8 = arith.constant 0 : index
    %c0_9 = arith.constant 0 : index
    %9 = vector.load %arg5[%c0_8, %c0_9] : memref<8x16xbf16, #tpu.memory_space<vmem>>, vector<8x16xbf16>
    %cst_10 = arith.constant dense<0.000000e+00> : vector<64x16xf32>
    %10 = tpu.matmul %8, %9, %cst_10 {dimension_numbers = #tpu.dot_dimension_numbers<[1], [0], [0], [1], [0, 0, 1, 1], [], []>} : vector<64x8xbf16>, vector<8x16xbf16>, vector<64x16xf32> -> vector<64x16xf32>
    %c0_11 = arith.constant 0 : index
    %c0_12 = arith.constant 0 : index
    %11 = vector.load %arg7[%c0_11, %c0_12] : memref<1x16xf32, #tpu.memory_space<vmem>>, vector<1x16xf32>
    %12 = vector.broadcast %11 : vector<1x16xf32> to vector<64x16xf32>
    %13 = arith.addf %10, %12 : vector<64x16xf32>
    %14 = arith.addf %7, %13 : vector<64x16xf32>
    %cst_13 = arith.constant 0.000000e+00 : f32
    %15 = vector.broadcast %cst_13 : f32 to vector<64x16xf32>
    %16 = arith.maximumf %14, %15 : vector<64x16xf32>
    %17 = arith.truncf %16 : vector<64x16xf32> to vector<64x16xbf16>
    %c0_14 = arith.constant 0 : index
    %c0_15 = arith.constant 0 : index
    %18 = vector.load %arg8[%c0_14, %c0_15] : memref<64x16xbf16, #tpu.memory_space<vmem>>, vector<64x16xbf16>
    tpu.vector_store %arg8[%c0_14, %c0_15], %17 {strides = array<i32>} : memref<64x16xbf16, #tpu.memory_space<vmem>>, vector<64x16xbf16>,
    return
  }
  func.func @transform_0(%arg0: i32, %arg1: i32) -> (i32, i32) {
    %c0_i32 = arith.constant 0 : i32
    %c0_i32_0 = arith.constant 0 : i32
    return %arg0, %c0_i32 : i32, i32
  }
  func.func @transform_1(%arg0: i32, %arg1: i32) -> (i32, i32) {
    %c0_i32 = arith.constant 0 : i32
    %c0_i32_0 = arith.constant 0 : i32
    return %arg0, %c0_i32 : i32, i32
  }
  func.func @transform_2(%arg0: i32, %arg1: i32) -> (i32, i32) {
    %c0_i32 = arith.constant 0 : i32
    %c0_i32_0 = arith.constant 0 : i32
    return %c0_i32, %arg1 : i32, i32
  }
  func.func @transform_3(%arg0: i32, %arg1: i32) -> (i32, i32) {
    %c0_i32 = arith.constant 0 : i32
    %c0_i32_0 = arith.constant 0 : i32
    return %c0_i32, %arg1 : i32, i32
  }
  func.func @transform_4(%arg0: i32, %arg1: i32) -> (i32, i32) {
    %c0_i32 = arith.constant 0 : i32
    %c0_i32_0 = arith.constant 0 : i32
    return %c0_i32, %arg1 : i32, i32
  }
  func.func @transform_5(%arg0: i32, %arg1: i32) -> (i32, i32) {
    %c0_i32 = arith.constant 0 : i32
    %c0_i32_0 = arith.constant 0 : i32
    return %c0_i32, %arg1 : i32, i32
  }
  func.func @transform_6(%arg0: i32, %arg1: i32) -> (i32, i32) {
    %c0_i32 = arith.constant 0 : i32
    return %arg0, %arg1 : i32, i32
  }
}

module attributes {stable_mosaic.version = 11 : i64} {
  func.func @_conv12_s2_kernel(%arg0: i32, %arg1: memref<1x4x64x8xbf16, #tpu.memory_space<vmem>>, %arg2: memref<8x4xbf16, #tpu.memory_space<vmem>>, %arg3: memref<1x4xf32, #tpu.memory_space<vmem>>, %arg4: memref<9x4x4xbf16, #tpu.memory_space<vmem>>, %arg5: memref<1x4xf32, #tpu.memory_space<vmem>>, %arg6: memref<1x64x4xbf16, #tpu.memory_space<vmem>>, %arg7: memref<4x82x4xf32, #tpu.memory_space<vmem>>, %arg8: memref<72x4xf32, #tpu.memory_space<vmem>>) attributes {dimension_semantics = [#tpu.dimension_semantics<parallel>], iteration_bounds = array<i64: 2>, scalar_prefetch = 0 : i64, scratch_operands = 2 : i64, tpu.core_type = #tpu.core_type<tc>, window_params = [{transform_indices = @transform_0, window_bounds = array<i64: 1, 4, 64, 8>}, {pipeline_mode = #tpu.pipeline_mode<synchronous>, transform_indices = @transform_1, window_bounds = array<i64: 8, 4>}, {pipeline_mode = #tpu.pipeline_mode<synchronous>, transform_indices = @transform_2, window_bounds = array<i64: 1, 4>}, {pipeline_mode = #tpu.pipeline_mode<synchronous>, transform_indices = @transform_3, window_bounds = array<i64: 9, 4, 4>}, {pipeline_mode = #tpu.pipeline_mode<synchronous>, transform_indices = @transform_4, window_bounds = array<i64: 1, 4>}, {transform_indices = @transform_5, window_bounds = array<i64: 1, 64, 4>}]} {
    %cst = arith.constant 0.000000e+00 : f32
    %0 = vector.broadcast %cst : f32 to vector<4x82x4xf32>
    %c0 = arith.constant 0 : index
    %c0_0 = arith.constant 0 : index
    %c0_1 = arith.constant 0 : index
    %1 = vector.load %arg7[%c0, %c0_0, %c0_1] : memref<4x82x4xf32, #tpu.memory_space<vmem>>, vector<4x82x4xf32>
    tpu.vector_store %arg7[%c0, %c0_0, %c0_1], %0 {strides = array<i32>} : memref<4x82x4xf32, #tpu.memory_space<vmem>>, vector<4x82x4xf32>,
    %c0_2 = arith.constant 0 : index
    %c0_3 = arith.constant 0 : index
    %2 = vector.load %arg2[%c0_2, %c0_3] : memref<8x4xbf16, #tpu.memory_space<vmem>>, vector<8x4xbf16>
    %c0_4 = arith.constant 0 : index
    %c0_5 = arith.constant 0 : index
    %3 = vector.load %arg3[%c0_4, %c0_5] : memref<1x4xf32, #tpu.memory_space<vmem>>, vector<1x4xf32>
    %c0_6 = arith.constant 0 : index
    %c0_7 = arith.constant 0 : index
    %c0_8 = arith.constant 0 : index
    %c0_9 = arith.constant 0 : index
    %4 = vector.load %arg1[%c0_6, %c0_7, %c0_8, %c0_9] : memref<1x4x64x8xbf16, #tpu.memory_space<vmem>>, vector<1x1x8x8xbf16>
    %5 = vector.shape_cast %4 : vector<1x1x8x8xbf16> to vector<8x8xbf16>
    %cst_10 = arith.constant dense<0.000000e+00> : vector<8x4xf32>
    %6 = tpu.matmul %5, %2, %cst_10 {dimension_numbers = #tpu.dot_dimension_numbers<[1], [0], [0], [1], [0, 0, 1, 1], [], []>} : vector<8x8xbf16>, vector<8x4xbf16>, vector<8x4xf32> -> vector<8x4xf32>
    %7 = vector.broadcast %3 : vector<1x4xf32> to vector<8x4xf32>
    %8 = arith.addf %6, %7 : vector<8x4xf32>
    %cst_11 = arith.constant 0.000000e+00 : f32
    %9 = vector.broadcast %cst_11 : f32 to vector<8x4xf32>
    %10 = arith.maximumf %8, %9 : vector<8x4xf32>
    %c3 = arith.constant 3 : index
    %c0_12 = arith.constant 0 : index
    %c0_13 = arith.constant 0 : index
    %11 = vector.load %arg7[%c3, %c0_12, %c0_13] : memref<4x82x4xf32, #tpu.memory_space<vmem>>, vector<1x8x4xf32>
    %12 = vector.shape_cast %11 : vector<1x8x4xf32> to vector<8x4xf32>
    %13 = vector.shape_cast %10 : vector<8x4xf32> to vector<1x8x4xf32>
    tpu.vector_store %arg7[%c3, %c0_12, %c0_13], %13 {strides = array<i32>} : memref<4x82x4xf32, #tpu.memory_space<vmem>>, vector<1x8x4xf32>,
    %c0_14 = arith.constant 0 : index
    %c0_15 = arith.constant 0 : index
    %c8 = arith.constant 8 : index
    %c0_16 = arith.constant 0 : index
    %14 = vector.load %arg1[%c0_14, %c0_15, %c8, %c0_16] : memref<1x4x64x8xbf16, #tpu.memory_space<vmem>>, vector<1x1x8x8xbf16>
    %15 = vector.shape_cast %14 : vector<1x1x8x8xbf16> to vector<8x8xbf16>
    %cst_17 = arith.constant dense<0.000000e+00> : vector<8x4xf32>
    %16 = tpu.matmul %15, %2, %cst_17 {dimension_numbers = #tpu.dot_dimension_numbers<[1], [0], [0], [1], [0, 0, 1, 1], [], []>} : vector<8x8xbf16>, vector<8x4xbf16>, vector<8x4xf32> -> vector<8x4xf32>
    %17 = vector.broadcast %3 : vector<1x4xf32> to vector<8x4xf32>
    %18 = arith.addf %16, %17 : vector<8x4xf32>
    %cst_18 = arith.constant 0.000000e+00 : f32
    %19 = vector.broadcast %cst_18 : f32 to vector<8x4xf32>
    %20 = arith.maximumf %18, %19 : vector<8x4xf32>
    %c3_19 = arith.constant 3 : index
    %c9 = arith.constant 9 : index
    %c0_20 = arith.constant 0 : index
    %21 = vector.load %arg7[%c3_19, %c9, %c0_20] : memref<4x82x4xf32, #tpu.memory_space<vmem>>, vector<1x8x4xf32>
    %22 = vector.shape_cast %21 : vector<1x8x4xf32> to vector<8x4xf32>
    %23 = vector.shape_cast %20 : vector<8x4xf32> to vector<1x8x4xf32>
    tpu.vector_store %arg7[%c3_19, %c9, %c0_20], %23 {strides = array<i32>} : memref<4x82x4xf32, #tpu.memory_space<vmem>>, vector<1x8x4xf32>,
    %c0_21 = arith.constant 0 : index
    %c0_22 = arith.constant 0 : index
    %c16 = arith.constant 16 : index
    %c0_23 = arith.constant 0 : index
    %24 = vector.load %arg1[%c0_21, %c0_22, %c16, %c0_23] : memref<1x4x64x8xbf16, #tpu.memory_space<vmem>>, vector<1x1x8x8xbf16>
    %25 = vector.shape_cast %24 : vector<1x1x8x8xbf16> to vector<8x8xbf16>
    %cst_24 = arith.constant dense<0.000000e+00> : vector<8x4xf32>
    %26 = tpu.matmul %25, %2, %cst_24 {dimension_numbers = #tpu.dot_dimension_numbers<[1], [0], [0], [1], [0, 0, 1, 1], [], []>} : vector<8x8xbf16>, vector<8x4xbf16>, vector<8x4xf32> -> vector<8x4xf32>
    %27 = vector.broadcast %3 : vector<1x4xf32> to vector<8x4xf32>
    %28 = arith.addf %26, %27 : vector<8x4xf32>
    %cst_25 = arith.constant 0.000000e+00 : f32
    %29 = vector.broadcast %cst_25 : f32 to vector<8x4xf32>
    %30 = arith.maximumf %28, %29 : vector<8x4xf32>
    %c3_26 = arith.constant 3 : index
    %c18 = arith.constant 18 : index
    %c0_27 = arith.constant 0 : index
    %31 = vector.load %arg7[%c3_26, %c18, %c0_27] : memref<4x82x4xf32, #tpu.memory_space<vmem>>, vector<1x8x4xf32>
    %32 = vector.shape_cast %31 : vector<1x8x4xf32> to vector<8x4xf32>
    %33 = vector.shape_cast %30 : vector<8x4xf32> to vector<1x8x4xf32>
    tpu.vector_store %arg7[%c3_26, %c18, %c0_27], %33 {strides = array<i32>} : memref<4x82x4xf32, #tpu.memory_space<vmem>>, vector<1x8x4xf32>,
    %c0_28 = arith.constant 0 : index
    %c0_29 = arith.constant 0 : index
    %c24 = arith.constant 24 : index
    %c0_30 = arith.constant 0 : index
    %34 = vector.load %arg1[%c0_28, %c0_29, %c24, %c0_30] : memref<1x4x64x8xbf16, #tpu.memory_space<vmem>>, vector<1x1x8x8xbf16>
    %35 = vector.shape_cast %34 : vector<1x1x8x8xbf16> to vector<8x8xbf16>
    %cst_31 = arith.constant dense<0.000000e+00> : vector<8x4xf32>
    %36 = tpu.matmul %35, %2, %cst_31 {dimension_numbers = #tpu.dot_dimension_numbers<[1], [0], [0], [1], [0, 0, 1, 1], [], []>} : vector<8x8xbf16>, vector<8x4xbf16>, vector<8x4xf32> -> vector<8x4xf32>
    %37 = vector.broadcast %3 : vector<1x4xf32> to vector<8x4xf32>
    %38 = arith.addf %36, %37 : vector<8x4xf32>
    %cst_32 = arith.constant 0.000000e+00 : f32
    %39 = vector.broadcast %cst_32 : f32 to vector<8x4xf32>
    %40 = arith.maximumf %38, %39 : vector<8x4xf32>
    %c3_33 = arith.constant 3 : index
    %c27 = arith.constant 27 : index
    %c0_34 = arith.constant 0 : index
    %41 = vector.load %arg7[%c3_33, %c27, %c0_34] : memref<4x82x4xf32, #tpu.memory_space<vmem>>, vector<1x8x4xf32>
    %42 = vector.shape_cast %41 : vector<1x8x4xf32> to vector<8x4xf32>
    %43 = vector.shape_cast %40 : vector<8x4xf32> to vector<1x8x4xf32>
    tpu.vector_store %arg7[%c3_33, %c27, %c0_34], %43 {strides = array<i32>} : memref<4x82x4xf32, #tpu.memory_space<vmem>>, vector<1x8x4xf32>,
    %c0_35 = arith.constant 0 : index
    %c0_36 = arith.constant 0 : index
    %c32 = arith.constant 32 : index
    %c0_37 = arith.constant 0 : index
    %44 = vector.load %arg1[%c0_35, %c0_36, %c32, %c0_37] : memref<1x4x64x8xbf16, #tpu.memory_space<vmem>>, vector<1x1x8x8xbf16>
    %45 = vector.shape_cast %44 : vector<1x1x8x8xbf16> to vector<8x8xbf16>
    %cst_38 = arith.constant dense<0.000000e+00> : vector<8x4xf32>
    %46 = tpu.matmul %45, %2, %cst_38 {dimension_numbers = #tpu.dot_dimension_numbers<[1], [0], [0], [1], [0, 0, 1, 1], [], []>} : vector<8x8xbf16>, vector<8x4xbf16>, vector<8x4xf32> -> vector<8x4xf32>
    %47 = vector.broadcast %3 : vector<1x4xf32> to vector<8x4xf32>
    %48 = arith.addf %46, %47 : vector<8x4xf32>
    %cst_39 = arith.constant 0.000000e+00 : f32
    %49 = vector.broadcast %cst_39 : f32 to vector<8x4xf32>
    %50 = arith.maximumf %48, %49 : vector<8x4xf32>
    %c3_40 = arith.constant 3 : index
    %c36 = arith.constant 36 : index
    %c0_41 = arith.constant 0 : index
    %51 = vector.load %arg7[%c3_40, %c36, %c0_41] : memref<4x82x4xf32, #tpu.memory_space<vmem>>, vector<1x8x4xf32>
    %52 = vector.shape_cast %51 : vector<1x8x4xf32> to vector<8x4xf32>
    %53 = vector.shape_cast %50 : vector<8x4xf32> to vector<1x8x4xf32>
    tpu.vector_store %arg7[%c3_40, %c36, %c0_41], %53 {strides = array<i32>} : memref<4x82x4xf32, #tpu.memory_space<vmem>>, vector<1x8x4xf32>,
    %c0_42 = arith.constant 0 : index
    %c0_43 = arith.constant 0 : index
    %c40 = arith.constant 40 : index
    %c0_44 = arith.constant 0 : index
    %54 = vector.load %arg1[%c0_42, %c0_43, %c40, %c0_44] : memref<1x4x64x8xbf16, #tpu.memory_space<vmem>>, vector<1x1x8x8xbf16>
    %55 = vector.shape_cast %54 : vector<1x1x8x8xbf16> to vector<8x8xbf16>
    %cst_45 = arith.constant dense<0.000000e+00> : vector<8x4xf32>
    %56 = tpu.matmul %55, %2, %cst_45 {dimension_numbers = #tpu.dot_dimension_numbers<[1], [0], [0], [1], [0, 0, 1, 1], [], []>} : vector<8x8xbf16>, vector<8x4xbf16>, vector<8x4xf32> -> vector<8x4xf32>
    %57 = vector.broadcast %3 : vector<1x4xf32> to vector<8x4xf32>
    %58 = arith.addf %56, %57 : vector<8x4xf32>
    %cst_46 = arith.constant 0.000000e+00 : f32
    %59 = vector.broadcast %cst_46 : f32 to vector<8x4xf32>
    %60 = arith.maximumf %58, %59 : vector<8x4xf32>
    %c3_47 = arith.constant 3 : index
    %c45 = arith.constant 45 : index
    %c0_48 = arith.constant 0 : index
    %61 = vector.load %arg7[%c3_47, %c45, %c0_48] : memref<4x82x4xf32, #tpu.memory_space<vmem>>, vector<1x8x4xf32>
    %62 = vector.shape_cast %61 : vector<1x8x4xf32> to vector<8x4xf32>
    %63 = vector.shape_cast %60 : vector<8x4xf32> to vector<1x8x4xf32>
    tpu.vector_store %arg7[%c3_47, %c45, %c0_48], %63 {strides = array<i32>} : memref<4x82x4xf32, #tpu.memory_space<vmem>>, vector<1x8x4xf32>,
    %c0_49 = arith.constant 0 : index
    %c0_50 = arith.constant 0 : index
    %c48 = arith.constant 48 : index
    %c0_51 = arith.constant 0 : index
    %64 = vector.load %arg1[%c0_49, %c0_50, %c48, %c0_51] : memref<1x4x64x8xbf16, #tpu.memory_space<vmem>>, vector<1x1x8x8xbf16>
    %65 = vector.shape_cast %64 : vector<1x1x8x8xbf16> to vector<8x8xbf16>
    %cst_52 = arith.constant dense<0.000000e+00> : vector<8x4xf32>
    %66 = tpu.matmul %65, %2, %cst_52 {dimension_numbers = #tpu.dot_dimension_numbers<[1], [0], [0], [1], [0, 0, 1, 1], [], []>} : vector<8x8xbf16>, vector<8x4xbf16>, vector<8x4xf32> -> vector<8x4xf32>
    %67 = vector.broadcast %3 : vector<1x4xf32> to vector<8x4xf32>
    %68 = arith.addf %66, %67 : vector<8x4xf32>
    %cst_53 = arith.constant 0.000000e+00 : f32
    %69 = vector.broadcast %cst_53 : f32 to vector<8x4xf32>
    %70 = arith.maximumf %68, %69 : vector<8x4xf32>
    %c3_54 = arith.constant 3 : index
    %c54 = arith.constant 54 : index
    %c0_55 = arith.constant 0 : index
    %71 = vector.load %arg7[%c3_54, %c54, %c0_55] : memref<4x82x4xf32, #tpu.memory_space<vmem>>, vector<1x8x4xf32>
    %72 = vector.shape_cast %71 : vector<1x8x4xf32> to vector<8x4xf32>
    %73 = vector.shape_cast %70 : vector<8x4xf32> to vector<1x8x4xf32>
    tpu.vector_store %arg7[%c3_54, %c54, %c0_55], %73 {strides = array<i32>} : memref<4x82x4xf32, #tpu.memory_space<vmem>>, vector<1x8x4xf32>,
    %c0_56 = arith.constant 0 : index
    %c0_57 = arith.constant 0 : index
    %c56 = arith.constant 56 : index
    %c0_58 = arith.constant 0 : index
    %74 = vector.load %arg1[%c0_56, %c0_57, %c56, %c0_58] : memref<1x4x64x8xbf16, #tpu.memory_space<vmem>>, vector<1x1x8x8xbf16>
    %75 = vector.shape_cast %74 : vector<1x1x8x8xbf16> to vector<8x8xbf16>
    %cst_59 = arith.constant dense<0.000000e+00> : vector<8x4xf32>
    %76 = tpu.matmul %75, %2, %cst_59 {dimension_numbers = #tpu.dot_dimension_numbers<[1], [0], [0], [1], [0, 0, 1, 1], [], []>} : vector<8x8xbf16>, vector<8x4xbf16>, vector<8x4xf32> -> vector<8x4xf32>
    %77 = vector.broadcast %3 : vector<1x4xf32> to vector<8x4xf32>
    %78 = arith.addf %76, %77 : vector<8x4xf32>
    %cst_60 = arith.constant 0.000000e+00 : f32
    %79 = vector.broadcast %cst_60 : f32 to vector<8x4xf32>
    %80 = arith.maximumf %78, %79 : vector<8x4xf32>
    %c3_61 = arith.constant 3 : index
    %c63 = arith.constant 63 : index
    %c0_62 = arith.constant 0 : index
    %81 = vector.load %arg7[%c3_61, %c63, %c0_62] : memref<4x82x4xf32, #tpu.memory_space<vmem>>, vector<1x8x4xf32>
    %82 = vector.shape_cast %81 : vector<1x8x4xf32> to vector<8x4xf32>
    %83 = vector.shape_cast %80 : vector<8x4xf32> to vector<1x8x4xf32>
    tpu.vector_store %arg7[%c3_61, %c63, %c0_62], %83 {strides = array<i32>} : memref<4x82x4xf32, #tpu.memory_space<vmem>>, vector<1x8x4xf32>,
    %c0_63 = arith.constant 0 : index
    %c1 = arith.constant 1 : index
    %c0_64 = arith.constant 0 : index
    %c0_65 = arith.constant 0 : index
    %84 = vector.load %arg1[%c0_63, %c1, %c0_64, %c0_65] : memref<1x4x64x8xbf16, #tpu.memory_space<vmem>>, vector<1x1x8x8xbf16>
    %85 = vector.shape_cast %84 : vector<1x1x8x8xbf16> to vector<8x8xbf16>
    %cst_66 = arith.constant dense<0.000000e+00> : vector<8x4xf32>
    %86 = tpu.matmul %85, %2, %cst_66 {dimension_numbers = #tpu.dot_dimension_numbers<[1], [0], [0], [1], [0, 0, 1, 1], [], []>} : vector<8x8xbf16>, vector<8x4xbf16>, vector<8x4xf32> -> vector<8x4xf32>
    %87 = vector.broadcast %3 : vector<1x4xf32> to vector<8x4xf32>
    %88 = arith.addf %86, %87 : vector<8x4xf32>
    %cst_67 = arith.constant 0.000000e+00 : f32
    %89 = vector.broadcast %cst_67 : f32 to vector<8x4xf32>
    %90 = arith.maximumf %88, %89 : vector<8x4xf32>
    %c2 = arith.constant 2 : index
    %c1_68 = arith.constant 1 : index
    %c0_69 = arith.constant 0 : index
    %91 = vector.load %arg7[%c2, %c1_68, %c0_69] : memref<4x82x4xf32, #tpu.memory_space<vmem>>, vector<1x8x4xf32>
    %92 = vector.shape_cast %91 : vector<1x8x4xf32> to vector<8x4xf32>
    %93 = vector.shape_cast %90 : vector<8x4xf32> to vector<1x8x4xf32>
    tpu.vector_store %arg7[%c2, %c1_68, %c0_69], %93 {strides = array<i32>} : memref<4x82x4xf32, #tpu.memory_space<vmem>>, vector<1x8x4xf32>,
    %c0_70 = arith.constant 0 : index
    %c1_71 = arith.constant 1 : index
    %c8_72 = arith.constant 8 : index
    %c0_73 = arith.constant 0 : index
    %94 = vector.load %arg1[%c0_70, %c1_71, %c8_72, %c0_73] : memref<1x4x64x8xbf16, #tpu.memory_space<vmem>>, vector<1x1x8x8xbf16>
    %95 = vector.shape_cast %94 : vector<1x1x8x8xbf16> to vector<8x8xbf16>
    %cst_74 = arith.constant dense<0.000000e+00> : vector<8x4xf32>
    %96 = tpu.matmul %95, %2, %cst_74 {dimension_numbers = #tpu.dot_dimension_numbers<[1], [0], [0], [1], [0, 0, 1, 1], [], []>} : vector<8x8xbf16>, vector<8x4xbf16>, vector<8x4xf32> -> vector<8x4xf32>
    %97 = vector.broadcast %3 : vector<1x4xf32> to vector<8x4xf32>
    %98 = arith.addf %96, %97 : vector<8x4xf32>
    %cst_75 = arith.constant 0.000000e+00 : f32
    %99 = vector.broadcast %cst_75 : f32 to vector<8x4xf32>
    %100 = arith.maximumf %98, %99 : vector<8x4xf32>
    %c2_76 = arith.constant 2 : index
    %c10 = arith.constant 10 : index
    %c0_77 = arith.constant 0 : index
    %101 = vector.load %arg7[%c2_76, %c10, %c0_77] : memref<4x82x4xf32, #tpu.memory_space<vmem>>, vector<1x8x4xf32>
    %102 = vector.shape_cast %101 : vector<1x8x4xf32> to vector<8x4xf32>
    %103 = vector.shape_cast %100 : vector<8x4xf32> to vector<1x8x4xf32>
    tpu.vector_store %arg7[%c2_76, %c10, %c0_77], %103 {strides = array<i32>} : memref<4x82x4xf32, #tpu.memory_space<vmem>>, vector<1x8x4xf32>,
    %c0_78 = arith.constant 0 : index
    %c1_79 = arith.constant 1 : index
    %c16_80 = arith.constant 16 : index
    %c0_81 = arith.constant 0 : index
    %104 = vector.load %arg1[%c0_78, %c1_79, %c16_80, %c0_81] : memref<1x4x64x8xbf16, #tpu.memory_space<vmem>>, vector<1x1x8x8xbf16>
    %105 = vector.shape_cast %104 : vector<1x1x8x8xbf16> to vector<8x8xbf16>
    %cst_82 = arith.constant dense<0.000000e+00> : vector<8x4xf32>
    %106 = tpu.matmul %105, %2, %cst_82 {dimension_numbers = #tpu.dot_dimension_numbers<[1], [0], [0], [1], [0, 0, 1, 1], [], []>} : vector<8x8xbf16>, vector<8x4xbf16>, vector<8x4xf32> -> vector<8x4xf32>
    %107 = vector.broadcast %3 : vector<1x4xf32> to vector<8x4xf32>
    %108 = arith.addf %106, %107 : vector<8x4xf32>
    %cst_83 = arith.constant 0.000000e+00 : f32
    %109 = vector.broadcast %cst_83 : f32 to vector<8x4xf32>
    %110 = arith.maximumf %108, %109 : vector<8x4xf32>
    %c2_84 = arith.constant 2 : index
    %c19 = arith.constant 19 : index
    %c0_85 = arith.constant 0 : index
    %111 = vector.load %arg7[%c2_84, %c19, %c0_85] : memref<4x82x4xf32, #tpu.memory_space<vmem>>, vector<1x8x4xf32>
    %112 = vector.shape_cast %111 : vector<1x8x4xf32> to vector<8x4xf32>
    %113 = vector.shape_cast %110 : vector<8x4xf32> to vector<1x8x4xf32>
    tpu.vector_store %arg7[%c2_84, %c19, %c0_85], %113 {strides = array<i32>} : memref<4x82x4xf32, #tpu.memory_space<vmem>>, vector<1x8x4xf32>,
    %c0_86 = arith.constant 0 : index
    %c1_87 = arith.constant 1 : index
    %c24_88 = arith.constant 24 : index
    %c0_89 = arith.constant 0 : index
    %114 = vector.load %arg1[%c0_86, %c1_87, %c24_88, %c0_89] : memref<1x4x64x8xbf16, #tpu.memory_space<vmem>>, vector<1x1x8x8xbf16>
    %115 = vector.shape_cast %114 : vector<1x1x8x8xbf16> to vector<8x8xbf16>
    %cst_90 = arith.constant dense<0.000000e+00> : vector<8x4xf32>
    %116 = tpu.matmul %115, %2, %cst_90 {dimension_numbers = #tpu.dot_dimension_numbers<[1], [0], [0], [1], [0, 0, 1, 1], [], []>} : vector<8x8xbf16>, vector<8x4xbf16>, vector<8x4xf32> -> vector<8x4xf32>
    %117 = vector.broadcast %3 : vector<1x4xf32> to vector<8x4xf32>
    %118 = arith.addf %116, %117 : vector<8x4xf32>
    %cst_91 = arith.constant 0.000000e+00 : f32
    %119 = vector.broadcast %cst_91 : f32 to vector<8x4xf32>
    %120 = arith.maximumf %118, %119 : vector<8x4xf32>
    %c2_92 = arith.constant 2 : index
    %c28 = arith.constant 28 : index
    %c0_93 = arith.constant 0 : index
    %121 = vector.load %arg7[%c2_92, %c28, %c0_93] : memref<4x82x4xf32, #tpu.memory_space<vmem>>, vector<1x8x4xf32>
    %122 = vector.shape_cast %121 : vector<1x8x4xf32> to vector<8x4xf32>
    %123 = vector.shape_cast %120 : vector<8x4xf32> to vector<1x8x4xf32>
    tpu.vector_store %arg7[%c2_92, %c28, %c0_93], %123 {strides = array<i32>} : memref<4x82x4xf32, #tpu.memory_space<vmem>>, vector<1x8x4xf32>,
    %c0_94 = arith.constant 0 : index
    %c1_95 = arith.constant 1 : index
    %c32_96 = arith.constant 32 : index
    %c0_97 = arith.constant 0 : index
    %124 = vector.load %arg1[%c0_94, %c1_95, %c32_96, %c0_97] : memref<1x4x64x8xbf16, #tpu.memory_space<vmem>>, vector<1x1x8x8xbf16>
    %125 = vector.shape_cast %124 : vector<1x1x8x8xbf16> to vector<8x8xbf16>
    %cst_98 = arith.constant dense<0.000000e+00> : vector<8x4xf32>
    %126 = tpu.matmul %125, %2, %cst_98 {dimension_numbers = #tpu.dot_dimension_numbers<[1], [0], [0], [1], [0, 0, 1, 1], [], []>} : vector<8x8xbf16>, vector<8x4xbf16>, vector<8x4xf32> -> vector<8x4xf32>
    %127 = vector.broadcast %3 : vector<1x4xf32> to vector<8x4xf32>
    %128 = arith.addf %126, %127 : vector<8x4xf32>
    %cst_99 = arith.constant 0.000000e+00 : f32
    %129 = vector.broadcast %cst_99 : f32 to vector<8x4xf32>
    %130 = arith.maximumf %128, %129 : vector<8x4xf32>
    %c2_100 = arith.constant 2 : index
    %c37 = arith.constant 37 : index
    %c0_101 = arith.constant 0 : index
    %131 = vector.load %arg7[%c2_100, %c37, %c0_101] : memref<4x82x4xf32, #tpu.memory_space<vmem>>, vector<1x8x4xf32>
    %132 = vector.shape_cast %131 : vector<1x8x4xf32> to vector<8x4xf32>
    %133 = vector.shape_cast %130 : vector<8x4xf32> to vector<1x8x4xf32>
    tpu.vector_store %arg7[%c2_100, %c37, %c0_101], %133 {strides = array<i32>} : memref<4x82x4xf32, #tpu.memory_space<vmem>>, vector<1x8x4xf32>,
    %c0_102 = arith.constant 0 : index
    %c1_103 = arith.constant 1 : index
    %c40_104 = arith.constant 40 : index
    %c0_105 = arith.constant 0 : index
    %134 = vector.load %arg1[%c0_102, %c1_103, %c40_104, %c0_105] : memref<1x4x64x8xbf16, #tpu.memory_space<vmem>>, vector<1x1x8x8xbf16>
    %135 = vector.shape_cast %134 : vector<1x1x8x8xbf16> to vector<8x8xbf16>
    %cst_106 = arith.constant dense<0.000000e+00> : vector<8x4xf32>
    %136 = tpu.matmul %135, %2, %cst_106 {dimension_numbers = #tpu.dot_dimension_numbers<[1], [0], [0], [1], [0, 0, 1, 1], [], []>} : vector<8x8xbf16>, vector<8x4xbf16>, vector<8x4xf32> -> vector<8x4xf32>
    %137 = vector.broadcast %3 : vector<1x4xf32> to vector<8x4xf32>
    %138 = arith.addf %136, %137 : vector<8x4xf32>
    %cst_107 = arith.constant 0.000000e+00 : f32
    %139 = vector.broadcast %cst_107 : f32 to vector<8x4xf32>
    %140 = arith.maximumf %138, %139 : vector<8x4xf32>
    %c2_108 = arith.constant 2 : index
    %c46 = arith.constant 46 : index
    %c0_109 = arith.constant 0 : index
    %141 = vector.load %arg7[%c2_108, %c46, %c0_109] : memref<4x82x4xf32, #tpu.memory_space<vmem>>, vector<1x8x4xf32>
    %142 = vector.shape_cast %141 : vector<1x8x4xf32> to vector<8x4xf32>
    %143 = vector.shape_cast %140 : vector<8x4xf32> to vector<1x8x4xf32>
    tpu.vector_store %arg7[%c2_108, %c46, %c0_109], %143 {strides = array<i32>} : memref<4x82x4xf32, #tpu.memory_space<vmem>>, vector<1x8x4xf32>,
    %c0_110 = arith.constant 0 : index
    %c1_111 = arith.constant 1 : index
    %c48_112 = arith.constant 48 : index
    %c0_113 = arith.constant 0 : index
    %144 = vector.load %arg1[%c0_110, %c1_111, %c48_112, %c0_113] : memref<1x4x64x8xbf16, #tpu.memory_space<vmem>>, vector<1x1x8x8xbf16>
    %145 = vector.shape_cast %144 : vector<1x1x8x8xbf16> to vector<8x8xbf16>
    %cst_114 = arith.constant dense<0.000000e+00> : vector<8x4xf32>
    %146 = tpu.matmul %145, %2, %cst_114 {dimension_numbers = #tpu.dot_dimension_numbers<[1], [0], [0], [1], [0, 0, 1, 1], [], []>} : vector<8x8xbf16>, vector<8x4xbf16>, vector<8x4xf32> -> vector<8x4xf32>
    %147 = vector.broadcast %3 : vector<1x4xf32> to vector<8x4xf32>
    %148 = arith.addf %146, %147 : vector<8x4xf32>
    %cst_115 = arith.constant 0.000000e+00 : f32
    %149 = vector.broadcast %cst_115 : f32 to vector<8x4xf32>
    %150 = arith.maximumf %148, %149 : vector<8x4xf32>
    %c2_116 = arith.constant 2 : index
    %c55 = arith.constant 55 : index
    %c0_117 = arith.constant 0 : index
    %151 = vector.load %arg7[%c2_116, %c55, %c0_117] : memref<4x82x4xf32, #tpu.memory_space<vmem>>, vector<1x8x4xf32>
    %152 = vector.shape_cast %151 : vector<1x8x4xf32> to vector<8x4xf32>
    %153 = vector.shape_cast %150 : vector<8x4xf32> to vector<1x8x4xf32>
    tpu.vector_store %arg7[%c2_116, %c55, %c0_117], %153 {strides = array<i32>} : memref<4x82x4xf32, #tpu.memory_space<vmem>>, vector<1x8x4xf32>,
    %c0_118 = arith.constant 0 : index
    %c1_119 = arith.constant 1 : index
    %c56_120 = arith.constant 56 : index
    %c0_121 = arith.constant 0 : index
    %154 = vector.load %arg1[%c0_118, %c1_119, %c56_120, %c0_121] : memref<1x4x64x8xbf16, #tpu.memory_space<vmem>>, vector<1x1x8x8xbf16>
    %155 = vector.shape_cast %154 : vector<1x1x8x8xbf16> to vector<8x8xbf16>
    %cst_122 = arith.constant dense<0.000000e+00> : vector<8x4xf32>
    %156 = tpu.matmul %155, %2, %cst_122 {dimension_numbers = #tpu.dot_dimension_numbers<[1], [0], [0], [1], [0, 0, 1, 1], [], []>} : vector<8x8xbf16>, vector<8x4xbf16>, vector<8x4xf32> -> vector<8x4xf32>
    %157 = vector.broadcast %3 : vector<1x4xf32> to vector<8x4xf32>
    %158 = arith.addf %156, %157 : vector<8x4xf32>
    %cst_123 = arith.constant 0.000000e+00 : f32
    %159 = vector.broadcast %cst_123 : f32 to vector<8x4xf32>
    %160 = arith.maximumf %158, %159 : vector<8x4xf32>
    %c2_124 = arith.constant 2 : index
    %c64 = arith.constant 64 : index
    %c0_125 = arith.constant 0 : index
    %161 = vector.load %arg7[%c2_124, %c64, %c0_125] : memref<4x82x4xf32, #tpu.memory_space<vmem>>, vector<1x8x4xf32>
    %162 = vector.shape_cast %161 : vector<1x8x4xf32> to vector<8x4xf32>
    %163 = vector.shape_cast %160 : vector<8x4xf32> to vector<1x8x4xf32>
    tpu.vector_store %arg7[%c2_124, %c64, %c0_125], %163 {strides = array<i32>} : memref<4x82x4xf32, #tpu.memory_space<vmem>>, vector<1x8x4xf32>,
    %c0_126 = arith.constant 0 : index
    %c2_127 = arith.constant 2 : index
    %c0_128 = arith.constant 0 : index
    %c0_129 = arith.constant 0 : index
    %164 = vector.load %arg1[%c0_126, %c2_127, %c0_128, %c0_129] : memref<1x4x64x8xbf16, #tpu.memory_space<vmem>>, vector<1x1x8x8xbf16>
    %165 = vector.shape_cast %164 : vector<1x1x8x8xbf16> to vector<8x8xbf16>
    %cst_130 = arith.constant dense<0.000000e+00> : vector<8x4xf32>
    %166 = tpu.matmul %165, %2, %cst_130 {dimension_numbers = #tpu.dot_dimension_numbers<[1], [0], [0], [1], [0, 0, 1, 1], [], []>} : vector<8x8xbf16>, vector<8x4xbf16>, vector<8x4xf32> -> vector<8x4xf32>
    %167 = vector.broadcast %3 : vector<1x4xf32> to vector<8x4xf32>
    %168 = arith.addf %166, %167 : vector<8x4xf32>
    %cst_131 = arith.constant 0.000000e+00 : f32
    %169 = vector.broadcast %cst_131 : f32 to vector<8x4xf32>
    %170 = arith.maximumf %168, %169 : vector<8x4xf32>
    %c1_132 = arith.constant 1 : index
    %c9_133 = arith.constant 9 : index
    %c0_134 = arith.constant 0 : index
    %171 = vector.load %arg7[%c1_132, %c9_133, %c0_134] : memref<4x82x4xf32, #tpu.memory_space<vmem>>, vector<1x8x4xf32>
    %172 = vector.shape_cast %171 : vector<1x8x4xf32> to vector<8x4xf32>
    %173 = vector.shape_cast %170 : vector<8x4xf32> to vector<1x8x4xf32>
    tpu.vector_store %arg7[%c1_132, %c9_133, %c0_134], %173 {strides = array<i32>} : memref<4x82x4xf32, #tpu.memory_space<vmem>>, vector<1x8x4xf32>,
    %c0_135 = arith.constant 0 : index
    %c2_136 = arith.constant 2 : index
    %c8_137 = arith.constant 8 : index
    %c0_138 = arith.constant 0 : index
    %174 = vector.load %arg1[%c0_135, %c2_136, %c8_137, %c0_138] : memref<1x4x64x8xbf16, #tpu.memory_space<vmem>>, vector<1x1x8x8xbf16>
    %175 = vector.shape_cast %174 : vector<1x1x8x8xbf16> to vector<8x8xbf16>
    %cst_139 = arith.constant dense<0.000000e+00> : vector<8x4xf32>
    %176 = tpu.matmul %175, %2, %cst_139 {dimension_numbers = #tpu.dot_dimension_numbers<[1], [0], [0], [1], [0, 0, 1, 1], [], []>} : vector<8x8xbf16>, vector<8x4xbf16>, vector<8x4xf32> -> vector<8x4xf32>
    %177 = vector.broadcast %3 : vector<1x4xf32> to vector<8x4xf32>
    %178 = arith.addf %176, %177 : vector<8x4xf32>
    %cst_140 = arith.constant 0.000000e+00 : f32
    %179 = vector.broadcast %cst_140 : f32 to vector<8x4xf32>
    %180 = arith.maximumf %178, %179 : vector<8x4xf32>
    %c1_141 = arith.constant 1 : index
    %c18_142 = arith.constant 18 : index
    %c0_143 = arith.constant 0 : index
    %181 = vector.load %arg7[%c1_141, %c18_142, %c0_143] : memref<4x82x4xf32, #tpu.memory_space<vmem>>, vector<1x8x4xf32>
    %182 = vector.shape_cast %181 : vector<1x8x4xf32> to vector<8x4xf32>
    %183 = vector.shape_cast %180 : vector<8x4xf32> to vector<1x8x4xf32>
    tpu.vector_store %arg7[%c1_141, %c18_142, %c0_143], %183 {strides = array<i32>} : memref<4x82x4xf32, #tpu.memory_space<vmem>>, vector<1x8x4xf32>,
    %c0_144 = arith.constant 0 : index
    %c2_145 = arith.constant 2 : index
    %c16_146 = arith.constant 16 : index
    %c0_147 = arith.constant 0 : index
    %184 = vector.load %arg1[%c0_144, %c2_145, %c16_146, %c0_147] : memref<1x4x64x8xbf16, #tpu.memory_space<vmem>>, vector<1x1x8x8xbf16>
    %185 = vector.shape_cast %184 : vector<1x1x8x8xbf16> to vector<8x8xbf16>
    %cst_148 = arith.constant dense<0.000000e+00> : vector<8x4xf32>
    %186 = tpu.matmul %185, %2, %cst_148 {dimension_numbers = #tpu.dot_dimension_numbers<[1], [0], [0], [1], [0, 0, 1, 1], [], []>} : vector<8x8xbf16>, vector<8x4xbf16>, vector<8x4xf32> -> vector<8x4xf32>
    %187 = vector.broadcast %3 : vector<1x4xf32> to vector<8x4xf32>
    %188 = arith.addf %186, %187 : vector<8x4xf32>
    %cst_149 = arith.constant 0.000000e+00 : f32
    %189 = vector.broadcast %cst_149 : f32 to vector<8x4xf32>
    %190 = arith.maximumf %188, %189 : vector<8x4xf32>
    %c1_150 = arith.constant 1 : index
    %c27_151 = arith.constant 27 : index
    %c0_152 = arith.constant 0 : index
    %191 = vector.load %arg7[%c1_150, %c27_151, %c0_152] : memref<4x82x4xf32, #tpu.memory_space<vmem>>, vector<1x8x4xf32>
    %192 = vector.shape_cast %191 : vector<1x8x4xf32> to vector<8x4xf32>
    %193 = vector.shape_cast %190 : vector<8x4xf32> to vector<1x8x4xf32>
    tpu.vector_store %arg7[%c1_150, %c27_151, %c0_152], %193 {strides = array<i32>} : memref<4x82x4xf32, #tpu.memory_space<vmem>>, vector<1x8x4xf32>,
    %c0_153 = arith.constant 0 : index
    %c2_154 = arith.constant 2 : index
    %c24_155 = arith.constant 24 : index
    %c0_156 = arith.constant 0 : index
    %194 = vector.load %arg1[%c0_153, %c2_154, %c24_155, %c0_156] : memref<1x4x64x8xbf16, #tpu.memory_space<vmem>>, vector<1x1x8x8xbf16>
    %195 = vector.shape_cast %194 : vector<1x1x8x8xbf16> to vector<8x8xbf16>
    %cst_157 = arith.constant dense<0.000000e+00> : vector<8x4xf32>
    %196 = tpu.matmul %195, %2, %cst_157 {dimension_numbers = #tpu.dot_dimension_numbers<[1], [0], [0], [1], [0, 0, 1, 1], [], []>} : vector<8x8xbf16>, vector<8x4xbf16>, vector<8x4xf32> -> vector<8x4xf32>
    %197 = vector.broadcast %3 : vector<1x4xf32> to vector<8x4xf32>
    %198 = arith.addf %196, %197 : vector<8x4xf32>
    %cst_158 = arith.constant 0.000000e+00 : f32
    %199 = vector.broadcast %cst_158 : f32 to vector<8x4xf32>
    %200 = arith.maximumf %198, %199 : vector<8x4xf32>
    %c1_159 = arith.constant 1 : index
    %c36_160 = arith.constant 36 : index
    %c0_161 = arith.constant 0 : index
    %201 = vector.load %arg7[%c1_159, %c36_160, %c0_161] : memref<4x82x4xf32, #tpu.memory_space<vmem>>, vector<1x8x4xf32>
    %202 = vector.shape_cast %201 : vector<1x8x4xf32> to vector<8x4xf32>
    %203 = vector.shape_cast %200 : vector<8x4xf32> to vector<1x8x4xf32>
    tpu.vector_store %arg7[%c1_159, %c36_160, %c0_161], %203 {strides = array<i32>} : memref<4x82x4xf32, #tpu.memory_space<vmem>>, vector<1x8x4xf32>,
    %c0_162 = arith.constant 0 : index
    %c2_163 = arith.constant 2 : index
    %c32_164 = arith.constant 32 : index
    %c0_165 = arith.constant 0 : index
    %204 = vector.load %arg1[%c0_162, %c2_163, %c32_164, %c0_165] : memref<1x4x64x8xbf16, #tpu.memory_space<vmem>>, vector<1x1x8x8xbf16>
    %205 = vector.shape_cast %204 : vector<1x1x8x8xbf16> to vector<8x8xbf16>
    %cst_166 = arith.constant dense<0.000000e+00> : vector<8x4xf32>
    %206 = tpu.matmul %205, %2, %cst_166 {dimension_numbers = #tpu.dot_dimension_numbers<[1], [0], [0], [1], [0, 0, 1, 1], [], []>} : vector<8x8xbf16>, vector<8x4xbf16>, vector<8x4xf32> -> vector<8x4xf32>
    %207 = vector.broadcast %3 : vector<1x4xf32> to vector<8x4xf32>
    %208 = arith.addf %206, %207 : vector<8x4xf32>
    %cst_167 = arith.constant 0.000000e+00 : f32
    %209 = vector.broadcast %cst_167 : f32 to vector<8x4xf32>
    %210 = arith.maximumf %208, %209 : vector<8x4xf32>
    %c1_168 = arith.constant 1 : index
    %c45_169 = arith.constant 45 : index
    %c0_170 = arith.constant 0 : index
    %211 = vector.load %arg7[%c1_168, %c45_169, %c0_170] : memref<4x82x4xf32, #tpu.memory_space<vmem>>, vector<1x8x4xf32>
    %212 = vector.shape_cast %211 : vector<1x8x4xf32> to vector<8x4xf32>
    %213 = vector.shape_cast %210 : vector<8x4xf32> to vector<1x8x4xf32>
    tpu.vector_store %arg7[%c1_168, %c45_169, %c0_170], %213 {strides = array<i32>} : memref<4x82x4xf32, #tpu.memory_space<vmem>>, vector<1x8x4xf32>,
    %c0_171 = arith.constant 0 : index
    %c2_172 = arith.constant 2 : index
    %c40_173 = arith.constant 40 : index
    %c0_174 = arith.constant 0 : index
    %214 = vector.load %arg1[%c0_171, %c2_172, %c40_173, %c0_174] : memref<1x4x64x8xbf16, #tpu.memory_space<vmem>>, vector<1x1x8x8xbf16>
    %215 = vector.shape_cast %214 : vector<1x1x8x8xbf16> to vector<8x8xbf16>
    %cst_175 = arith.constant dense<0.000000e+00> : vector<8x4xf32>
    %216 = tpu.matmul %215, %2, %cst_175 {dimension_numbers = #tpu.dot_dimension_numbers<[1], [0], [0], [1], [0, 0, 1, 1], [], []>} : vector<8x8xbf16>, vector<8x4xbf16>, vector<8x4xf32> -> vector<8x4xf32>
    %217 = vector.broadcast %3 : vector<1x4xf32> to vector<8x4xf32>
    %218 = arith.addf %216, %217 : vector<8x4xf32>
    %cst_176 = arith.constant 0.000000e+00 : f32
    %219 = vector.broadcast %cst_176 : f32 to vector<8x4xf32>
    %220 = arith.maximumf %218, %219 : vector<8x4xf32>
    %c1_177 = arith.constant 1 : index
    %c54_178 = arith.constant 54 : index
    %c0_179 = arith.constant 0 : index
    %221 = vector.load %arg7[%c1_177, %c54_178, %c0_179] : memref<4x82x4xf32, #tpu.memory_space<vmem>>, vector<1x8x4xf32>
    %222 = vector.shape_cast %221 : vector<1x8x4xf32> to vector<8x4xf32>
    %223 = vector.shape_cast %220 : vector<8x4xf32> to vector<1x8x4xf32>
    tpu.vector_store %arg7[%c1_177, %c54_178, %c0_179], %223 {strides = array<i32>} : memref<4x82x4xf32, #tpu.memory_space<vmem>>, vector<1x8x4xf32>,
    %c0_180 = arith.constant 0 : index
    %c2_181 = arith.constant 2 : index
    %c48_182 = arith.constant 48 : index
    %c0_183 = arith.constant 0 : index
    %224 = vector.load %arg1[%c0_180, %c2_181, %c48_182, %c0_183] : memref<1x4x64x8xbf16, #tpu.memory_space<vmem>>, vector<1x1x8x8xbf16>
    %225 = vector.shape_cast %224 : vector<1x1x8x8xbf16> to vector<8x8xbf16>
    %cst_184 = arith.constant dense<0.000000e+00> : vector<8x4xf32>
    %226 = tpu.matmul %225, %2, %cst_184 {dimension_numbers = #tpu.dot_dimension_numbers<[1], [0], [0], [1], [0, 0, 1, 1], [], []>} : vector<8x8xbf16>, vector<8x4xbf16>, vector<8x4xf32> -> vector<8x4xf32>
    %227 = vector.broadcast %3 : vector<1x4xf32> to vector<8x4xf32>
    %228 = arith.addf %226, %227 : vector<8x4xf32>
    %cst_185 = arith.constant 0.000000e+00 : f32
    %229 = vector.broadcast %cst_185 : f32 to vector<8x4xf32>
    %230 = arith.maximumf %228, %229 : vector<8x4xf32>
    %c1_186 = arith.constant 1 : index
    %c63_187 = arith.constant 63 : index
    %c0_188 = arith.constant 0 : index
    %231 = vector.load %arg7[%c1_186, %c63_187, %c0_188] : memref<4x82x4xf32, #tpu.memory_space<vmem>>, vector<1x8x4xf32>
    %232 = vector.shape_cast %231 : vector<1x8x4xf32> to vector<8x4xf32>
    %233 = vector.shape_cast %230 : vector<8x4xf32> to vector<1x8x4xf32>
    tpu.vector_store %arg7[%c1_186, %c63_187, %c0_188], %233 {strides = array<i32>} : memref<4x82x4xf32, #tpu.memory_space<vmem>>, vector<1x8x4xf32>,
    %c0_189 = arith.constant 0 : index
    %c2_190 = arith.constant 2 : index
    %c56_191 = arith.constant 56 : index
    %c0_192 = arith.constant 0 : index
    %234 = vector.load %arg1[%c0_189, %c2_190, %c56_191, %c0_192] : memref<1x4x64x8xbf16, #tpu.memory_space<vmem>>, vector<1x1x8x8xbf16>
    %235 = vector.shape_cast %234 : vector<1x1x8x8xbf16> to vector<8x8xbf16>
    %cst_193 = arith.constant dense<0.000000e+00> : vector<8x4xf32>
    %236 = tpu.matmul %235, %2, %cst_193 {dimension_numbers = #tpu.dot_dimension_numbers<[1], [0], [0], [1], [0, 0, 1, 1], [], []>} : vector<8x8xbf16>, vector<8x4xbf16>, vector<8x4xf32> -> vector<8x4xf32>
    %237 = vector.broadcast %3 : vector<1x4xf32> to vector<8x4xf32>
    %238 = arith.addf %236, %237 : vector<8x4xf32>
    %cst_194 = arith.constant 0.000000e+00 : f32
    %239 = vector.broadcast %cst_194 : f32 to vector<8x4xf32>
    %240 = arith.maximumf %238, %239 : vector<8x4xf32>
    %c1_195 = arith.constant 1 : index
    %c72 = arith.constant 72 : index
    %c0_196 = arith.constant 0 : index
    %241 = vector.load %arg7[%c1_195, %c72, %c0_196] : memref<4x82x4xf32, #tpu.memory_space<vmem>>, vector<1x8x4xf32>
    %242 = vector.shape_cast %241 : vector<1x8x4xf32> to vector<8x4xf32>
    %243 = vector.shape_cast %240 : vector<8x4xf32> to vector<1x8x4xf32>
    tpu.vector_store %arg7[%c1_195, %c72, %c0_196], %243 {strides = array<i32>} : memref<4x82x4xf32, #tpu.memory_space<vmem>>, vector<1x8x4xf32>,
    %c0_197 = arith.constant 0 : index
    %c3_198 = arith.constant 3 : index
    %c0_199 = arith.constant 0 : index
    %c0_200 = arith.constant 0 : index
    %244 = vector.load %arg1[%c0_197, %c3_198, %c0_199, %c0_200] : memref<1x4x64x8xbf16, #tpu.memory_space<vmem>>, vector<1x1x8x8xbf16>
    %245 = vector.shape_cast %244 : vector<1x1x8x8xbf16> to vector<8x8xbf16>
    %cst_201 = arith.constant dense<0.000000e+00> : vector<8x4xf32>
    %246 = tpu.matmul %245, %2, %cst_201 {dimension_numbers = #tpu.dot_dimension_numbers<[1], [0], [0], [1], [0, 0, 1, 1], [], []>} : vector<8x8xbf16>, vector<8x4xbf16>, vector<8x4xf32> -> vector<8x4xf32>
    %247 = vector.broadcast %3 : vector<1x4xf32> to vector<8x4xf32>
    %248 = arith.addf %246, %247 : vector<8x4xf32>
    %cst_202 = arith.constant 0.000000e+00 : f32
    %249 = vector.broadcast %cst_202 : f32 to vector<8x4xf32>
    %250 = arith.maximumf %248, %249 : vector<8x4xf32>
    %c0_203 = arith.constant 0 : index
    %c10_204 = arith.constant 10 : index
    %c0_205 = arith.constant 0 : index
    %251 = vector.load %arg7[%c0_203, %c10_204, %c0_205] : memref<4x82x4xf32, #tpu.memory_space<vmem>>, vector<1x8x4xf32>
    %252 = vector.shape_cast %251 : vector<1x8x4xf32> to vector<8x4xf32>
    %253 = vector.shape_cast %250 : vector<8x4xf32> to vector<1x8x4xf32>
    tpu.vector_store %arg7[%c0_203, %c10_204, %c0_205], %253 {strides = array<i32>} : memref<4x82x4xf32, #tpu.memory_space<vmem>>, vector<1x8x4xf32>,
    %c0_206 = arith.constant 0 : index
    %c3_207 = arith.constant 3 : index
    %c8_208 = arith.constant 8 : index
    %c0_209 = arith.constant 0 : index
    %254 = vector.load %arg1[%c0_206, %c3_207, %c8_208, %c0_209] : memref<1x4x64x8xbf16, #tpu.memory_space<vmem>>, vector<1x1x8x8xbf16>
    %255 = vector.shape_cast %254 : vector<1x1x8x8xbf16> to vector<8x8xbf16>
    %cst_210 = arith.constant dense<0.000000e+00> : vector<8x4xf32>
    %256 = tpu.matmul %255, %2, %cst_210 {dimension_numbers = #tpu.dot_dimension_numbers<[1], [0], [0], [1], [0, 0, 1, 1], [], []>} : vector<8x8xbf16>, vector<8x4xbf16>, vector<8x4xf32> -> vector<8x4xf32>
    %257 = vector.broadcast %3 : vector<1x4xf32> to vector<8x4xf32>
    %258 = arith.addf %256, %257 : vector<8x4xf32>
    %cst_211 = arith.constant 0.000000e+00 : f32
    %259 = vector.broadcast %cst_211 : f32 to vector<8x4xf32>
    %260 = arith.maximumf %258, %259 : vector<8x4xf32>
    %c0_212 = arith.constant 0 : index
    %c19_213 = arith.constant 19 : index
    %c0_214 = arith.constant 0 : index
    %261 = vector.load %arg7[%c0_212, %c19_213, %c0_214] : memref<4x82x4xf32, #tpu.memory_space<vmem>>, vector<1x8x4xf32>
    %262 = vector.shape_cast %261 : vector<1x8x4xf32> to vector<8x4xf32>
    %263 = vector.shape_cast %260 : vector<8x4xf32> to vector<1x8x4xf32>
    tpu.vector_store %arg7[%c0_212, %c19_213, %c0_214], %263 {strides = array<i32>} : memref<4x82x4xf32, #tpu.memory_space<vmem>>, vector<1x8x4xf32>,
    %c0_215 = arith.constant 0 : index
    %c3_216 = arith.constant 3 : index
    %c16_217 = arith.constant 16 : index
    %c0_218 = arith.constant 0 : index
    %264 = vector.load %arg1[%c0_215, %c3_216, %c16_217, %c0_218] : memref<1x4x64x8xbf16, #tpu.memory_space<vmem>>, vector<1x1x8x8xbf16>
    %265 = vector.shape_cast %264 : vector<1x1x8x8xbf16> to vector<8x8xbf16>
    %cst_219 = arith.constant dense<0.000000e+00> : vector<8x4xf32>
    %266 = tpu.matmul %265, %2, %cst_219 {dimension_numbers = #tpu.dot_dimension_numbers<[1], [0], [0], [1], [0, 0, 1, 1], [], []>} : vector<8x8xbf16>, vector<8x4xbf16>, vector<8x4xf32> -> vector<8x4xf32>
    %267 = vector.broadcast %3 : vector<1x4xf32> to vector<8x4xf32>
    %268 = arith.addf %266, %267 : vector<8x4xf32>
    %cst_220 = arith.constant 0.000000e+00 : f32
    %269 = vector.broadcast %cst_220 : f32 to vector<8x4xf32>
    %270 = arith.maximumf %268, %269 : vector<8x4xf32>
    %c0_221 = arith.constant 0 : index
    %c28_222 = arith.constant 28 : index
    %c0_223 = arith.constant 0 : index
    %271 = vector.load %arg7[%c0_221, %c28_222, %c0_223] : memref<4x82x4xf32, #tpu.memory_space<vmem>>, vector<1x8x4xf32>
    %272 = vector.shape_cast %271 : vector<1x8x4xf32> to vector<8x4xf32>
    %273 = vector.shape_cast %270 : vector<8x4xf32> to vector<1x8x4xf32>
    tpu.vector_store %arg7[%c0_221, %c28_222, %c0_223], %273 {strides = array<i32>} : memref<4x82x4xf32, #tpu.memory_space<vmem>>, vector<1x8x4xf32>,
    %c0_224 = arith.constant 0 : index
    %c3_225 = arith.constant 3 : index
    %c24_226 = arith.constant 24 : index
    %c0_227 = arith.constant 0 : index
    %274 = vector.load %arg1[%c0_224, %c3_225, %c24_226, %c0_227] : memref<1x4x64x8xbf16, #tpu.memory_space<vmem>>, vector<1x1x8x8xbf16>
    %275 = vector.shape_cast %274 : vector<1x1x8x8xbf16> to vector<8x8xbf16>
    %cst_228 = arith.constant dense<0.000000e+00> : vector<8x4xf32>
    %276 = tpu.matmul %275, %2, %cst_228 {dimension_numbers = #tpu.dot_dimension_numbers<[1], [0], [0], [1], [0, 0, 1, 1], [], []>} : vector<8x8xbf16>, vector<8x4xbf16>, vector<8x4xf32> -> vector<8x4xf32>
    %277 = vector.broadcast %3 : vector<1x4xf32> to vector<8x4xf32>
    %278 = arith.addf %276, %277 : vector<8x4xf32>
    %cst_229 = arith.constant 0.000000e+00 : f32
    %279 = vector.broadcast %cst_229 : f32 to vector<8x4xf32>
    %280 = arith.maximumf %278, %279 : vector<8x4xf32>
    %c0_230 = arith.constant 0 : index
    %c37_231 = arith.constant 37 : index
    %c0_232 = arith.constant 0 : index
    %281 = vector.load %arg7[%c0_230, %c37_231, %c0_232] : memref<4x82x4xf32, #tpu.memory_space<vmem>>, vector<1x8x4xf32>
    %282 = vector.shape_cast %281 : vector<1x8x4xf32> to vector<8x4xf32>
    %283 = vector.shape_cast %280 : vector<8x4xf32> to vector<1x8x4xf32>
    tpu.vector_store %arg7[%c0_230, %c37_231, %c0_232], %283 {strides = array<i32>} : memref<4x82x4xf32, #tpu.memory_space<vmem>>, vector<1x8x4xf32>,
    %c0_233 = arith.constant 0 : index
    %c3_234 = arith.constant 3 : index
    %c32_235 = arith.constant 32 : index
    %c0_236 = arith.constant 0 : index
    %284 = vector.load %arg1[%c0_233, %c3_234, %c32_235, %c0_236] : memref<1x4x64x8xbf16, #tpu.memory_space<vmem>>, vector<1x1x8x8xbf16>
    %285 = vector.shape_cast %284 : vector<1x1x8x8xbf16> to vector<8x8xbf16>
    %cst_237 = arith.constant dense<0.000000e+00> : vector<8x4xf32>
    %286 = tpu.matmul %285, %2, %cst_237 {dimension_numbers = #tpu.dot_dimension_numbers<[1], [0], [0], [1], [0, 0, 1, 1], [], []>} : vector<8x8xbf16>, vector<8x4xbf16>, vector<8x4xf32> -> vector<8x4xf32>
    %287 = vector.broadcast %3 : vector<1x4xf32> to vector<8x4xf32>
    %288 = arith.addf %286, %287 : vector<8x4xf32>
    %cst_238 = arith.constant 0.000000e+00 : f32
    %289 = vector.broadcast %cst_238 : f32 to vector<8x4xf32>
    %290 = arith.maximumf %288, %289 : vector<8x4xf32>
    %c0_239 = arith.constant 0 : index
    %c46_240 = arith.constant 46 : index
    %c0_241 = arith.constant 0 : index
    %291 = vector.load %arg7[%c0_239, %c46_240, %c0_241] : memref<4x82x4xf32, #tpu.memory_space<vmem>>, vector<1x8x4xf32>
    %292 = vector.shape_cast %291 : vector<1x8x4xf32> to vector<8x4xf32>
    %293 = vector.shape_cast %290 : vector<8x4xf32> to vector<1x8x4xf32>
    tpu.vector_store %arg7[%c0_239, %c46_240, %c0_241], %293 {strides = array<i32>} : memref<4x82x4xf32, #tpu.memory_space<vmem>>, vector<1x8x4xf32>,
    %c0_242 = arith.constant 0 : index
    %c3_243 = arith.constant 3 : index
    %c40_244 = arith.constant 40 : index
    %c0_245 = arith.constant 0 : index
    %294 = vector.load %arg1[%c0_242, %c3_243, %c40_244, %c0_245] : memref<1x4x64x8xbf16, #tpu.memory_space<vmem>>, vector<1x1x8x8xbf16>
    %295 = vector.shape_cast %294 : vector<1x1x8x8xbf16> to vector<8x8xbf16>
    %cst_246 = arith.constant dense<0.000000e+00> : vector<8x4xf32>
    %296 = tpu.matmul %295, %2, %cst_246 {dimension_numbers = #tpu.dot_dimension_numbers<[1], [0], [0], [1], [0, 0, 1, 1], [], []>} : vector<8x8xbf16>, vector<8x4xbf16>, vector<8x4xf32> -> vector<8x4xf32>
    %297 = vector.broadcast %3 : vector<1x4xf32> to vector<8x4xf32>
    %298 = arith.addf %296, %297 : vector<8x4xf32>
    %cst_247 = arith.constant 0.000000e+00 : f32
    %299 = vector.broadcast %cst_247 : f32 to vector<8x4xf32>
    %300 = arith.maximumf %298, %299 : vector<8x4xf32>
    %c0_248 = arith.constant 0 : index
    %c55_249 = arith.constant 55 : index
    %c0_250 = arith.constant 0 : index
    %301 = vector.load %arg7[%c0_248, %c55_249, %c0_250] : memref<4x82x4xf32, #tpu.memory_space<vmem>>, vector<1x8x4xf32>
    %302 = vector.shape_cast %301 : vector<1x8x4xf32> to vector<8x4xf32>
    %303 = vector.shape_cast %300 : vector<8x4xf32> to vector<1x8x4xf32>
    tpu.vector_store %arg7[%c0_248, %c55_249, %c0_250], %303 {strides = array<i32>} : memref<4x82x4xf32, #tpu.memory_space<vmem>>, vector<1x8x4xf32>,
    %c0_251 = arith.constant 0 : index
    %c3_252 = arith.constant 3 : index
    %c48_253 = arith.constant 48 : index
    %c0_254 = arith.constant 0 : index
    %304 = vector.load %arg1[%c0_251, %c3_252, %c48_253, %c0_254] : memref<1x4x64x8xbf16, #tpu.memory_space<vmem>>, vector<1x1x8x8xbf16>
    %305 = vector.shape_cast %304 : vector<1x1x8x8xbf16> to vector<8x8xbf16>
    %cst_255 = arith.constant dense<0.000000e+00> : vector<8x4xf32>
    %306 = tpu.matmul %305, %2, %cst_255 {dimension_numbers = #tpu.dot_dimension_numbers<[1], [0], [0], [1], [0, 0, 1, 1], [], []>} : vector<8x8xbf16>, vector<8x4xbf16>, vector<8x4xf32> -> vector<8x4xf32>
    %307 = vector.broadcast %3 : vector<1x4xf32> to vector<8x4xf32>
    %308 = arith.addf %306, %307 : vector<8x4xf32>
    %cst_256 = arith.constant 0.000000e+00 : f32
    %309 = vector.broadcast %cst_256 : f32 to vector<8x4xf32>
    %310 = arith.maximumf %308, %309 : vector<8x4xf32>
    %c0_257 = arith.constant 0 : index
    %c64_258 = arith.constant 64 : index
    %c0_259 = arith.constant 0 : index
    %311 = vector.load %arg7[%c0_257, %c64_258, %c0_259] : memref<4x82x4xf32, #tpu.memory_space<vmem>>, vector<1x8x4xf32>
    %312 = vector.shape_cast %311 : vector<1x8x4xf32> to vector<8x4xf32>
    %313 = vector.shape_cast %310 : vector<8x4xf32> to vector<1x8x4xf32>
    tpu.vector_store %arg7[%c0_257, %c64_258, %c0_259], %313 {strides = array<i32>} : memref<4x82x4xf32, #tpu.memory_space<vmem>>, vector<1x8x4xf32>,
    %c0_260 = arith.constant 0 : index
    %c3_261 = arith.constant 3 : index
    %c56_262 = arith.constant 56 : index
    %c0_263 = arith.constant 0 : index
    %314 = vector.load %arg1[%c0_260, %c3_261, %c56_262, %c0_263] : memref<1x4x64x8xbf16, #tpu.memory_space<vmem>>, vector<1x1x8x8xbf16>
    %315 = vector.shape_cast %314 : vector<1x1x8x8xbf16> to vector<8x8xbf16>
    %cst_264 = arith.constant dense<0.000000e+00> : vector<8x4xf32>
    %316 = tpu.matmul %315, %2, %cst_264 {dimension_numbers = #tpu.dot_dimension_numbers<[1], [0], [0], [1], [0, 0, 1, 1], [], []>} : vector<8x8xbf16>, vector<8x4xbf16>, vector<8x4xf32> -> vector<8x4xf32>
    %317 = vector.broadcast %3 : vector<1x4xf32> to vector<8x4xf32>
    %318 = arith.addf %316, %317 : vector<8x4xf32>
    %cst_265 = arith.constant 0.000000e+00 : f32
    %319 = vector.broadcast %cst_265 : f32 to vector<8x4xf32>
    %320 = arith.maximumf %318, %319 : vector<8x4xf32>
    %c0_266 = arith.constant 0 : index
    %c73 = arith.constant 73 : index
    %c0_267 = arith.constant 0 : index
    %321 = vector.load %arg7[%c0_266, %c73, %c0_267] : memref<4x82x4xf32, #tpu.memory_space<vmem>>, vector<1x8x4xf32>
    %322 = vector.shape_cast %321 : vector<1x8x4xf32> to vector<8x4xf32>
    %323 = vector.shape_cast %320 : vector<8x4xf32> to vector<1x8x4xf32>
    tpu.vector_store %arg7[%c0_266, %c73, %c0_267], %323 {strides = array<i32>} : memref<4x82x4xf32, #tpu.memory_space<vmem>>, vector<1x8x4xf32>,
    %c0_268 = arith.constant 0 : index
    %c0_269 = arith.constant 0 : index
    %c0_270 = arith.constant 0 : index
    %324 = vector.load %arg7[%c0_268, %c0_269, %c0_270] : memref<4x82x4xf32, #tpu.memory_space<vmem>>, vector<1x72x4xf32>
    %325 = vector.shape_cast %324 : vector<1x72x4xf32> to vector<72x4xf32>
    %326 = arith.truncf %325 : vector<72x4xf32> to vector<72x4xbf16>
    %c0_271 = arith.constant 0 : index
    %c0_272 = arith.constant 0 : index
    %c0_273 = arith.constant 0 : index
    %327 = vector.load %arg4[%c0_271, %c0_272, %c0_273] : memref<9x4x4xbf16, #tpu.memory_space<vmem>>, vector<1x4x4xbf16>
    %328 = vector.shape_cast %327 : vector<1x4x4xbf16> to vector<4x4xbf16>
    %cst_274 = arith.constant dense<0.000000e+00> : vector<72x4xf32>
    %329 = tpu.matmul %326, %328, %cst_274 {dimension_numbers = #tpu.dot_dimension_numbers<[1], [0], [0], [1], [0, 0, 1, 1], [], []>} : vector<72x4xbf16>, vector<4x4xbf16>, vector<72x4xf32> -> vector<72x4xf32>
    %c0_275 = arith.constant 0 : index
    %c0_276 = arith.constant 0 : index
    %330 = vector.load %arg8[%c0_275, %c0_276] : memref<72x4xf32, #tpu.memory_space<vmem>>, vector<72x4xf32>
    tpu.vector_store %arg8[%c0_275, %c0_276], %329 {strides = array<i32>} : memref<72x4xf32, #tpu.memory_space<vmem>>, vector<72x4xf32>,
    %c1_277 = arith.constant 1 : index
    %c0_278 = arith.constant 0 : index
    %c0_279 = arith.constant 0 : index
    %331 = vector.load %arg7[%c1_277, %c0_278, %c0_279] : memref<4x82x4xf32, #tpu.memory_space<vmem>>, vector<1x72x4xf32>
    %332 = vector.shape_cast %331 : vector<1x72x4xf32> to vector<72x4xf32>
    %333 = arith.truncf %332 : vector<72x4xf32> to vector<72x4xbf16>
    %c1_280 = arith.constant 1 : index
    %c0_281 = arith.constant 0 : index
    %c0_282 = arith.constant 0 : index
    %334 = vector.load %arg4[%c1_280, %c0_281, %c0_282] : memref<9x4x4xbf16, #tpu.memory_space<vmem>>, vector<1x4x4xbf16>
    %335 = vector.shape_cast %334 : vector<1x4x4xbf16> to vector<4x4xbf16>
    %cst_283 = arith.constant dense<0.000000e+00> : vector<72x4xf32>
    %336 = tpu.matmul %333, %335, %cst_283 {dimension_numbers = #tpu.dot_dimension_numbers<[1], [0], [0], [1], [0, 0, 1, 1], [], []>} : vector<72x4xbf16>, vector<4x4xbf16>, vector<72x4xf32> -> vector<72x4xf32>
    %c0_284 = arith.constant 0 : index
    %c0_285 = arith.constant 0 : index
    %337 = vector.load %arg8[%c0_284, %c0_285] : memref<72x4xf32, #tpu.memory_space<vmem>>, vector<72x4xf32>
    %338 = arith.addf %337, %336 : vector<72x4xf32>
    %c0_286 = arith.constant 0 : index
    %c0_287 = arith.constant 0 : index
    %339 = vector.load %arg8[%c0_286, %c0_287] : memref<72x4xf32, #tpu.memory_space<vmem>>, vector<72x4xf32>
    tpu.vector_store %arg8[%c0_286, %c0_287], %338 {strides = array<i32>} : memref<72x4xf32, #tpu.memory_space<vmem>>, vector<72x4xf32>,
    %c0_288 = arith.constant 0 : index
    %c1_289 = arith.constant 1 : index
    %c0_290 = arith.constant 0 : index
    %340 = vector.load %arg7[%c0_288, %c1_289, %c0_290] : memref<4x82x4xf32, #tpu.memory_space<vmem>>, vector<1x72x4xf32>
    %341 = vector.shape_cast %340 : vector<1x72x4xf32> to vector<72x4xf32>
    %342 = arith.truncf %341 : vector<72x4xf32> to vector<72x4xbf16>
    %c2_291 = arith.constant 2 : index
    %c0_292 = arith.constant 0 : index
    %c0_293 = arith.constant 0 : index
    %343 = vector.load %arg4[%c2_291, %c0_292, %c0_293] : memref<9x4x4xbf16, #tpu.memory_space<vmem>>, vector<1x4x4xbf16>
    %344 = vector.shape_cast %343 : vector<1x4x4xbf16> to vector<4x4xbf16>
    %cst_294 = arith.constant dense<0.000000e+00> : vector<72x4xf32>
    %345 = tpu.matmul %342, %344, %cst_294 {dimension_numbers = #tpu.dot_dimension_numbers<[1], [0], [0], [1], [0, 0, 1, 1], [], []>} : vector<72x4xbf16>, vector<4x4xbf16>, vector<72x4xf32> -> vector<72x4xf32>
    %c0_295 = arith.constant 0 : index
    %c0_296 = arith.constant 0 : index
    %346 = vector.load %arg8[%c0_295, %c0_296] : memref<72x4xf32, #tpu.memory_space<vmem>>, vector<72x4xf32>
    %347 = arith.addf %346, %345 : vector<72x4xf32>
    %c0_297 = arith.constant 0 : index
    %c0_298 = arith.constant 0 : index
    %348 = vector.load %arg8[%c0_297, %c0_298] : memref<72x4xf32, #tpu.memory_space<vmem>>, vector<72x4xf32>
    tpu.vector_store %arg8[%c0_297, %c0_298], %347 {strides = array<i32>} : memref<72x4xf32, #tpu.memory_space<vmem>>, vector<72x4xf32>,
    %c2_299 = arith.constant 2 : index
    %c0_300 = arith.constant 0 : index
    %c0_301 = arith.constant 0 : index
    %349 = vector.load %arg7[%c2_299, %c0_300, %c0_301] : memref<4x82x4xf32, #tpu.memory_space<vmem>>, vector<1x72x4xf32>
    %350 = vector.shape_cast %349 : vector<1x72x4xf32> to vector<72x4xf32>
    %351 = arith.truncf %350 : vector<72x4xf32> to vector<72x4xbf16>
    %c3_302 = arith.constant 3 : index
    %c0_303 = arith.constant 0 : index
    %c0_304 = arith.constant 0 : index
    %352 = vector.load %arg4[%c3_302, %c0_303, %c0_304] : memref<9x4x4xbf16, #tpu.memory_space<vmem>>, vector<1x4x4xbf16>
    %353 = vector.shape_cast %352 : vector<1x4x4xbf16> to vector<4x4xbf16>
    %cst_305 = arith.constant dense<0.000000e+00> : vector<72x4xf32>
    %354 = tpu.matmul %351, %353, %cst_305 {dimension_numbers = #tpu.dot_dimension_numbers<[1], [0], [0], [1], [0, 0, 1, 1], [], []>} : vector<72x4xbf16>, vector<4x4xbf16>, vector<72x4xf32> -> vector<72x4xf32>
    %c0_306 = arith.constant 0 : index
    %c0_307 = arith.constant 0 : index
    %355 = vector.load %arg8[%c0_306, %c0_307] : memref<72x4xf32, #tpu.memory_space<vmem>>, vector<72x4xf32>
    %356 = arith.addf %355, %354 : vector<72x4xf32>
    %c0_308 = arith.constant 0 : index
    %c0_309 = arith.constant 0 : index
    %357 = vector.load %arg8[%c0_308, %c0_309] : memref<72x4xf32, #tpu.memory_space<vmem>>, vector<72x4xf32>
    tpu.vector_store %arg8[%c0_308, %c0_309], %356 {strides = array<i32>} : memref<72x4xf32, #tpu.memory_space<vmem>>, vector<72x4xf32>,
    %c3_310 = arith.constant 3 : index
    %c0_311 = arith.constant 0 : index
    %c0_312 = arith.constant 0 : index
    %358 = vector.load %arg7[%c3_310, %c0_311, %c0_312] : memref<4x82x4xf32, #tpu.memory_space<vmem>>, vector<1x72x4xf32>
    %359 = vector.shape_cast %358 : vector<1x72x4xf32> to vector<72x4xf32>
    %360 = arith.truncf %359 : vector<72x4xf32> to vector<72x4xbf16>
    %c4 = arith.constant 4 : index
    %c0_313 = arith.constant 0 : index
    %c0_314 = arith.constant 0 : index
    %361 = vector.load %arg4[%c4, %c0_313, %c0_314] : memref<9x4x4xbf16, #tpu.memory_space<vmem>>, vector<1x4x4xbf16>
    %362 = vector.shape_cast %361 : vector<1x4x4xbf16> to vector<4x4xbf16>
    %cst_315 = arith.constant dense<0.000000e+00> : vector<72x4xf32>
    %363 = tpu.matmul %360, %362, %cst_315 {dimension_numbers = #tpu.dot_dimension_numbers<[1], [0], [0], [1], [0, 0, 1, 1], [], []>} : vector<72x4xbf16>, vector<4x4xbf16>, vector<72x4xf32> -> vector<72x4xf32>
    %c0_316 = arith.constant 0 : index
    %c0_317 = arith.constant 0 : index
    %364 = vector.load %arg8[%c0_316, %c0_317] : memref<72x4xf32, #tpu.memory_space<vmem>>, vector<72x4xf32>
    %365 = arith.addf %364, %363 : vector<72x4xf32>
    %c0_318 = arith.constant 0 : index
    %c0_319 = arith.constant 0 : index
    %366 = vector.load %arg8[%c0_318, %c0_319] : memref<72x4xf32, #tpu.memory_space<vmem>>, vector<72x4xf32>
    tpu.vector_store %arg8[%c0_318, %c0_319], %365 {strides = array<i32>} : memref<72x4xf32, #tpu.memory_space<vmem>>, vector<72x4xf32>,
    %c2_320 = arith.constant 2 : index
    %c1_321 = arith.constant 1 : index
    %c0_322 = arith.constant 0 : index
    %367 = vector.load %arg7[%c2_320, %c1_321, %c0_322] : memref<4x82x4xf32, #tpu.memory_space<vmem>>, vector<1x72x4xf32>
    %368 = vector.shape_cast %367 : vector<1x72x4xf32> to vector<72x4xf32>
    %369 = arith.truncf %368 : vector<72x4xf32> to vector<72x4xbf16>
    %c5 = arith.constant 5 : index
    %c0_323 = arith.constant 0 : index
    %c0_324 = arith.constant 0 : index
    %370 = vector.load %arg4[%c5, %c0_323, %c0_324] : memref<9x4x4xbf16, #tpu.memory_space<vmem>>, vector<1x4x4xbf16>
    %371 = vector.shape_cast %370 : vector<1x4x4xbf16> to vector<4x4xbf16>
    %cst_325 = arith.constant dense<0.000000e+00> : vector<72x4xf32>
    %372 = tpu.matmul %369, %371, %cst_325 {dimension_numbers = #tpu.dot_dimension_numbers<[1], [0], [0], [1], [0, 0, 1, 1], [], []>} : vector<72x4xbf16>, vector<4x4xbf16>, vector<72x4xf32> -> vector<72x4xf32>
    %c0_326 = arith.constant 0 : index
    %c0_327 = arith.constant 0 : index
    %373 = vector.load %arg8[%c0_326, %c0_327] : memref<72x4xf32, #tpu.memory_space<vmem>>, vector<72x4xf32>
    %374 = arith.addf %373, %372 : vector<72x4xf32>
    %c0_328 = arith.constant 0 : index
    %c0_329 = arith.constant 0 : index
    %375 = vector.load %arg8[%c0_328, %c0_329] : memref<72x4xf32, #tpu.memory_space<vmem>>, vector<72x4xf32>
    tpu.vector_store %arg8[%c0_328, %c0_329], %374 {strides = array<i32>} : memref<72x4xf32, #tpu.memory_space<vmem>>, vector<72x4xf32>,
    %c0_330 = arith.constant 0 : index
    %c9_331 = arith.constant 9 : index
    %c0_332 = arith.constant 0 : index
    %376 = vector.load %arg7[%c0_330, %c9_331, %c0_332] : memref<4x82x4xf32, #tpu.memory_space<vmem>>, vector<1x72x4xf32>
    %377 = vector.shape_cast %376 : vector<1x72x4xf32> to vector<72x4xf32>
    %378 = arith.truncf %377 : vector<72x4xf32> to vector<72x4xbf16>
    %c6 = arith.constant 6 : index
    %c0_333 = arith.constant 0 : index
    %c0_334 = arith.constant 0 : index
    %379 = vector.load %arg4[%c6, %c0_333, %c0_334] : memref<9x4x4xbf16, #tpu.memory_space<vmem>>, vector<1x4x4xbf16>
    %380 = vector.shape_cast %379 : vector<1x4x4xbf16> to vector<4x4xbf16>
    %cst_335 = arith.constant dense<0.000000e+00> : vector<72x4xf32>
    %381 = tpu.matmul %378, %380, %cst_335 {dimension_numbers = #tpu.dot_dimension_numbers<[1], [0], [0], [1], [0, 0, 1, 1], [], []>} : vector<72x4xbf16>, vector<4x4xbf16>, vector<72x4xf32> -> vector<72x4xf32>
    %c0_336 = arith.constant 0 : index
    %c0_337 = arith.constant 0 : index
    %382 = vector.load %arg8[%c0_336, %c0_337] : memref<72x4xf32, #tpu.memory_space<vmem>>, vector<72x4xf32>
    %383 = arith.addf %382, %381 : vector<72x4xf32>
    %c0_338 = arith.constant 0 : index
    %c0_339 = arith.constant 0 : index
    %384 = vector.load %arg8[%c0_338, %c0_339] : memref<72x4xf32, #tpu.memory_space<vmem>>, vector<72x4xf32>
    tpu.vector_store %arg8[%c0_338, %c0_339], %383 {strides = array<i32>} : memref<72x4xf32, #tpu.memory_space<vmem>>, vector<72x4xf32>,
    %c1_340 = arith.constant 1 : index
    %c9_341 = arith.constant 9 : index
    %c0_342 = arith.constant 0 : index
    %385 = vector.load %arg7[%c1_340, %c9_341, %c0_342] : memref<4x82x4xf32, #tpu.memory_space<vmem>>, vector<1x72x4xf32>
    %386 = vector.shape_cast %385 : vector<1x72x4xf32> to vector<72x4xf32>
    %387 = arith.truncf %386 : vector<72x4xf32> to vector<72x4xbf16>
    %c7 = arith.constant 7 : index
    %c0_343 = arith.constant 0 : index
    %c0_344 = arith.constant 0 : index
    %388 = vector.load %arg4[%c7, %c0_343, %c0_344] : memref<9x4x4xbf16, #tpu.memory_space<vmem>>, vector<1x4x4xbf16>
    %389 = vector.shape_cast %388 : vector<1x4x4xbf16> to vector<4x4xbf16>
    %cst_345 = arith.constant dense<0.000000e+00> : vector<72x4xf32>
    %390 = tpu.matmul %387, %389, %cst_345 {dimension_numbers = #tpu.dot_dimension_numbers<[1], [0], [0], [1], [0, 0, 1, 1], [], []>} : vector<72x4xbf16>, vector<4x4xbf16>, vector<72x4xf32> -> vector<72x4xf32>
    %c0_346 = arith.constant 0 : index
    %c0_347 = arith.constant 0 : index
    %391 = vector.load %arg8[%c0_346, %c0_347] : memref<72x4xf32, #tpu.memory_space<vmem>>, vector<72x4xf32>
    %392 = arith.addf %391, %390 : vector<72x4xf32>
    %c0_348 = arith.constant 0 : index
    %c0_349 = arith.constant 0 : index
    %393 = vector.load %arg8[%c0_348, %c0_349] : memref<72x4xf32, #tpu.memory_space<vmem>>, vector<72x4xf32>
    tpu.vector_store %arg8[%c0_348, %c0_349], %392 {strides = array<i32>} : memref<72x4xf32, #tpu.memory_space<vmem>>, vector<72x4xf32>,
    %c0_350 = arith.constant 0 : index
    %c10_351 = arith.constant 10 : index
    %c0_352 = arith.constant 0 : index
    %394 = vector.load %arg7[%c0_350, %c10_351, %c0_352] : memref<4x82x4xf32, #tpu.memory_space<vmem>>, vector<1x72x4xf32>
    %395 = vector.shape_cast %394 : vector<1x72x4xf32> to vector<72x4xf32>
    %396 = arith.truncf %395 : vector<72x4xf32> to vector<72x4xbf16>
    %c8_353 = arith.constant 8 : index
    %c0_354 = arith.constant 0 : index
    %c0_355 = arith.constant 0 : index
    %397 = vector.load %arg4[%c8_353, %c0_354, %c0_355] : memref<9x4x4xbf16, #tpu.memory_space<vmem>>, vector<1x4x4xbf16>
    %398 = vector.shape_cast %397 : vector<1x4x4xbf16> to vector<4x4xbf16>
    %cst_356 = arith.constant dense<0.000000e+00> : vector<72x4xf32>
    %399 = tpu.matmul %396, %398, %cst_356 {dimension_numbers = #tpu.dot_dimension_numbers<[1], [0], [0], [1], [0, 0, 1, 1], [], []>} : vector<72x4xbf16>, vector<4x4xbf16>, vector<72x4xf32> -> vector<72x4xf32>
    %c0_357 = arith.constant 0 : index
    %c0_358 = arith.constant 0 : index
    %400 = vector.load %arg8[%c0_357, %c0_358] : memref<72x4xf32, #tpu.memory_space<vmem>>, vector<72x4xf32>
    %401 = arith.addf %400, %399 : vector<72x4xf32>
    %c0_359 = arith.constant 0 : index
    %c0_360 = arith.constant 0 : index
    %402 = vector.load %arg8[%c0_359, %c0_360] : memref<72x4xf32, #tpu.memory_space<vmem>>, vector<72x4xf32>
    tpu.vector_store %arg8[%c0_359, %c0_360], %401 {strides = array<i32>} : memref<72x4xf32, #tpu.memory_space<vmem>>, vector<72x4xf32>,
    %c0_361 = arith.constant 0 : index
    %c0_362 = arith.constant 0 : index
    %403 = vector.load %arg5[%c0_361, %c0_362] : memref<1x4xf32, #tpu.memory_space<vmem>>, vector<1x4xf32>
    %c0_363 = arith.constant 0 : index
    %c0_364 = arith.constant 0 : index
    %404 = vector.load %arg8[%c0_363, %c0_364] : memref<72x4xf32, #tpu.memory_space<vmem>>, vector<8x4xf32>
    %405 = vector.broadcast %403 : vector<1x4xf32> to vector<8x4xf32>
    %406 = arith.addf %404, %405 : vector<8x4xf32>
    %cst_365 = arith.constant 0.000000e+00 : f32
    %407 = vector.broadcast %cst_365 : f32 to vector<8x4xf32>
    %408 = arith.maximumf %406, %407 : vector<8x4xf32>
    %409 = arith.truncf %408 : vector<8x4xf32> to vector<8x4xbf16>
    %c0_366 = arith.constant 0 : index
    %c0_367 = arith.constant 0 : index
    %c0_368 = arith.constant 0 : index
    %410 = vector.load %arg6[%c0_366, %c0_367, %c0_368] : memref<1x64x4xbf16, #tpu.memory_space<vmem>>, vector<1x8x4xbf16>
    %411 = vector.shape_cast %410 : vector<1x8x4xbf16> to vector<8x4xbf16>
    %412 = vector.shape_cast %409 : vector<8x4xbf16> to vector<1x8x4xbf16>
    tpu.vector_store %arg6[%c0_366, %c0_367, %c0_368], %412 {strides = array<i32>} : memref<1x64x4xbf16, #tpu.memory_space<vmem>>, vector<1x8x4xbf16>,
    %c9_369 = arith.constant 9 : index
    %c0_370 = arith.constant 0 : index
    %413 = vector.load %arg8[%c9_369, %c0_370] : memref<72x4xf32, #tpu.memory_space<vmem>>, vector<8x4xf32>
    %414 = vector.broadcast %403 : vector<1x4xf32> to vector<8x4xf32>
    %415 = arith.addf %413, %414 : vector<8x4xf32>
    %cst_371 = arith.constant 0.000000e+00 : f32
    %416 = vector.broadcast %cst_371 : f32 to vector<8x4xf32>
    %417 = arith.maximumf %415, %416 : vector<8x4xf32>
    %418 = arith.truncf %417 : vector<8x4xf32> to vector<8x4xbf16>
    %c0_372 = arith.constant 0 : index
    %c8_373 = arith.constant 8 : index
    %c0_374 = arith.constant 0 : index
    %419 = vector.load %arg6[%c0_372, %c8_373, %c0_374] : memref<1x64x4xbf16, #tpu.memory_space<vmem>>, vector<1x8x4xbf16>
    %420 = vector.shape_cast %419 : vector<1x8x4xbf16> to vector<8x4xbf16>
    %421 = vector.shape_cast %418 : vector<8x4xbf16> to vector<1x8x4xbf16>
    tpu.vector_store %arg6[%c0_372, %c8_373, %c0_374], %421 {strides = array<i32>} : memref<1x64x4xbf16, #tpu.memory_space<vmem>>, vector<1x8x4xbf16>,
    %c18_375 = arith.constant 18 : index
    %c0_376 = arith.constant 0 : index
    %422 = vector.load %arg8[%c18_375, %c0_376] : memref<72x4xf32, #tpu.memory_space<vmem>>, vector<8x4xf32>
    %423 = vector.broadcast %403 : vector<1x4xf32> to vector<8x4xf32>
    %424 = arith.addf %422, %423 : vector<8x4xf32>
    %cst_377 = arith.constant 0.000000e+00 : f32
    %425 = vector.broadcast %cst_377 : f32 to vector<8x4xf32>
    %426 = arith.maximumf %424, %425 : vector<8x4xf32>
    %427 = arith.truncf %426 : vector<8x4xf32> to vector<8x4xbf16>
    %c0_378 = arith.constant 0 : index
    %c16_379 = arith.constant 16 : index
    %c0_380 = arith.constant 0 : index
    %428 = vector.load %arg6[%c0_378, %c16_379, %c0_380] : memref<1x64x4xbf16, #tpu.memory_space<vmem>>, vector<1x8x4xbf16>
    %429 = vector.shape_cast %428 : vector<1x8x4xbf16> to vector<8x4xbf16>
    %430 = vector.shape_cast %427 : vector<8x4xbf16> to vector<1x8x4xbf16>
    tpu.vector_store %arg6[%c0_378, %c16_379, %c0_380], %430 {strides = array<i32>} : memref<1x64x4xbf16, #tpu.memory_space<vmem>>, vector<1x8x4xbf16>,
    %c27_381 = arith.constant 27 : index
    %c0_382 = arith.constant 0 : index
    %431 = vector.load %arg8[%c27_381, %c0_382] : memref<72x4xf32, #tpu.memory_space<vmem>>, vector<8x4xf32>
    %432 = vector.broadcast %403 : vector<1x4xf32> to vector<8x4xf32>
    %433 = arith.addf %431, %432 : vector<8x4xf32>
    %cst_383 = arith.constant 0.000000e+00 : f32
    %434 = vector.broadcast %cst_383 : f32 to vector<8x4xf32>
    %435 = arith.maximumf %433, %434 : vector<8x4xf32>
    %436 = arith.truncf %435 : vector<8x4xf32> to vector<8x4xbf16>
    %c0_384 = arith.constant 0 : index
    %c24_385 = arith.constant 24 : index
    %c0_386 = arith.constant 0 : index
    %437 = vector.load %arg6[%c0_384, %c24_385, %c0_386] : memref<1x64x4xbf16, #tpu.memory_space<vmem>>, vector<1x8x4xbf16>
    %438 = vector.shape_cast %437 : vector<1x8x4xbf16> to vector<8x4xbf16>
    %439 = vector.shape_cast %436 : vector<8x4xbf16> to vector<1x8x4xbf16>
    tpu.vector_store %arg6[%c0_384, %c24_385, %c0_386], %439 {strides = array<i32>} : memref<1x64x4xbf16, #tpu.memory_space<vmem>>, vector<1x8x4xbf16>,
    %c36_387 = arith.constant 36 : index
    %c0_388 = arith.constant 0 : index
    %440 = vector.load %arg8[%c36_387, %c0_388] : memref<72x4xf32, #tpu.memory_space<vmem>>, vector<8x4xf32>
    %441 = vector.broadcast %403 : vector<1x4xf32> to vector<8x4xf32>
    %442 = arith.addf %440, %441 : vector<8x4xf32>
    %cst_389 = arith.constant 0.000000e+00 : f32
    %443 = vector.broadcast %cst_389 : f32 to vector<8x4xf32>
    %444 = arith.maximumf %442, %443 : vector<8x4xf32>
    %445 = arith.truncf %444 : vector<8x4xf32> to vector<8x4xbf16>
    %c0_390 = arith.constant 0 : index
    %c32_391 = arith.constant 32 : index
    %c0_392 = arith.constant 0 : index
    %446 = vector.load %arg6[%c0_390, %c32_391, %c0_392] : memref<1x64x4xbf16, #tpu.memory_space<vmem>>, vector<1x8x4xbf16>
    %447 = vector.shape_cast %446 : vector<1x8x4xbf16> to vector<8x4xbf16>
    %448 = vector.shape_cast %445 : vector<8x4xbf16> to vector<1x8x4xbf16>
    tpu.vector_store %arg6[%c0_390, %c32_391, %c0_392], %448 {strides = array<i32>} : memref<1x64x4xbf16, #tpu.memory_space<vmem>>, vector<1x8x4xbf16>,
    %c45_393 = arith.constant 45 : index
    %c0_394 = arith.constant 0 : index
    %449 = vector.load %arg8[%c45_393, %c0_394] : memref<72x4xf32, #tpu.memory_space<vmem>>, vector<8x4xf32>
    %450 = vector.broadcast %403 : vector<1x4xf32> to vector<8x4xf32>
    %451 = arith.addf %449, %450 : vector<8x4xf32>
    %cst_395 = arith.constant 0.000000e+00 : f32
    %452 = vector.broadcast %cst_395 : f32 to vector<8x4xf32>
    %453 = arith.maximumf %451, %452 : vector<8x4xf32>
    %454 = arith.truncf %453 : vector<8x4xf32> to vector<8x4xbf16>
    %c0_396 = arith.constant 0 : index
    %c40_397 = arith.constant 40 : index
    %c0_398 = arith.constant 0 : index
    %455 = vector.load %arg6[%c0_396, %c40_397, %c0_398] : memref<1x64x4xbf16, #tpu.memory_space<vmem>>, vector<1x8x4xbf16>
    %456 = vector.shape_cast %455 : vector<1x8x4xbf16> to vector<8x4xbf16>
    %457 = vector.shape_cast %454 : vector<8x4xbf16> to vector<1x8x4xbf16>
    tpu.vector_store %arg6[%c0_396, %c40_397, %c0_398], %457 {strides = array<i32>} : memref<1x64x4xbf16, #tpu.memory_space<vmem>>, vector<1x8x4xbf16>,
    %c54_399 = arith.constant 54 : index
    %c0_400 = arith.constant 0 : index
    %458 = vector.load %arg8[%c54_399, %c0_400] : memref<72x4xf32, #tpu.memory_space<vmem>>, vector<8x4xf32>
    %459 = vector.broadcast %403 : vector<1x4xf32> to vector<8x4xf32>
    %460 = arith.addf %458, %459 : vector<8x4xf32>
    %cst_401 = arith.constant 0.000000e+00 : f32
    %461 = vector.broadcast %cst_401 : f32 to vector<8x4xf32>
    %462 = arith.maximumf %460, %461 : vector<8x4xf32>
    %463 = arith.truncf %462 : vector<8x4xf32> to vector<8x4xbf16>
    %c0_402 = arith.constant 0 : index
    %c48_403 = arith.constant 48 : index
    %c0_404 = arith.constant 0 : index
    %464 = vector.load %arg6[%c0_402, %c48_403, %c0_404] : memref<1x64x4xbf16, #tpu.memory_space<vmem>>, vector<1x8x4xbf16>
    %465 = vector.shape_cast %464 : vector<1x8x4xbf16> to vector<8x4xbf16>
    %466 = vector.shape_cast %463 : vector<8x4xbf16> to vector<1x8x4xbf16>
    tpu.vector_store %arg6[%c0_402, %c48_403, %c0_404], %466 {strides = array<i32>} : memref<1x64x4xbf16, #tpu.memory_space<vmem>>, vector<1x8x4xbf16>,
    %c63_405 = arith.constant 63 : index
    %c0_406 = arith.constant 0 : index
    %467 = vector.load %arg8[%c63_405, %c0_406] : memref<72x4xf32, #tpu.memory_space<vmem>>, vector<8x4xf32>
    %468 = vector.broadcast %403 : vector<1x4xf32> to vector<8x4xf32>
    %469 = arith.addf %467, %468 : vector<8x4xf32>
    %cst_407 = arith.constant 0.000000e+00 : f32
    %470 = vector.broadcast %cst_407 : f32 to vector<8x4xf32>
    %471 = arith.maximumf %469, %470 : vector<8x4xf32>
    %472 = arith.truncf %471 : vector<8x4xf32> to vector<8x4xbf16>
    %c0_408 = arith.constant 0 : index
    %c56_409 = arith.constant 56 : index
    %c0_410 = arith.constant 0 : index
    %473 = vector.load %arg6[%c0_408, %c56_409, %c0_410] : memref<1x64x4xbf16, #tpu.memory_space<vmem>>, vector<1x8x4xbf16>
    %474 = vector.shape_cast %473 : vector<1x8x4xbf16> to vector<8x4xbf16>
    %475 = vector.shape_cast %472 : vector<8x4xbf16> to vector<1x8x4xbf16>
    tpu.vector_store %arg6[%c0_408, %c56_409, %c0_410], %475 {strides = array<i32>} : memref<1x64x4xbf16, #tpu.memory_space<vmem>>, vector<1x8x4xbf16>,
    return
  }
  func.func @transform_0(%arg0: i32) -> (i32, i32, i32, i32) {
    %c0_i32 = arith.constant 0 : i32
    %c0_i32_0 = arith.constant 0 : i32
    %c0_i32_1 = arith.constant 0 : i32
    %c0_i32_2 = arith.constant 0 : i32
    return %arg0, %c0_i32, %c0_i32_0, %c0_i32_1 : i32, i32, i32, i32
  }
  func.func @transform_1(%arg0: i32) -> (i32, i32) {
    %c0_i32 = arith.constant 0 : i32
    %c0_i32_0 = arith.constant 0 : i32
    %c0_i32_1 = arith.constant 0 : i32
    return %c0_i32, %c0_i32_0 : i32, i32
  }
  func.func @transform_2(%arg0: i32) -> (i32, i32) {
    %c0_i32 = arith.constant 0 : i32
    %c0_i32_0 = arith.constant 0 : i32
    %c0_i32_1 = arith.constant 0 : i32
    return %c0_i32, %c0_i32_0 : i32, i32
  }
  func.func @transform_3(%arg0: i32) -> (i32, i32, i32) {
    %c0_i32 = arith.constant 0 : i32
    %c0_i32_0 = arith.constant 0 : i32
    %c0_i32_1 = arith.constant 0 : i32
    %c0_i32_2 = arith.constant 0 : i32
    return %c0_i32, %c0_i32_0, %c0_i32_1 : i32, i32, i32
  }
  func.func @transform_4(%arg0: i32) -> (i32, i32) {
    %c0_i32 = arith.constant 0 : i32
    %c0_i32_0 = arith.constant 0 : i32
    %c0_i32_1 = arith.constant 0 : i32
    return %c0_i32, %c0_i32_0 : i32, i32
  }
  func.func @transform_5(%arg0: i32) -> (i32, i32, i32) {
    %c0_i32 = arith.constant 0 : i32
    %c0_i32_0 = arith.constant 0 : i32
    %c0_i32_1 = arith.constant 0 : i32
    return %arg0, %c0_i32, %c0_i32_0 : i32, i32, i32
  }
}

</mosaic_0001>

<bundles_post_ra>
// kernel: bottleneck_forward.3
= control target key start
LH: loop header
LB: loop body
LE: loop exit
PB: predicated region body
PF: predicated region fallthrough
CT: control target
= control target key end

     0   :  { %s852_s21 = smov 0   ;;  %s854_s22 = smov 0   ;;  %s947_s0 = inlined_call_operand.vmem [shape: bf16[128,4], index: 0, kind: input, shape index: {}]   ;;  %s948_s1 = inlined_call_operand.vmem [shape: bf16[128,8], index: 1, kind: input, shape index: {}]   ;;  %s949_s2 = inlined_call_operand.vmem [shape: bf16[4,16], index: 2, kind: input, shape index: {}]   ;;  %s950_s3 = inlined_call_operand.vmem [shape: bf16[8,16], index: 3, kind: input, shape index: {}]   ;;  %s951_s4 = inlined_call_operand.vmem [shape: f32[1,16], index: 4, kind: input, shape index: {}]   ;;  %s952_s5 = inlined_call_operand.vmem [shape: f32[1,16], index: 5, kind: input, shape index: {}]   ;;  %s953_s6 = inlined_call_operand.vmem [shape: bf16[128,16], index: 6, kind: output, shape index: {}]  }
   0x1   :  { %s856_s23 = smov 0  }
   0x2 LB: > { %s28_s24 = sadd.s32 1, %s811_s22  ;;  %p708_p0 = scmp.ge.s32.totalorder %s815_s23, 1  ;;  %s815_s23 = sphi %s856_s23, %s16_s23   ;;  %s811_s22 = sphi %s854_s22, %s955_s22   ;;  %s807_s21 = sphi %s852_s21, %s954_s21  }
   0x3   : > { %p30_p1 = scmp.ge.s32.totalorder %s28_s24, 2  ;;  %p272_p2 = scmp.lt.s32.totalorder %s815_s23, 3 }
   0x5   : > { %s957_s24 = smov (%p30_p1, %s28_s24), 0  ;;  %p273_p3 = pnand %p708_p0, %p272_p2 }
   0x6   : > { %s709_s29 = sshll.u32 (!%p273_p3), %s807_s21, 3 }
   0x7   : > { %276 = sbr.rel (%p273_p3) target bundleno = 184 (0xb8), region = 44  ;;  %p325_p4 = scmp.lt.s32.totalorder (!%p273_p3), %s709_s29, 15 }
   0xc   : > { %v368_v0 = vld [vmem:[%s949_s2] sm:$0x3]  ;;  %vm406_vm0 = vcmask 1041408   ;;  %vm493_vm1 = vcmask 1043456   ;;  %s959_s29 = smov (!%p325_p4, %s709_s29), 15  ;;  %vm393_vm2 = vcmask 31744  }
   0xd   : > { %v455_v1 = vld [vmem:[%s950_s3] sm:$0xf]  ;;  %v408_v2 = vsel %vm406_vm0, %v368_v0, 0  ;;  %s876_s30 = sshll.u32 %s959_s29, 2  ;;  %vm480_vm3 = vcmask 64512   ;;  %vm550_vm4 = vcmask 125952  }
   0xe   : > { %v495_v3 = vsel %vm493_vm1, %v455_v1, 0  ;;  %417 = vmatpush.bf16.msra.mxu0 %v408_v2  ;;  %765 = vmatpush.bf16.msra.mxu2 %v408_v2  ;;  %s328_s9 = scalar_lea.vmem %s947_s0, %s876_s30  ;;  %s334_s12 = scalar_lea.vmem %s948_s1, %s876_s30  ;;  %v893_v12 = vld [vmem:[%s951_s4] ss:$0 sm:$0xff] }
   0xf   : > { %504 = vmatpush.bf16.msra.mxu1 %v495_v3  ;;  %766 = vmatpush.bf16.msra.mxu3 %v495_v3  ;;  %v757_v4 = vld [vmem:[%s328_s9] sm:$0xff]  ;;  %v759_v5 = vld [vmem:[%s328_s9 + $0x10] sm:$0xff]  ;;  %v758_v8 = vld [vmem:[%s328_s9 + $0x8] sm:$0xff]  ;;  %s907_s19 = scalar_lea.vmem %s953_s6, %s876_s30 }
  0x10   : > { %v761_v6 = vld [vmem:[%s334_s12] sm:$0xff]  ;;  %v763_v7 = vld [vmem:[%s334_s12 + $0x10] sm:$0xff]  ;;  %v760_v9 = vld [vmem:[%s328_s9 + $0x18] sm:$0xff] }
  0x11   : > { %731 = vmatmul.msk.bf16.vlgmr.msra.gmra.mxu0 %vm393_vm2, %v757_v4  ;;  %733 = vmatmul.msk.bf16.vlgmr.msra.gmra.mxu2 %vm393_vm2, %v759_v5  ;;  %v762_v10 = vld [vmem:[%s334_s12 + $0x8] sm:$0xff]  ;;  %v764_v11 = vld [vmem:[%s334_s12 + $0x18] sm:$0xff]  ;;  %v898_v13 = vld [vmem:[%s952_s5] ss:$0 sm:$0xff] }
  0x12   : > { %751 = vmatmul.msk.bf16.vlgmr.msra.gmra.mxu1 %vm480_vm3, %v761_v6  ;;  %753 = vmatmul.msk.bf16.vlgmr.msra.gmra.mxu3 %vm480_vm3, %v763_v7 }
  0x21   : > { %732 = vmatmul.msk.bf16.gmra.mxu0 %vm393_vm2, %v758_v8  ;;  %734 = vmatmul.msk.bf16.gmra.mxu2 %vm393_vm2, %v760_v9 }
  0x22   : > { %752 = vmatmul.msk.bf16.gmra.mxu1 %vm480_vm3, %v762_v10  ;;  %754 = vmatmul.msk.bf16.gmra.mxu3 %vm480_vm3, %v764_v11 }
  0x8e   : > { %v419_v14 = vpop.f32.mrf.mxu0 }
  0x8f   : > { %v420_v15 = vadd.f32 %v893_v12, %v419_v14  ;;  %v506_v16 = vpop.f32.mrf.mxu1 }
  0x90   : > { %v507_v17 = vadd.f32 %v898_v13, %v506_v16 }
  0x91   : > { %v439_v18 = vmax.f32 %v420_v15, 0.0 }
  0x93   : > { %v526_v19 = vadd.f32 %v507_v17, %v439_v18 }
  0x94   : > { %v429_v20 = vpop.f32.mrf.mxu2 }
  0x95   : > { %v534_v21 = vmax.f32 %v526_v19, 0.0  ;;  %v430_v22 = vadd.f32 %v893_v12, %v429_v20  ;;  %v516_v23 = vpop.f32.mrf.mxu3 }
  0x96   : > { %v517_v24 = vadd.f32 %v898_v13, %v516_v23  ;;  %v421_v25 = vpop.f32.mrf.mxu0 }
  0x97   : > { %v542_v26 = vpack.c.bf16 %v534_v21, %v534_v21  ;;  %v443_v27 = vmax.f32 %v430_v22, 0.0  ;;  %v422_v28 = vadd.f32 %v893_v12, %v421_v25  ;;  %v508_v29 = vpop.f32.mrf.mxu1 }
  0x98   : > { %v509_v32 = vadd.f32 %v898_v13, %v508_v29 }
  0x99   : > { %551 = vst.msk [vmem:[%s907_s19] sm:$0xf] %vm550_vm4, %v542_v26  ;;  %v530_v30 = vadd.f32 %v517_v24, %v443_v27  ;;  %v440_v31 = vmax.f32 %v422_v28, 0.0 }
  0x9b   : > { %v538_v33 = vmax.f32 %v530_v30, 0.0  ;;  %v527_v34 = vadd.f32 %v509_v32, %v440_v31 }
  0x9c   : > { %v431_v35 = vpop.f32.mrf.mxu2 }
  0x9d   : > { %v546_v36 = vpack.c.bf16 %v538_v33, %v538_v33  ;;  %v535_v37 = vmax.f32 %v527_v34, 0.0  ;;  %v432_v38 = vadd.f32 %v893_v12, %v431_v35  ;;  %v518_v39 = vpop.f32.mrf.mxu3 }
  0x9e   : > { %v424_v40 = vpop.f32.mrf.mxu0  ;;  %v519_v43 = vadd.f32 %v898_v13, %v518_v39 }
  0x9f   : > { %555 = vst.msk [vmem:[%s907_s19 + $0x10] sm:$0xf] %vm550_vm4, %v546_v36  ;;  %v543_v41 = vpack.c.bf16 %v535_v37, %v535_v37  ;;  %v444_v42 = vmax.f32 %v432_v38, 0.0  ;;  %v425_v44 = vadd.f32 %v893_v12, %v424_v40  ;;  %v511_v45 = vpop.f32.mrf.mxu1 }
  0xa0   : > { %v512_v46 = vadd.f32 %v898_v13, %v511_v45 }
  0xa1   : > { %552 = vst.msk [vmem:[%s907_s19 + $0x4] sm:$0xf] %vm550_vm4, %v543_v41  ;;  %v531_v47 = vadd.f32 %v519_v43, %v444_v42  ;;  %v441_v48 = vmax.f32 %v425_v44, 0.0 }
  0xa3   : > { %v539_v49 = vmax.f32 %v531_v47, 0.0  ;;  %v528_v50 = vadd.f32 %v512_v46, %v441_v48 }
  0xa4   : > { %v434_v51 = vpop.f32.mrf.mxu2 }
  0xa5   : > { %v547_v52 = vpack.c.bf16 %v539_v49, %v539_v49  ;;  %v536_v53 = vmax.f32 %v528_v50, 0.0  ;;  %v435_v54 = vadd.f32 %v893_v12, %v434_v51  ;;  %v521_v55 = vpop.f32.mrf.mxu3 }
  0xa6   : > { %v522_v56 = vadd.f32 %v898_v13, %v521_v55  ;;  %v426_v57 = vpop.f32.mrf.mxu0 }
  0xa7   : > { %556 = vst.msk [vmem:[%s907_s19 + $0x14] sm:$0xf] %vm550_vm4, %v547_v52  ;;  %v544_v58 = vpack.c.bf16 %v536_v53, %v536_v53  ;;  %v445_v59 = vmax.f32 %v435_v54, 0.0  ;;  %v427_v60 = vadd.f32 %v893_v12, %v426_v57  ;;  %v513_v61 = vpop.f32.mrf.mxu1 }
  0xa8   : > { %v514_v0 = vadd.f32 %v898_v13, %v513_v61 }
  0xa9   : > { %553 = vst.msk [vmem:[%s907_s19 + $0x8] sm:$0xf] %vm550_vm4, %v544_v58  ;;  %v532_v62 = vadd.f32 %v522_v56, %v445_v59  ;;  %v442_v63 = vmax.f32 %v427_v60, 0.0 }
  0xab   : > { %v540_v1 = vmax.f32 %v532_v62, 0.0  ;;  %v529_v2 = vadd.f32 %v514_v0, %v442_v63 }
  0xac   : > { %v436_v3 = vpop.f32.mrf.mxu2 }
  0xad   : > { %v548_v4 = vpack.c.bf16 %v540_v1, %v540_v1  ;;  %v537_v5 = vmax.f32 %v529_v2, 0.0  ;;  %v437_v6 = vadd.f32 %v893_v12, %v436_v3  ;;  %v523_v7 = vpop.f32.mrf.mxu3 }
  0xae   : > { %v524_v10 = vadd.f32 %v898_v13, %v523_v7 }
  0xaf   : > { %557 = vst.msk [vmem:[%s907_s19 + $0x18] sm:$0xf] %vm550_vm4, %v548_v4  ;;  %v545_v8 = vpack.c.bf16 %v537_v5, %v537_v5  ;;  %v446_v9 = vmax.f32 %v437_v6, 0.0 }
  0xb1   : > { %554 = vst.msk [vmem:[%s907_s19 + $0xc] sm:$0xf] %vm550_vm4, %v545_v8  ;;  %v533_v11 = vadd.f32 %v524_v10, %v446_v9 }
  0xb3   : > { %v541_v14 = vmax.f32 %v533_v11, 0.0 }
  0xb5   : > { %v549_v15 = vpack.c.bf16 %v541_v14, %v541_v14 }
  0xb7   : > { %558 = vst.msk [vmem:[%s907_s19 + $0x1c] sm:$0xf] %vm550_vm4, %v549_v15 }
  0xb8 PF: > { %s16_s23 = sadd.s32 1, %s815_s23   ;;  %s954_s21 = smov %s811_s22 }
  0xb9   : > { %p13_p5 = scmp.ge.s32.totalorder %s16_s23, 4   ;;  %s955_s22 = smov %s957_s24 }
  0xbb   :  { %15 = sbr.rel (!%p13_p5) target bundleno = 2 (0x2), region = 89 }

// kernel: bottleneck_forward.2
= control target key start
LH: loop header
LB: loop body
LE: loop exit
PB: predicated region body
PF: predicated region fallthrough
CT: control target
= control target key end

     0   :  { %s1997_s18 = smov 0   ;;  %s2670_s0 = inlined_call_operand.vmem [shape: bf16[2,4,64,8], index: 0, kind: input, shape index: {}]   ;;  %s2671_s1 = inlined_call_operand.vmem [shape: bf16[8,4], index: 1, kind: input, shape index: {}]   ;;  %s2672_s2 = inlined_call_operand.vmem [shape: f32[1,4], index: 2, kind: input, shape index: {}]   ;;  %s2673_s3 = inlined_call_operand.vmem [shape: bf16[9,4,4], index: 3, kind: input, shape index: {}]   ;;  %s2674_s4 = inlined_call_operand.vmem [shape: f32[1,4], index: 4, kind: input, shape index: {}]   ;;  %s2675_s5 = inlined_call_operand.vmem [shape: bf16[2,64,4], index: 5, kind: output, shape index: {}]  }
   0x1 LB: > { %s1824_s19 = sadd.s32 4294967295, %s1964_s18   ;;  %p1828_p0 = scmp.ge.s32.totalorder %s1964_s18, 1  ;;  %s1964_s18 = sphi %s1997_s18, %s15_s18  }
   0x2   : > { %p187_p1 = scmp.lt.s32.totalorder %s1964_s18, 3 }
   0x4   : > { %p188_p2 = pnand %p1828_p0, %p187_p1 }
   0x5   : > { %p215_p3 = scmp.lt.s32.totalorder (!%p188_p2), %s1824_s19, 1 }
   0x6   : > { %191 = sbr.rel (%p188_p2) target bundleno = 641 (0x281), region = 40 }
   0xb   : > { %v272_v0 = vld [vmem:[%s2671_s1] sm:$0xf]  ;;  %vm282_vm0 = vcmask 1043456   ;;  %s2677_s19 = smov (!%p215_p3, %s1824_s19), 1  ;;  %vm278_vm1 = vcmask 64512   ;;  %vm226_vm2 = vcmask 31744  }
   0xc   : > { %v2008_v1 = vsel %vm282_vm0, %v272_v0, 0  ;;  %s1944_s22 = sshll.u32 %s2677_s19, 7  ;;  %v1966_v30 = vmov 0.0   ;;  %v2177_v37 = vld [vmem:[%s2672_s2] ss:$0 sm:$0xff]  ;;  %vm926_vm3 = vcmask 1041408  }
   0xd   : > { %293 = vmatpush.bf16.msra.mxu3 %v2008_v1  ;;  %313 = vmatpush.bf16.msra.mxu2 %v2008_v1  ;;  %s2022_s25 = scalar_lea.vmem %s2670_s0, %s1944_s22  ;;  %261 = vst.msk [vmem:[#allocation2 + $0x108] sm:$0xff] %vm226_vm2, %v1966_v30  ;;  %v1906_v49 = vld [vmem:[%s2673_s3 + $0x6] sm:$0x3]  ;;  %vm237_vm4 = vcmask 25600   ;;  %vm1732_vm5 = vcmask 27648  }
   0xe   : > { %370 = vmatpush.bf16.msra.mxu0 %v2008_v1  ;;  %389 = vmatpush.bf16.msra.mxu1 %v2008_v1  ;;  %v274_v2 = vld [vmem:[%s2022_s25] sm:$0xf]  ;;  %v302_v3 = vld [vmem:[%s2022_s25 + $0x4] sm:$0xf]  ;;  %v359_v4 = vld [vmem:[%s2022_s25 + $0x10] sm:$0xf] }
   0xf   : > { %v378_v5 = vld [vmem:[%s2022_s25 + $0x14] sm:$0xf]  ;;  %v321_v6 = vld [vmem:[%s2022_s25 + $0x8] sm:$0xf]  ;;  %v340_v7 = vld [vmem:[%s2022_s25 + $0xc] sm:$0xf] }
  0x10   : > { %1833 = vmatmul.msk.bf16.vlgmr.msra.gmra.mxu3 %vm278_vm1, %v274_v2  ;;  %1834 = vmatmul.msk.bf16.vlgmr.msra.gmra.mxu2 %vm278_vm1, %v302_v3  ;;  %v1841_v8 = vld [vmem:[%s2022_s25 + $0x20] sm:$0xf]  ;;  %v1843_v9 = vld [vmem:[%s2022_s25 + $0x24] sm:$0xf]  ;;  %v397_v10 = vld [vmem:[%s2022_s25 + $0x18] sm:$0xf] }
  0x11   : > { %332 = vmatpush.bf16.msrb.mxu2 %v2008_v1  ;;  %351 = vmatpush.bf16.msrb.mxu3 %v2008_v1  ;;  %v416_v11 = vld [vmem:[%s2022_s25 + $0x1c] sm:$0xf]  ;;  %v1849_v12 = vld [vmem:[%s2022_s25 + $0x30] sm:$0xf]  ;;  %v1851_v13 = vld [vmem:[%s2022_s25 + $0x34] sm:$0xf] }
  0x12   : > { %447 = vmatpush.bf16.msrb.mxu0 %v2008_v1  ;;  %467 = vmatpush.bf16.msrb.mxu1 %v2008_v1  ;;  %v1845_v14 = vld [vmem:[%s2022_s25 + $0x28] sm:$0xf]  ;;  %v1847_v15 = vld [vmem:[%s2022_s25 + $0x2c] sm:$0xf]  ;;  %v1857_v16 = vld [vmem:[%s2022_s25 + $0x40] sm:$0xf] }
  0x13   : > { %1837 = vmatmul.msk.bf16.vlgmr.msra.gmra.mxu0 %vm278_vm1, %v359_v4  ;;  %1838 = vmatmul.msk.bf16.vlgmr.msra.gmra.mxu1 %vm278_vm1, %v378_v5  ;;  %v1859_v17 = vld [vmem:[%s2022_s25 + $0x44] sm:$0xf]  ;;  %v1853_v18 = vld [vmem:[%s2022_s25 + $0x38] sm:$0xf]  ;;  %v1855_v19 = vld [vmem:[%s2022_s25 + $0x3c] sm:$0xf] }
  0x14   : > { %v1865_v20 = vld [vmem:[%s2022_s25 + $0x50] sm:$0xf]  ;;  %v1867_v21 = vld [vmem:[%s2022_s25 + $0x54] sm:$0xf]  ;;  %v1861_v22 = vld [vmem:[%s2022_s25 + $0x48] sm:$0xf] }
  0x15   : > { %408 = vmatpush.bf16.msra.mxu2 %v2008_v1  ;;  %427 = vmatpush.bf16.msra.mxu3 %v2008_v1  ;;  %v1863_v23 = vld [vmem:[%s2022_s25 + $0x4c] sm:$0xf]  ;;  %v1873_v24 = vld [vmem:[%s2022_s25 + $0x60] sm:$0xf]  ;;  %v1875_v25 = vld [vmem:[%s2022_s25 + $0x64] sm:$0xf] }
  0x16   : > { %524 = vmatpush.bf16.msra.mxu0 %v2008_v1  ;;  %543 = vmatpush.bf16.msra.mxu1 %v2008_v1  ;;  %v1869_v26 = vld [vmem:[%s2022_s25 + $0x58] sm:$0xf]  ;;  %v1871_v27 = vld [vmem:[%s2022_s25 + $0x5c] sm:$0xf]  ;;  %v1881_v28 = vld [vmem:[%s2022_s25 + $0x70] sm:$0xf] }
  0x17   : > { %v1883_v29 = vld [vmem:[%s2022_s25 + $0x74] sm:$0xf]  ;;  %227 = vst.msk [vmem:[#allocation2] sm:$0xff] %vm226_vm2, %v1966_v30  ;;  %v1877_v31 = vld [vmem:[%s2022_s25 + $0x68] sm:$0xf]  ;;  %v1192_v51 = vsel %vm926_vm3, %v1906_v49, 0 }
  0x18   : > { %228 = vst.msk [vmem:[#allocation2 + $0x8] sm:$0xff] %vm226_vm2, %v1966_v30  ;;  %v1879_v32 = vld [vmem:[%s2022_s25 + $0x6c] sm:$0xf]  ;;  %v1885_v33 = vld [vmem:[%s2022_s25 + $0x78] sm:$0xf] }
  0x19   : > { %229 = vst.msk [vmem:[#allocation2 + $0x10] sm:$0xff] %vm226_vm2, %v1966_v30  ;;  %v1887_v34 = vld [vmem:[%s2022_s25 + $0x7c] sm:$0xf]  ;;  %s1945_s25 = sshll.u32 %s2677_s19, 5 }
  0x1a   : > { %230 = vst.msk [vmem:[#allocation2 + $0x18] sm:$0xff] %vm226_vm2, %v1966_v30  ;;  %s2604_s28 = scalar_lea.vmem %s2675_s5, %s1945_s25 }
  0x1b   : > { %231 = vst.msk [vmem:[#allocation2 + $0x20] sm:$0xff] %vm226_vm2, %v1966_v30 }
  0x1c   : > { %232 = vst.msk [vmem:[#allocation2 + $0x28] sm:$0xff] %vm226_vm2, %v1966_v30 }
  0x1d   : > { %233 = vst.msk [vmem:[#allocation2 + $0x30] sm:$0xff] %vm226_vm2, %v1966_v30 }
  0x1e   : > { %234 = vst.msk [vmem:[#allocation2 + $0x38] sm:$0xff] %vm226_vm2, %v1966_v30 }
  0x1f   : > { %235 = vst.msk [vmem:[#allocation2 + $0x40] sm:$0xff] %vm226_vm2, %v1966_v30 }
  0x20   : > { %1835 = vmatmul.msk.bf16.vlgmr.msrb.gmra.mxu2 %vm278_vm1, %v321_v6  ;;  %1836 = vmatmul.msk.bf16.vlgmr.msrb.gmra.mxu3 %vm278_vm1, %v340_v7  ;;  %236 = vst.msk [vmem:[#allocation2 + $0x48] sm:$0xff] %vm226_vm2, %v1966_v30 }
  0x21   : > { %486 = vmatpush.bf16.msrb.mxu2 %v2008_v1  ;;  %505 = vmatpush.bf16.msrb.mxu3 %v2008_v1  ;;  %239 = vst.msk [vmem:[#allocation2 + $0x58] sm:$0xff] %vm226_vm2, %v1966_v30 }
  0x22   : > { %240 = vst.msk [vmem:[#allocation2 + $0x60] sm:$0xff] %vm226_vm2, %v1966_v30 }
  0x23   : > { %1842 = vmatmul.msk.bf16.vlgmr.msrb.gmra.mxu0 %vm278_vm1, %v1841_v8  ;;  %1844 = vmatmul.msk.bf16.vlgmr.msrb.gmra.mxu1 %vm278_vm1, %v1843_v9  ;;  %241 = vst.msk [vmem:[#allocation2 + $0x68] sm:$0xff] %vm226_vm2, %v1966_v30 }
  0x24   : > { %601 = vmatpush.bf16.msrb.mxu0 %v2008_v1  ;;  %621 = vmatpush.bf16.msrb.mxu1 %v2008_v1  ;;  %242 = vst.msk [vmem:[#allocation2 + $0x70] sm:$0xff] %vm226_vm2, %v1966_v30 }
  0x25   : > { %243 = vst.msk [vmem:[#allocation2 + $0x78] sm:$0xff] %vm226_vm2, %v1966_v30 }
  0x26   : > { %244 = vst.msk [vmem:[#allocation2 + $0x80] sm:$0xff] %vm226_vm2, %v1966_v30 }
  0x27   : > { %245 = vst.msk [vmem:[#allocation2 + $0x88] sm:$0xff] %vm226_vm2, %v1966_v30 }
  0x28   : > { %246 = vst.msk [vmem:[#allocation2 + $0x90] sm:$0xff] %vm226_vm2, %v1966_v30 }
  0x29   : > { %247 = vst.msk [vmem:[#allocation2 + $0x98] sm:$0xff] %vm226_vm2, %v1966_v30 }
  0x2a   : > { %248 = vst.msk [vmem:[#allocation2 + $0xa0] sm:$0xff] %vm226_vm2, %v1966_v30 }
  0x2b   : > { %250 = vst.msk [vmem:[#allocation2 + $0xb0] sm:$0xff] %vm226_vm2, %v1966_v30 }
  0x2c   : > { %251 = vst.msk [vmem:[#allocation2 + $0xb8] sm:$0xff] %vm226_vm2, %v1966_v30 }
  0x2d   : > { %252 = vst.msk [vmem:[#allocation2 + $0xc0] sm:$0xff] %vm226_vm2, %v1966_v30 }
  0x2e   : > { %253 = vst.msk [vmem:[#allocation2 + $0xc8] sm:$0xff] %vm226_vm2, %v1966_v30 }
  0x2f   : > { %254 = vst.msk [vmem:[#allocation2 + $0xd0] sm:$0xff] %vm226_vm2, %v1966_v30 }
  0x30   : > { %1839 = vmatmul.msk.bf16.vlgmr.msra.gmra.mxu2 %vm278_vm1, %v397_v10  ;;  %1840 = vmatmul.msk.bf16.vlgmr.msra.gmra.mxu3 %vm278_vm1, %v416_v11  ;;  %255 = vst.msk [vmem:[#allocation2 + $0xd8] sm:$0xff] %vm226_vm2, %v1966_v30 }
  0x31   : > { %562 = vmatpush.bf16.msra.mxu2 %v2008_v1  ;;  %581 = vmatpush.bf16.msra.mxu3 %v2008_v1  ;;  %256 = vst.msk [vmem:[#allocation2 + $0xe0] sm:$0xff] %vm226_vm2, %v1966_v30 }
  0x32   : > { %257 = vst.msk [vmem:[#allocation2 + $0xe8] sm:$0xff] %vm226_vm2, %v1966_v30 }
  0x33   : > { %1850 = vmatmul.msk.bf16.vlgmr.msra.gmra.mxu0 %vm278_vm1, %v1849_v12  ;;  %1852 = vmatmul.msk.bf16.vlgmr.msra.gmra.mxu1 %vm278_vm1, %v1851_v13  ;;  %258 = vst.msk [vmem:[#allocation2 + $0xf0] sm:$0xff] %vm226_vm2, %v1966_v30 }
  0x34   : > { %678 = vmatpush.bf16.msra.mxu0 %v2008_v1  ;;  %697 = vmatpush.bf16.msra.mxu1 %v2008_v1  ;;  %259 = vst.msk [vmem:[#allocation2 + $0xf8] sm:$0xff] %vm226_vm2, %v1966_v30 }
  0x35   : > { %262 = vst.msk [vmem:[#allocation2 + $0x110] sm:$0xff] %vm226_vm2, %v1966_v30 }
  0x36   : > { %263 = vst.msk [vmem:[#allocation2 + $0x118] sm:$0xff] %vm226_vm2, %v1966_v30 }
  0x37   : > { %264 = vst.msk [vmem:[#allocation2 + $0x120] sm:$0xff] %vm226_vm2, %v1966_v30 }
  0x38   : > { %265 = vst.msk [vmem:[#allocation2 + $0x128] sm:$0xff] %vm226_vm2, %v1966_v30 }
  0x39   : > { %266 = vst.msk [vmem:[#allocation2 + $0x130] sm:$0xff] %vm226_vm2, %v1966_v30 }
  0x3a   : > { %267 = vst.msk [vmem:[#allocation2 + $0x138] sm:$0xff] %vm226_vm2, %v1966_v30 }
  0x3b   : > { %268 = vst.msk [vmem:[#allocation2 + $0x140] sm:$0xff] %vm226_vm2, %v1966_v30 }
  0x3c   : > { %269 = vst.msk [vmem:[#allocation2 + $0x148] sm:$0xff] %vm226_vm2, %v1966_v30 }
  0x3d   : > { %238 = vst.msk [vmem:[#allocation2 + $0x50] sm:$0x3] %vm237_vm4, %v1966_v30 }
  0x3e   : > { %249 = vst.msk [vmem:[#allocation2 + $0xa8] sm:$0x3] %vm237_vm4, %v1966_v30 }
  0x40   : > { %1846 = vmatmul.msk.bf16.vlgmr.msrb.gmra.mxu2 %vm278_vm1, %v1845_v14  ;;  %1848 = vmatmul.msk.bf16.vlgmr.msrb.gmra.mxu3 %vm278_vm1, %v1847_v15 }
  0x41   : > { %640 = vmatpush.bf16.msrb.mxu2 %v2008_v1  ;;  %659 = vmatpush.bf16.msrb.mxu3 %v2008_v1 }
  0x43   : > { %1858 = vmatmul.msk.bf16.vlgmr.msrb.gmra.mxu0 %vm278_vm1, %v1857_v16  ;;  %1860 = vmatmul.msk.bf16.vlgmr.msrb.gmra.mxu1 %vm278_vm1, %v1859_v17 }
  0x44   : > { %755 = vmatpush.bf16.msrb.mxu0 %v2008_v1  ;;  %774 = vmatpush.bf16.msrb.mxu1 %v2008_v1 }
  0x50   : > { %1854 = vmatmul.msk.bf16.vlgmr.msra.gmra.mxu2 %vm278_vm1, %v1853_v18  ;;  %1856 = vmatmul.msk.bf16.vlgmr.msra.gmra.mxu3 %vm278_vm1, %v1855_v19 }
  0x51   : > { %716 = vmatpush.bf16.msra.mxu2 %v2008_v1  ;;  %735 = vmatpush.bf16.msra.mxu3 %v2008_v1 }
  0x53   : > { %1866 = vmatmul.msk.bf16.vlgmr.msra.gmra.mxu0 %vm278_vm1, %v1865_v20  ;;  %1868 = vmatmul.msk.bf16.vlgmr.msra.gmra.mxu1 %vm278_vm1, %v1867_v21 }
  0x54   : > { %831 = vmatpush.bf16.msra.mxu0 %v2008_v1  ;;  %850 = vmatpush.bf16.msra.mxu1 %v2008_v1 }
  0x60   : > { %1862 = vmatmul.msk.bf16.vlgmr.msrb.gmra.mxu2 %vm278_vm1, %v1861_v22  ;;  %1864 = vmatmul.msk.bf16.vlgmr.msrb.gmra.mxu3 %vm278_vm1, %v1863_v23 }
  0x61   : > { %793 = vmatpush.bf16.msrb.mxu2 %v2008_v1  ;;  %812 = vmatpush.bf16.msrb.mxu3 %v2008_v1 }
  0x63   : > { %1874 = vmatmul.msk.bf16.vlgmr.msrb.gmra.mxu0 %vm278_vm1, %v1873_v24  ;;  %1876 = vmatmul.msk.bf16.vlgmr.msrb.gmra.mxu1 %vm278_vm1, %v1875_v25 }
  0x70   : > { %1870 = vmatmul.msk.bf16.vlgmr.msra.gmra.mxu2 %vm278_vm1, %v1869_v26  ;;  %1872 = vmatmul.msk.bf16.vlgmr.msra.gmra.mxu3 %vm278_vm1, %v1871_v27 }
  0x71   : > { %869 = vmatpush.bf16.msra.mxu2 %v2008_v1  ;;  %888 = vmatpush.bf16.msra.mxu3 %v2008_v1 }
  0x73   : > { %1882 = vmatmul.msk.bf16.vlgmr.msra.gmra.mxu0 %vm278_vm1, %v1881_v28  ;;  %1884 = vmatmul.msk.bf16.vlgmr.msra.gmra.mxu1 %vm278_vm1, %v1883_v29 }
  0x80   : > { %1878 = vmatmul.msk.bf16.vlgmr.msrb.gmra.mxu2 %vm278_vm1, %v1877_v31  ;;  %1880 = vmatmul.msk.bf16.vlgmr.msrb.gmra.mxu3 %vm278_vm1, %v1879_v32 }
  0x81   : > { %1201 = vmatpush.bf16.msrb.mxu3 %v1192_v51 }
  0x90   : > { %v372_v35 = vpop.f32.mrf.mxu0  ;;  %v391_v36 = vpop.f32.mrf.mxu1  ;;  %1886 = vmatmul.msk.bf16.vlgmr.msra.gmra.mxu2 %vm278_vm1, %v1885_v33  ;;  %1888 = vmatmul.msk.bf16.vlgmr.msra.gmra.mxu3 %vm278_vm1, %v1887_v34 }
  0x91   : > { %v373_v40 = vadd.f32 %v2177_v37, %v372_v35  ;;  %v392_v43 = vadd.f32 %v2177_v37, %v391_v36 }
  0x93   : > { %v295_v38 = vpop.f32.mrf.mxu3  ;;  %v315_v39 = vpop.f32.mrf.mxu2  ;;  %v376_v48 = vmax.f32 %v373_v40, 0.0  ;;  %v395_v50 = vmax.f32 %v392_v43, 0.0 }
  0x94   : > { %v296_v41 = vadd.f32 %v2177_v37, %v295_v38  ;;  %v316_v42 = vadd.f32 %v2177_v37, %v315_v39 }
  0x95   : > { %377 = vst.msk [vmem:[#allocation2 + $0x12c] sm:$0xff] %vm226_vm2, %v376_v48 }
  0x96   : > { %v299_v44 = vmax.f32 %v296_v41, 0.0  ;;  %v319_v45 = vmax.f32 %v316_v42, 0.0  ;;  %396 = vst.msk [vmem:[#allocation2 + $0x135] sm:$0xff] %vm226_vm2, %v395_v50 }
  0x98   : > { %v374_v46 = vpop.f32.mrf.mxu0  ;;  %v393_v47 = vpop.f32.mrf.mxu1  ;;  %301 = vst.msk [vmem:[#allocation2 + $0x108] sm:$0xff] %vm226_vm2, %v299_v44 }
  0x99   : > { %320 = vst.msk [vmem:[#allocation2 + $0x111] sm:$0xff] %vm226_vm2, %v319_v45 }
  0x9b   : > { %v297_v52 = vpop.f32.mrf.mxu3  ;;  %v317_v53 = vpop.f32.mrf.mxu2 }
  0xa0   : > { %v449_v54 = vpop.f32.mrf.mxu0  ;;  %v469_v55 = vpop.f32.mrf.mxu1 }
  0xa1   : > { %v450_v56 = vadd.f32 %v2177_v37, %v449_v54  ;;  %v470_v57 = vadd.f32 %v2177_v37, %v469_v55 }
  0xa3   : > { %v453_v58 = vmax.f32 %v450_v56, 0.0  ;;  %v473_v59 = vmax.f32 %v470_v57, 0.0  ;;  %v334_v60 = vpop.f32.mrf.mxu2  ;;  %v353_v61 = vpop.f32.mrf.mxu3 }
  0xa4   : > { %v335_v62 = vadd.f32 %v2177_v37, %v334_v60  ;;  %v354_v63 = vadd.f32 %v2177_v37, %v353_v61  ;;  %v910_v60 = vld [vmem:[%s2673_s3] sm:$0x3]  ;;  %v1900_v61 = vld [vmem:[%s2673_s3 + $0x4] sm:$0x3] }
  0xa5   : > { %455 = vst.msk [vmem:[#allocation2 + $0xb1] sm:$0xff] %vm226_vm2, %v453_v58 }
  0xa6   : > { %474 = vst.msk [vmem:[#allocation2 + $0xba] sm:$0xff] %vm226_vm2, %v473_v59  ;;  %v338_v0 = vmax.f32 %v335_v62, 0.0  ;;  %v357_v1 = vmax.f32 %v354_v63, 0.0  ;;  %v928_v62 = vsel %vm926_vm3, %v910_v60, 0  ;;  %v1098_v63 = vsel %vm926_vm3, %v1900_v61, 0 }
  0xa7   : > { %937 = vmatpush.bf16.msrb.mxu0 %v928_v62  ;;  %1107 = vmatpush.bf16.msrb.mxu2 %v1098_v63 }
  0xa8   : > { %v451_v2 = vpop.f32.mrf.mxu0  ;;  %v471_v3 = vpop.f32.mrf.mxu1  ;;  %339 = vst.msk [vmem:[#allocation2 + $0x11a] sm:$0xff] %vm226_vm2, %v338_v0  ;;  %1946 = vmatpush.bf16.msrb.mxu1 %v928_v62 }
  0xa9   : > { %358 = vst.msk [vmem:[#allocation2 + $0x123] sm:$0xff] %vm226_vm2, %v357_v1 }
  0xab   : > { %v336_v5 = vpop.f32.mrf.mxu2  ;;  %v355_v6 = vpop.f32.mrf.mxu3 }
  0xac   : > { %v1160_v4 = vld [vmem:[#allocation2 + $0xb0] sm:$0xff] }
  0xad   : > { %v1161_v7 = vld [vmem:[#allocation2 + $0xb8] sm:$0xff] }
  0xae   : > { %v1169_v8 = vpack.c.bf16 %v1161_v7, %v1160_v4 }
  0xb0   : > { %1907 = vmatmul.msk.bf16.vlgmr.msrb.gmra.mxu3 %vm226_vm2, %v1169_v8  ;;  %v526_v9 = vpop.f32.mrf.mxu0  ;;  %v545_v11 = vpop.f32.mrf.mxu1 }
  0xb1   : > { %v527_v10 = vadd.f32 %v2177_v37, %v526_v9  ;;  %v546_v12 = vadd.f32 %v2177_v37, %v545_v11 }
  0xb3   : > { %v530_v13 = vmax.f32 %v527_v10, 0.0  ;;  %v549_v14 = vmax.f32 %v546_v12, 0.0  ;;  %v410_v15 = vpop.f32.mrf.mxu2  ;;  %v429_v16 = vpop.f32.mrf.mxu3 }
  0xb4   : > { %v411_v17 = vadd.f32 %v2177_v37, %v410_v15  ;;  %v430_v18 = vadd.f32 %v2177_v37, %v429_v16 }
  0xb5   : > { %531 = vst.msk [vmem:[#allocation2 + $0xd5] sm:$0xff] %vm226_vm2, %v530_v13 }
  0xb6   : > { %550 = vst.msk [vmem:[#allocation2 + $0xde] sm:$0xff] %vm226_vm2, %v549_v14  ;;  %v414_v19 = vmax.f32 %v411_v17, 0.0  ;;  %v433_v20 = vmax.f32 %v430_v18, 0.0  ;;  %v896_v18 = vld [vmem:[#allocation2] sm:$0xff] }
  0xb8   : > { %v528_v21 = vpop.f32.mrf.mxu0  ;;  %v547_v22 = vpop.f32.mrf.mxu1  ;;  %415 = vst.msk [vmem:[#allocation2 + $0x13e] sm:$0xff] %vm226_vm2, %v414_v19  ;;  %v1066_v19 = vld [vmem:[#allocation2 + $0x1] sm:$0xff] }
  0xb9   : > { %434 = vst.msk [vmem:[#allocation2 + $0x147] sm:$0xff] %vm226_vm2, %v433_v20 }
  0xbb   : > { %v412_v23 = vpop.f32.mrf.mxu2  ;;  %v431_v24 = vpop.f32.mrf.mxu3 }
  0xbd   : > { %v1165_v3 = vld [vmem:[#allocation2 + $0xd8] sm:$0xff] }
  0xc0   : > { %v603_v25 = vpop.f32.mrf.mxu0  ;;  %v623_v27 = vpop.f32.mrf.mxu1 }
  0xc1   : > { %v604_v26 = vadd.f32 %v2177_v37, %v603_v25  ;;  %v624_v28 = vadd.f32 %v2177_v37, %v623_v27 }
  0xc3   : > { %v607_v29 = vmax.f32 %v604_v26, 0.0  ;;  %v627_v31 = vmax.f32 %v624_v28, 0.0  ;;  %v488_v32 = vpop.f32.mrf.mxu2  ;;  %v507_v33 = vpop.f32.mrf.mxu3  ;;  %v1930_v26 = vld [vmem:[%s2673_s3 + $0xe] sm:$0x3] }
  0xc4   : > { %v489_v34 = vadd.f32 %v2177_v37, %v488_v32  ;;  %v508_v35 = vadd.f32 %v2177_v37, %v507_v33  ;;  %v1568_v28 = vsel %vm926_vm3, %v1930_v26, 0  ;;  %v1255_v26 = vld [vmem:[#allocation2 + $0x110] sm:$0xff] }
  0xc5   : > { %609 = vst.msk [vmem:[#allocation2 + $0x61] sm:$0xff] %vm226_vm2, %v607_v29  ;;  %1577 = vmatpush.bf16.msra.mxu3 %v1568_v28 }
  0xc6   : > { %628 = vst.msk [vmem:[#allocation2 + $0x6a] sm:$0xff] %vm226_vm2, %v627_v31  ;;  %v492_v36 = vmax.f32 %v489_v34, 0.0  ;;  %v511_v38 = vmax.f32 %v508_v35, 0.0 }
  0xc8   : > { %v605_v39 = vpop.f32.mrf.mxu0  ;;  %v625_v40 = vpop.f32.mrf.mxu1  ;;  %493 = vst.msk [vmem:[#allocation2 + $0xc3] sm:$0xff] %vm226_vm2, %v492_v36 }
  0xc9   : > { %512 = vst.msk [vmem:[#allocation2 + $0xcc] sm:$0xff] %vm226_vm2, %v511_v38 }
  0xcb   : > { %v490_v41 = vpop.f32.mrf.mxu2  ;;  %v509_v42 = vpop.f32.mrf.mxu3 }
  0xcf   : > { %v1162_v44 = vld [vmem:[#allocation2 + $0xc0] sm:$0xff] }
  0xd0   : > { %v680_v43 = vpop.f32.mrf.mxu0  ;;  %v699_v46 = vpop.f32.mrf.mxu1  ;;  %v1163_v47 = vld [vmem:[#allocation2 + $0xc8] sm:$0xff]  ;;  %v1164_v2 = vld [vmem:[#allocation2 + $0xd0] sm:$0xff] }
  0xd1   : > { %v681_v45 = vadd.f32 %v2177_v37, %v680_v43  ;;  %v700_v48 = vadd.f32 %v2177_v37, %v699_v46  ;;  %v1170_v49 = vpack.c.bf16 %v1163_v47, %v1162_v44  ;;  %v1171_v8 = vpack.c.bf16 %v1165_v3, %v1164_v2  ;;  %v1894_v43 = vld [vmem:[%s2673_s3 + $0x2] sm:$0x3]  ;;  %v1537_v3 = vld [vmem:[#allocation2 + $0x69] sm:$0xff] }
  0xd2   : > { %v1004_v46 = vsel %vm926_vm3, %v1894_v43, 0  ;;  %v1536_v2 = vld [vmem:[#allocation2 + $0x61] sm:$0xff] }
  0xd3   : > { %v684_v50 = vmax.f32 %v681_v45, 0.0  ;;  %v703_v51 = vmax.f32 %v700_v48, 0.0  ;;  %1908 = vmatmul.msk.bf16.gmra.mxu3 %vm226_vm2, %v1170_v49  ;;  %v564_v52 = vpop.f32.mrf.mxu2  ;;  %v583_v53 = vpop.f32.mrf.mxu3  ;;  %1013 = vmatpush.bf16.msra.mxu1 %v1004_v46  ;;  %v1256_v46 = vld [vmem:[#allocation2 + $0x118] sm:$0xff] }
  0xd4   : > { %v565_v54 = vadd.f32 %v2177_v37, %v564_v52  ;;  %v584_v55 = vadd.f32 %v2177_v37, %v583_v53 }
  0xd5   : > { %685 = vst.msk [vmem:[#allocation2 + $0x85] sm:$0xff] %vm226_vm2, %v684_v50 }
  0xd6   : > { %704 = vst.msk [vmem:[#allocation2 + $0x8e] sm:$0xff] %vm226_vm2, %v703_v51  ;;  %v568_v56 = vmax.f32 %v565_v54, 0.0  ;;  %v587_v57 = vmax.f32 %v584_v55, 0.0  ;;  %v1912_v51 = vld [vmem:[%s2673_s3 + $0x8] sm:$0x3] }
  0xd7   : > { %v1286_v52 = vsel %vm926_vm3, %v1912_v51, 0 }
  0xd8   : > { %v682_v58 = vpop.f32.mrf.mxu0  ;;  %v701_v59 = vpop.f32.mrf.mxu1  ;;  %569 = vst.msk [vmem:[#allocation2 + $0xe7] sm:$0xff] %vm226_vm2, %v568_v56  ;;  %1295 = vmatpush.bf16.msra.mxu0 %v1286_v52 }
  0xd9   : > { %588 = vst.msk [vmem:[#allocation2 + $0xf0] sm:$0xff] %vm226_vm2, %v587_v57 }
  0xdb   : > { %v566_v0 = vpop.f32.mrf.mxu2  ;;  %v585_v1 = vpop.f32.mrf.mxu3 }
  0xdf   : > { %v1166_v31 = vld [vmem:[#allocation2 + $0xe0] sm:$0xff]  ;;  %v1167_v32 = vld [vmem:[#allocation2 + $0xe8] sm:$0xff] }
  0xe0   : > { %v757_v4 = vpop.f32.mrf.mxu0  ;;  %v776_v6 = vpop.f32.mrf.mxu1  ;;  %v1172_v38 = vpack.c.bf16 %v1167_v32, %v1166_v31  ;;  %v1168_v55 = vld [vmem:[#allocation2 + $0xf0] sm:$0xff] }
  0xe1   : > { %v758_v5 = vadd.f32 %v2177_v37, %v757_v4  ;;  %v777_v7 = vadd.f32 %v2177_v37, %v776_v6  ;;  %v1173_v56 = vpack.c.bf16 %v1168_v55, %v1168_v55  ;;  %v972_v55 = vld [vmem:[#allocation2 + $0x58] sm:$0xff] }
  0xe3   : > { %v761_v9 = vmax.f32 %v758_v5, 0.0  ;;  %v780_v10 = vmax.f32 %v777_v7, 0.0  ;;  %1909 = vmatmul.msk.bf16.gmra.mxu3 %vm226_vm2, %v1171_v8  ;;  %v642_v11 = vpop.f32.mrf.mxu2  ;;  %v661_v12 = vpop.f32.mrf.mxu3 }
  0xe4   : > { %v643_v13 = vadd.f32 %v2177_v37, %v642_v11  ;;  %v662_v30 = vadd.f32 %v2177_v37, %v661_v12 }
  0xe5   : > { %762 = vst.msk [vmem:[#allocation2 + $0xa] sm:$0xff] %vm226_vm2, %v761_v9 }
  0xe6   : > { %781 = vst.msk [vmem:[#allocation2 + $0x13] sm:$0xff] %vm226_vm2, %v780_v10  ;;  %v646_v14 = vmax.f32 %v643_v13, 0.0  ;;  %v665_v15 = vmax.f32 %v662_v30, 0.0  ;;  %v1545_v13 = vpack.c.bf16 %v1537_v3, %v1536_v2  ;;  %v1260_v3 = vld [vmem:[#allocation2 + $0x138] sm:$0xff] }
  0xe8   : > { %v759_v16 = vpop.f32.mrf.mxu0  ;;  %v778_v17 = vpop.f32.mrf.mxu1  ;;  %647 = vst.msk [vmem:[#allocation2 + $0x73] sm:$0xff] %vm226_vm2, %v646_v14 }
  0xe9   : > { %666 = vst.msk [vmem:[#allocation2 + $0x7c] sm:$0xff] %vm226_vm2, %v665_v15 }
  0xeb   : > { %v644_v22 = vpop.f32.mrf.mxu2  ;;  %v663_v23 = vpop.f32.mrf.mxu3 }
  0xec   : > { %v897_v20 = vld [vmem:[#allocation2 + $0x8] sm:$0xff] }
  0xed   : > { %v2262_v21 = vld [vmem:[#allocation2 + $0x9] sm:$0xff]  ;;  %v905_v24 = vpack.c.bf16 %v897_v20, %v896_v18  ;;  %v2268_v27 = vld [vmem:[#allocation2 + $0x11] sm:$0xff] }
  0xee   : > { %v1075_v25 = vpack.c.bf16 %v2262_v21, %v1066_v19  ;;  %v1451_v29 = vpack.c.bf16 %v2268_v27, %v2262_v21  ;;  %v898_v1 = vld [vmem:[#allocation2 + $0x10] sm:$0xff] }
  0xef   : > { %1889 = vmatmul.msk.bf16.vlgmr.msrb.gmra.mxu0 %vm226_vm2, %v905_v24  ;;  %v1538_v28 = vld [vmem:[#allocation2 + $0x71] sm:$0xff] }
  0xf0   : > { %1901 = vmatmul.msk.bf16.vlgmr.msrb.gmra.mxu2 %vm226_vm2, %v1075_v25  ;;  %v833_v33 = vpop.f32.mrf.mxu0  ;;  %v852_v35 = vpop.f32.mrf.mxu1  ;;  %v1254_v25 = vld [vmem:[#allocation2 + $0x108] sm:$0xff] }
  0xf1   : > { %v834_v34 = vadd.f32 %v2177_v37, %v833_v33  ;;  %v853_v36 = vadd.f32 %v2177_v37, %v852_v35  ;;  %v1539_v33 = vld [vmem:[#allocation2 + $0x79] sm:$0xff] }
  0xf3   : > { %v837_v39 = vmax.f32 %v834_v34, 0.0  ;;  %v856_v40 = vmax.f32 %v853_v36, 0.0  ;;  %1910 = vmatmul.msk.bf16.gmra.mxu3 %vm226_vm2, %v1172_v38  ;;  %v718_v41 = vpop.f32.mrf.mxu2  ;;  %v737_v42 = vpop.f32.mrf.mxu3  ;;  %v1263_v36 = vpack.c.bf16 %v1255_v26, %v1254_v25  ;;  %v1631_v25 = vld [vmem:[#allocation2 + $0x12] sm:$0xff] }
  0xf4   : > { %v719_v44 = vadd.f32 %v2177_v37, %v718_v41  ;;  %v738_v45 = vadd.f32 %v2177_v37, %v737_v42  ;;  %v1918_v41 = vld [vmem:[%s2673_s3 + $0xa] sm:$0x3]  ;;  %v1924_v42 = vld [vmem:[%s2673_s3 + $0xc] sm:$0x3] }
  0xf5   : > { %838 = vst.msk [vmem:[#allocation2 + $0x2e] sm:$0xff] %vm226_vm2, %v837_v39  ;;  %v1380_v43 = vsel %vm926_vm3, %v1918_v41, 0 }
  0xf6   : > { %857 = vst.msk [vmem:[#allocation2 + $0x37] sm:$0xff] %vm226_vm2, %v856_v40  ;;  %v722_v47 = vmax.f32 %v719_v44, 0.0  ;;  %v741_v48 = vmax.f32 %v738_v45, 0.0  ;;  %v1546_v40 = vpack.c.bf16 %v1539_v33, %v1538_v28  ;;  %v1474_v44 = vsel %vm926_vm3, %v1924_v42, 0 }
  0xf7   : > { %1483 = vmatpush.bf16.msra.mxu2 %v1474_v44 }
  0xf8   : > { %v835_v49 = vpop.f32.mrf.mxu0  ;;  %v854_v50 = vpop.f32.mrf.mxu1  ;;  %723 = vst.msk [vmem:[#allocation2 + $0x97] sm:$0xff] %vm226_vm2, %v722_v47  ;;  %v1257_v47 = vld [vmem:[#allocation2 + $0x120] sm:$0xff] }
  0xf9   : > { %742 = vst.msk [vmem:[#allocation2 + $0xa0] sm:$0xff] %vm226_vm2, %v741_v48  ;;  %v1540_v48 = vld [vmem:[#allocation2 + $0x81] sm:$0xff]  ;;  %v1541_v49 = vld [vmem:[#allocation2 + $0x89] sm:$0xff]  ;;  %v1264_v52 = vpack.c.bf16 %v1257_v47, %v1256_v46  ;;  %v1349_v46 = vld [vmem:[#allocation2 + $0xb9] sm:$0xff] }
  0xfb   : > { %v720_v53 = vpop.f32.mrf.mxu2  ;;  %v739_v54 = vpop.f32.mrf.mxu3 }
  0xfc   : > { %v1547_v53 = vpack.c.bf16 %v1541_v49, %v1540_v48  ;;  %v1259_v54 = vld [vmem:[#allocation2 + $0x130] sm:$0xff] }
  0xfd   : > { %v2299_v6 = vld [vmem:[#allocation2 + $0x31] sm:$0xff] }
  0xfe   : > { %v902_v31 = vld [vmem:[#allocation2 + $0x30] sm:$0xff]  ;;  %v903_v32 = vld [vmem:[#allocation2 + $0x38] sm:$0xff] }
  0xff   : > { %v908_v39 = vpack.c.bf16 %v903_v32, %v902_v31  ;;  %v979_v28 = vld [vmem:[#allocation2 + $0x90] sm:$0xff]  ;;  %v978_v31 = vld [vmem:[#allocation2 + $0x88] sm:$0xff] }
 0x100   : > { %v984_v33 = vpack.c.bf16 %v979_v28, %v978_v31  ;;  %v1354_v31 = vld [vmem:[#allocation2 + $0xe1] sm:$0xff] }
 0x103   : > { %1911 = vmatmul.msk.bf16.gmra.mxu3 %vm226_vm2, %v1173_v56  ;;  %v795_v57 = vpop.f32.mrf.mxu2  ;;  %v814_v58 = vpop.f32.mrf.mxu3  ;;  %v973_v56 = vld [vmem:[#allocation2 + $0x60] sm:$0xff] }
 0x104   : > { %v796_v59 = vadd.f32 %v2177_v37, %v795_v57  ;;  %v815_v60 = vadd.f32 %v2177_v37, %v814_v58  ;;  %v1258_v57 = vld [vmem:[#allocation2 + $0x128] sm:$0xff]  ;;  %v1542_v58 = vld [vmem:[#allocation2 + $0x91] sm:$0xff] }
 0x106   : > { %v799_v61 = vmax.f32 %v796_v59, 0.0  ;;  %v818_v62 = vmax.f32 %v815_v60, 0.0  ;;  %v1543_v59 = vld [vmem:[#allocation2 + $0x99] sm:$0xff]  ;;  %v1936_v60 = vld [vmem:[%s2673_s3 + $0x10] sm:$0x3] }
 0x108   : > { %800 = vst.msk [vmem:[#allocation2 + $0x1c] sm:$0xff] %vm226_vm2, %v799_v61  ;;  %v1662_v61 = vsel %vm926_vm3, %v1936_v60, 0 }
 0x109   : > { %819 = vst.msk [vmem:[#allocation2 + $0x25] sm:$0xff] %vm226_vm2, %v818_v62  ;;  %1671 = vmatpush.bf16.msrb.mxu0 %v1662_v61 }
 0x10b   : > { %v797_v63 = vpop.f32.mrf.mxu2  ;;  %v816_v0 = vpop.f32.mrf.mxu3 }
 0x10c   : > { %v1265_v63 = vpack.c.bf16 %v1259_v54, %v1258_v57  ;;  %v981_v0 = vpack.c.bf16 %v973_v56, %v972_v55  ;;  %v1350_v56 = vld [vmem:[#allocation2 + $0xc1] sm:$0xff]  ;;  %v1351_v57 = vld [vmem:[#allocation2 + $0xc9] sm:$0xff] }
 0x10d   : > { %v1358_v61 = vpack.c.bf16 %v1351_v57, %v1350_v56 }
 0x10f   : > { %v899_v4 = vld [vmem:[#allocation2 + $0x18] sm:$0xff] }
 0x110   : > { %v2297_v5 = vld [vmem:[#allocation2 + $0x19] sm:$0xff]  ;;  %v906_v7 = vpack.c.bf16 %v899_v4, %v898_v1  ;;  %v901_v9 = vld [vmem:[#allocation2 + $0x28] sm:$0xff]  ;;  %v1548_v1 = vpack.c.bf16 %v1543_v59, %v1542_v58 }
 0x111   : > { %v900_v8 = vld [vmem:[#allocation2 + $0x20] sm:$0xff]  ;;  %v1076_v10 = vpack.c.bf16 %v2297_v5, %v2268_v27  ;;  %v2305_v30 = vld [vmem:[#allocation2 + $0x29] sm:$0xff] }
 0x112   : > { %v2303_v11 = vld [vmem:[#allocation2 + $0x21] sm:$0xff]  ;;  %v907_v12 = vpack.c.bf16 %v901_v9, %v900_v8  ;;  %1890 = vmatmul.msk.bf16.gmra.mxu0 %vm226_vm2, %v906_v7  ;;  %v1453_v15 = vpack.c.bf16 %v2299_v6, %v2305_v30  ;;  %v975_v8 = vld [vmem:[#allocation2 + $0x70] sm:$0xff] }
 0x113   : > { %v1452_v14 = vpack.c.bf16 %v2303_v11, %v2297_v5  ;;  %1902 = vmatmul.msk.bf16.gmra.mxu2 %vm226_vm2, %v1076_v10  ;;  %1931 = vmatmul.msk.bf16.vlgmr.msra.gmra.mxu3 %vm226_vm2, %v1545_v13  ;;  %v871_v16 = vpop.f32.mrf.mxu2  ;;  %v890_v17 = vpop.f32.mrf.mxu3  ;;  %v1261_v4 = vld [vmem:[#allocation2 + $0x140] sm:$0xff]  ;;  %v974_v10 = vld [vmem:[#allocation2 + $0x68] sm:$0xff] }
 0x114   : > { %1891 = vmatmul.msk.bf16.vlgmr.msrb.gmra.mxu1 %vm226_vm2, %v907_v12  ;;  %v872_v18 = vadd.f32 %v2177_v37, %v871_v16  ;;  %v891_v19 = vadd.f32 %v2177_v37, %v890_v17  ;;  %v1077_v37 = vpack.c.bf16 %v2305_v30, %v2303_v11  ;;  %v1544_v9 = vld [vmem:[#allocation2 + $0xa1] sm:$0xff]  ;;  %v1266_v12 = vpack.c.bf16 %v1261_v4, %v1260_v3  ;;  %v1634_v42 = vld [vmem:[#allocation2 + $0x2a] sm:$0xff] }
 0x115   : > { %1389 = vmatpush.bf16.msrb.mxu1 %v1380_v43  ;;  %v982_v13 = vpack.c.bf16 %v975_v8, %v974_v10  ;;  %v1549_v16 = vpack.c.bf16 %v1544_v9, %v1544_v9  ;;  %v1635_v43 = vld [vmem:[#allocation2 + $0x32] sm:$0xff] }
 0x116   : > { %v875_v20 = vmax.f32 %v872_v18, 0.0  ;;  %v894_v22 = vmax.f32 %v891_v19, 0.0  ;;  %v1262_v18 = vld [vmem:[#allocation2 + $0x148] sm:$0xff] }
 0x118   : > { %876 = vst.msk [vmem:[#allocation2 + $0x40] sm:$0xff] %vm226_vm2, %v875_v20  ;;  %v976_v20 = vld [vmem:[#allocation2 + $0x78] sm:$0xff] }
 0x119   : > { %895 = vst.msk [vmem:[#allocation2 + $0x49] sm:$0xff] %vm226_vm2, %v894_v22  ;;  %v977_v22 = vld [vmem:[#allocation2 + $0x80] sm:$0xff] }
 0x11b   : > { %v873_v23 = vpop.f32.mrf.mxu2  ;;  %v892_v24 = vpop.f32.mrf.mxu3 }
 0x11c   : > { %v1267_v23 = vpack.c.bf16 %v1262_v18, %v1262_v18  ;;  %v983_v24 = vpack.c.bf16 %v977_v22, %v976_v20 }
 0x11f   : > { %v2319_v34 = vld [vmem:[#allocation2 + $0x39] sm:$0xff]  ;;  %v2321_v35 = vld [vmem:[#allocation2 + $0x41] sm:$0xff] }
 0x120   : > { %v1454_v38 = vpack.c.bf16 %v2321_v35, %v2319_v34  ;;  %v904_v45 = vld [vmem:[#allocation2 + $0x40] sm:$0xff]  ;;  %v1078_v51 = vpack.c.bf16 %v2319_v34, %v2299_v6  ;;  %v1079_v62 = vpack.c.bf16 %v2321_v35, %v2321_v35  ;;  %v1641_v35 = vpack.c.bf16 %v1635_v43, %v1634_v42  ;;  %v1450_v3 = vld [vmem:[#allocation2 + $0x49] sm:$0xff] }
 0x121   : > { %v909_v50 = vpack.c.bf16 %v904_v45, %v904_v45  ;;  %v1348_v45 = vld [vmem:[#allocation2 + $0xb1] sm:$0xff]  ;;  %v1637_v54 = vld [vmem:[#allocation2 + $0x42] sm:$0xff]  ;;  %v1455_v4 = vpack.c.bf16 %v1450_v3, %v1450_v3 }
 0x122   : > { %1913 = vmatmul.msk.bf16.vlgmr.msra.gmra.mxu0 %vm226_vm2, %v1263_v36  ;;  %v1638_v8 = vld [vmem:[#allocation2 + $0x4a] sm:$0xff] }
 0x123   : > { %1903 = vmatmul.msk.bf16.gmra.mxu2 %vm226_vm2, %v1077_v37  ;;  %1932 = vmatmul.msk.bf16.gmra.mxu3 %vm226_vm2, %v1546_v40  ;;  %v1633_v37 = vld [vmem:[#allocation2 + $0x22] sm:$0xff] }
 0x124   : > { %1892 = vmatmul.msk.bf16.gmra.mxu1 %vm226_vm2, %v908_v39  ;;  %v980_v39 = vld [vmem:[#allocation2 + $0x98] sm:$0xff] }
 0x125   : > { %v985_v41 = vpack.c.bf16 %v980_v39, %v980_v39 }
 0x132   : > { %1914 = vmatmul.msk.bf16.gmra.mxu0 %vm226_vm2, %v1264_v52 }
 0x133   : > { %1904 = vmatmul.msk.bf16.gmra.mxu2 %vm226_vm2, %v1078_v51  ;;  %1933 = vmatmul.msk.bf16.gmra.mxu3 %vm226_vm2, %v1547_v53  ;;  %v2355_v2 = vpop.f32.mrf.mxu3  ;;  %v1636_v53 = vld [vmem:[#allocation2 + $0x3a] sm:$0xff] }
 0x134   : > { %1893 = vmatmul.msk.bf16.gmra.mxu1 %vm226_vm2, %v909_v50  ;;  %v1642_v60 = vpack.c.bf16 %v1637_v54, %v1636_v53 }
 0x13b   : > { %v2357_v7 = vpop.f32.mrf.mxu3 }
 0x142   : > { %1915 = vmatmul.msk.bf16.gmra.mxu0 %vm226_vm2, %v1265_v63 }
 0x143   : > { %1905 = vmatmul.msk.bf16.gmra.mxu2 %vm226_vm2, %v1079_v62  ;;  %1934 = vmatmul.msk.bf16.gmra.mxu3 %vm226_vm2, %v1548_v1 }
 0x144   : > { %1895 = vmatmul.msk.bf16.vlgmr.msra.gmra.mxu1 %vm226_vm2, %v981_v0 }
 0x152   : > { %1916 = vmatmul.msk.bf16.gmra.mxu0 %vm226_vm2, %v1266_v12  ;;  %v1352_v12 = vld [vmem:[#allocation2 + $0xd1] sm:$0xff] }
 0x153   : > { %1925 = vmatmul.msk.bf16.vlgmr.msra.gmra.mxu2 %vm226_vm2, %v1451_v29  ;;  %1935 = vmatmul.msk.bf16.gmra.mxu3 %vm226_vm2, %v1549_v16  ;;  %v1630_v29 = vld [vmem:[#allocation2 + $0xa] sm:$0xff]  ;;  %v1643_v16 = vpack.c.bf16 %v1638_v8, %v1638_v8 }
 0x154   : > { %1896 = vmatmul.msk.bf16.gmra.mxu1 %vm226_vm2, %v982_v13  ;;  %v1639_v32 = vpack.c.bf16 %v1631_v25, %v1630_v29  ;;  %v1353_v13 = vld [vmem:[#allocation2 + $0xd9] sm:$0xff] }
 0x155   : > { %v1359_v22 = vpack.c.bf16 %v1353_v13, %v1352_v12 }
 0x156   : > { %v2366_v17 = vpop.f32.mrf.mxu3 }
 0x15e   : > { %v2368_v19 = vpop.f32.mrf.mxu3 }
 0x162   : > { %1917 = vmatmul.msk.bf16.gmra.mxu0 %vm226_vm2, %v1267_v23 }
 0x163   : > { %1926 = vmatmul.msk.bf16.gmra.mxu2 %vm226_vm2, %v1452_v14  ;;  %v1632_v14 = vld [vmem:[#allocation2 + $0x1a] sm:$0xff] }
 0x164   : > { %1897 = vmatmul.msk.bf16.gmra.mxu1 %vm226_vm2, %v983_v24  ;;  %v1640_v40 = vpack.c.bf16 %v1633_v37, %v1632_v14 }
 0x166   : > { %v2376_v21 = vpop.f32.mrf.mxu3 }
 0x16c   : > { %v939_v27 = vpop.f32.mrf.mxu0 }
 0x16d   : > { %963 = vst.msk [vmem:[#allocation3] sm:$0xff] %vm226_vm2, %v939_v27 }
 0x16e   : > { %v2379_v26 = vpop.f32.mrf.mxu3 }
 0x172   : > { %1937 = vmatmul.msk.bf16.vlgmr.msrb.gmra.mxu0 %vm226_vm2, %v1639_v32  ;;  %v1355_v32 = vld [vmem:[#allocation2 + $0xe9] sm:$0xff] }
 0x173   : > { %1927 = vmatmul.msk.bf16.gmra.mxu2 %vm226_vm2, %v1453_v15  ;;  %v2397_v6 = vpop.f32.mrf.mxu2  ;;  %v1360_v39 = vpack.c.bf16 %v1355_v32, %v1354_v31 }
 0x174   : > { %v941_v5 = vpop.f32.mrf.mxu0  ;;  %1898 = vmatmul.msk.bf16.gmra.mxu1 %vm226_vm2, %v984_v33  ;;  %v1039_v14 = vld [vmem:[#allocation3] sm:$0xff] }
 0x175   : > { %964 = vst.msk [vmem:[#allocation3 + $0x8] sm:$0xff] %vm226_vm2, %v941_v5 }
 0x176   : > { %v2388_v11 = vpop.f32.mrf.mxu3 }
 0x17b   : > { %v2402_v15 = vpop.f32.mrf.mxu2 }
 0x17e   : > { %v2390_v36 = vpop.f32.mrf.mxu3 }
 0x182   : > { %1938 = vmatmul.msk.bf16.gmra.mxu0 %vm226_vm2, %v1640_v40 }
 0x183   : > { %1928 = vmatmul.msk.bf16.gmra.mxu2 %vm226_vm2, %v1454_v38  ;;  %v1357_v38 = vpack.c.bf16 %v1349_v46, %v1348_v45 }
 0x184   : > { %1899 = vmatmul.msk.bf16.gmra.mxu1 %vm226_vm2, %v985_v41 }
 0x186   : > { %v2400_v30 = vpop.f32.mrf.mxu3 }
 0x18e   : > { %v1225_v44 = vpop.f32.mrf.mxu3 }
 0x18f   : > { %v944_v47 = vpop.f32.mrf.mxu0  ;;  %v1040_v44 = vld [vmem:[#allocation3 + $0x8] sm:$0xff] }
 0x190   : > { %965 = vst.msk [vmem:[#allocation3 + $0x10] sm:$0xff] %vm226_vm2, %v944_v47 }
 0x191   : > { %v949_v34 = vpop.f32.mrf.mxu1 }
 0x192   : > { %967 = vst.msk [vmem:[#allocation3 + $0x20] sm:$0xff] %vm226_vm2, %v949_v34  ;;  %1939 = vmatmul.msk.bf16.gmra.mxu0 %vm226_vm2, %v1641_v35 }
 0x193   : > { %1929 = vmatmul.msk.bf16.gmra.mxu2 %vm226_vm2, %v1455_v4 }
 0x194   : > { %1919 = vmatmul.msk.bf16.vlgmr.msrb.gmra.mxu1 %vm226_vm2, %v1357_v38  ;;  %v1356_v38 = vld [vmem:[#allocation2 + $0xf1] sm:$0xff] }
 0x195   : > { %v1361_v56 = vpack.c.bf16 %v1356_v38, %v1356_v38 }
 0x196   : > { %v2408_v48 = vpop.f32.mrf.mxu2  ;;  %v2410_v49 = vpop.f32.mrf.mxu3 }
 0x197   : > { %v946_v50 = vpop.f32.mrf.mxu0  ;;  %v1041_v53 = vld [vmem:[#allocation3 + $0x10] sm:$0xff] }
 0x198   : > { %966 = vst.msk [vmem:[#allocation3 + $0x18] sm:$0xff] %vm226_vm2, %v946_v50 }
 0x199   : > { %v951_v51 = vpop.f32.mrf.mxu1  ;;  %v1043_v32 = vld [vmem:[#allocation3 + $0x20] sm:$0xff] }
 0x19a   : > { %968 = vst.msk [vmem:[#allocation3 + $0x28] sm:$0xff] %vm226_vm2, %v951_v51 }
 0x19e   : > { %v2414_v52 = vpop.f32.mrf.mxu2  ;;  %v2416_v55 = vpop.f32.mrf.mxu3 }
 0x19f   : > { %v2418_v58 = vpop.f32.mrf.mxu0  ;;  %v1042_v4 = vld [vmem:[#allocation3 + $0x18] sm:$0xff] }
 0x1a1   : > { %v954_v59 = vpop.f32.mrf.mxu1 }
 0x1a2   : > { %969 = vst.msk [vmem:[#allocation3 + $0x30] sm:$0xff] %vm226_vm2, %v954_v59  ;;  %1940 = vmatmul.msk.bf16.gmra.mxu0 %vm226_vm2, %v1642_v60 }
 0x1a4   : > { %1920 = vmatmul.msk.bf16.gmra.mxu1 %vm226_vm2, %v1358_v61 }
 0x1a6   : > { %v2423_v62 = vpop.f32.mrf.mxu2  ;;  %v2425_v63 = vpop.f32.mrf.mxu3 }
 0x1a7   : > { %v2427_v0 = vpop.f32.mrf.mxu0 }
 0x1a9   : > { %v956_v1 = vpop.f32.mrf.mxu1 }
 0x1aa   : > { %970 = vst.msk [vmem:[#allocation3 + $0x38] sm:$0xff] %vm226_vm2, %v956_v1 }
 0x1ae   : > { %v2430_v9 = vpop.f32.mrf.mxu2  ;;  %v2433_v10 = vpop.f32.mrf.mxu3 }
 0x1af   : > { %v2435_v18 = vpop.f32.mrf.mxu0 }
 0x1b1   : > { %v959_v20 = vpop.f32.mrf.mxu1 }
 0x1b2   : > { %971 = vst.msk [vmem:[#allocation3 + $0x40] sm:$0xff] %vm226_vm2, %v959_v20  ;;  %1941 = vmatmul.msk.bf16.gmra.mxu0 %vm226_vm2, %v1643_v16 }
 0x1b4   : > { %1921 = vmatmul.msk.bf16.gmra.mxu1 %vm226_vm2, %v1359_v22 }
 0x1b6   : > { %v2440_v23 = vpop.f32.mrf.mxu2  ;;  %v2442_v24 = vpop.f32.mrf.mxu3 }
 0x1b7   : > { %v2444_v27 = vpop.f32.mrf.mxu0 }
 0x1b9   : > { %v961_v29 = vpop.f32.mrf.mxu1 }
 0x1be   : > { %v2446_v25 = vpop.f32.mrf.mxu2  ;;  %v2448_v28 = vpop.f32.mrf.mxu3 }
 0x1bf   : > { %v2450_v33 = vpop.f32.mrf.mxu0 }
 0x1c1   : > { %v1015_v5 = vpop.f32.mrf.mxu1 }
 0x1c2   : > { %v1048_v37 = vadd.f32 %v1039_v14, %v1015_v5 }
 0x1c4   : > { %1057 = vst.msk [vmem:[#allocation3] sm:$0xff] %vm226_vm2, %v1048_v37  ;;  %1922 = vmatmul.msk.bf16.gmra.mxu1 %vm226_vm2, %v1360_v39 }
 0x1c6   : > { %v2454_v40 = vpop.f32.mrf.mxu2  ;;  %v2456_v41 = vpop.f32.mrf.mxu3 }
 0x1c7   : > { %v2458_v42 = vpop.f32.mrf.mxu0 }
 0x1c9   : > { %v1017_v43 = vpop.f32.mrf.mxu1 }
 0x1ca   : > { %v1049_v45 = vadd.f32 %v1040_v44, %v1017_v43 }
 0x1cb   : > { %v1133_v46 = vld [vmem:[#allocation3] sm:$0xff] }
 0x1cc   : > { %v1142_v47 = vadd.f32 %v1133_v46, %v2397_v6  ;;  %1058 = vst.msk [vmem:[#allocation3 + $0x8] sm:$0xff] %vm226_vm2, %v1049_v45  ;;  %v1044_v46 = vld [vmem:[#allocation3 + $0x28] sm:$0xff] }
 0x1ce   : > { %1151 = vst.msk [vmem:[#allocation3] sm:$0xff] %vm226_vm2, %v1142_v47  ;;  %v1131_v34 = vpop.f32.mrf.mxu2  ;;  %v2463_v35 = vpop.f32.mrf.mxu3 }
 0x1cf   : > { %v2465_v50 = vpop.f32.mrf.mxu0 }
 0x1d1   : > { %v1020_v51 = vpop.f32.mrf.mxu1 }
 0x1d2   : > { %v1050_v54 = vadd.f32 %v1041_v53, %v1020_v51 }
 0x1d3   : > { %v1134_v57 = vld [vmem:[#allocation3 + $0x8] sm:$0xff] }
 0x1d4   : > { %v1143_v59 = vadd.f32 %v1134_v57, %v2402_v15  ;;  %1059 = vst.msk [vmem:[#allocation3 + $0x10] sm:$0xff] %vm226_vm2, %v1050_v54  ;;  %1923 = vmatmul.msk.bf16.gmra.mxu1 %vm226_vm2, %v1361_v56  ;;  %v1045_v57 = vld [vmem:[#allocation3 + $0x30] sm:$0xff] }
 0x1d5   : > { %v1227_v6 = vld [vmem:[#allocation3] sm:$0xff] }
 0x1d6   : > { %1152 = vst.msk [vmem:[#allocation3 + $0x8] sm:$0xff] %vm226_vm2, %v1143_v59  ;;  %v1236_v60 = vadd.f32 %v1227_v6, %v2355_v2  ;;  %v2472_v61 = vpop.f32.mrf.mxu3 }
 0x1d7   : > { %v2474_v1 = vpop.f32.mrf.mxu0 }
 0x1d8   : > { %1245 = vst.msk [vmem:[#allocation3] sm:$0xff] %vm226_vm2, %v1236_v60 }
 0x1d9   : > { %v1022_v3 = vpop.f32.mrf.mxu1 }
 0x1da   : > { %v1051_v8 = vadd.f32 %v1042_v4, %v1022_v3 }
 0x1db   : > { %v1135_v12 = vld [vmem:[#allocation3 + $0x10] sm:$0xff] }
 0x1dc   : > { %v1144_v15 = vadd.f32 %v1135_v12, %v2408_v48  ;;  %1060 = vst.msk [vmem:[#allocation3 + $0x18] sm:$0xff] %vm226_vm2, %v1051_v8  ;;  %v2486_v48 = vpop.f32.mrf.mxu2 }
 0x1dd   : > { %v1228_v13 = vld [vmem:[#allocation3 + $0x8] sm:$0xff] }
 0x1de   : > { %1153 = vst.msk [vmem:[#allocation3 + $0x10] sm:$0xff] %vm226_vm2, %v1144_v15  ;;  %v1237_v16 = vadd.f32 %v1228_v13, %v2357_v7  ;;  %v1601_v2 = vpop.f32.mrf.mxu3  ;;  %v1046_v15 = vld [vmem:[#allocation3 + $0x38] sm:$0xff] }
 0x1df   : > { %v1321_v20 = vld [vmem:[#allocation3] sm:$0xff]  ;;  %v2481_v22 = vpop.f32.mrf.mxu0 }
 0x1e0   : > { %v1330_v29 = vadd.f32 %v1321_v20, %v2418_v58  ;;  %1246 = vst.msk [vmem:[#allocation3 + $0x8] sm:$0xff] %vm226_vm2, %v1237_v16 }
 0x1e1   : > { %v1025_v31 = vpop.f32.mrf.mxu1 }
 0x1e2   : > { %v1052_v5 = vadd.f32 %v1043_v32, %v1025_v31  ;;  %1339 = vst.msk [vmem:[#allocation3] sm:$0xff] %vm226_vm2, %v1330_v29 }
 0x1e3   : > { %v1136_v14 = vld [vmem:[#allocation3 + $0x18] sm:$0xff] }
 0x1e4   : > { %v1145_v37 = vadd.f32 %v1136_v14, %v2414_v52  ;;  %1061 = vst.msk [vmem:[#allocation3 + $0x20] sm:$0xff] %vm226_vm2, %v1052_v5  ;;  %v2497_v38 = vpop.f32.mrf.mxu2  ;;  %v1047_v5 = vld [vmem:[#allocation3 + $0x40] sm:$0xff] }
 0x1e5   : > { %v1229_v7 = vld [vmem:[#allocation3 + $0x10] sm:$0xff] }
 0x1e6   : > { %1154 = vst.msk [vmem:[#allocation3 + $0x18] sm:$0xff] %vm226_vm2, %v1145_v37  ;;  %v1238_v39 = vadd.f32 %v1229_v7, %v2366_v17 }
 0x1e7   : > { %v1322_v58 = vld [vmem:[#allocation3 + $0x8] sm:$0xff]  ;;  %v1319_v43 = vpop.f32.mrf.mxu0 }
 0x1e8   : > { %v1331_v44 = vadd.f32 %v1322_v58, %v2427_v0  ;;  %1247 = vst.msk [vmem:[#allocation3 + $0x10] sm:$0xff] %vm226_vm2, %v1238_v39 }
 0x1e9   : > { %v1027_v45 = vpop.f32.mrf.mxu1 }
 0x1ea   : > { %v1053_v47 = vadd.f32 %v1044_v46, %v1027_v45  ;;  %1340 = vst.msk [vmem:[#allocation3 + $0x8] sm:$0xff] %vm226_vm2, %v1331_v44 }
 0x1eb   : > { %v1137_v34 = vld [vmem:[#allocation3 + $0x20] sm:$0xff] }
 0x1ec   : > { %v1146_v52 = vadd.f32 %v1137_v34, %v2423_v62  ;;  %1062 = vst.msk [vmem:[#allocation3 + $0x28] sm:$0xff] %vm226_vm2, %v1053_v47  ;;  %v2510_v3 = vpop.f32.mrf.mxu2 }
 0x1ed   : > { %v1230_v51 = vld [vmem:[#allocation3 + $0x18] sm:$0xff] }
 0x1ee   : > { %1155 = vst.msk [vmem:[#allocation3 + $0x20] sm:$0xff] %vm226_vm2, %v1146_v52  ;;  %v1239_v17 = vadd.f32 %v1230_v51, %v2368_v19  ;;  %v1415_v51 = vld [vmem:[#allocation3] sm:$0xff] }
 0x1ef   : > { %v1323_v0 = vld [vmem:[#allocation3 + $0x10] sm:$0xff]  ;;  %v2501_v53 = vpop.f32.mrf.mxu0 }
 0x1f0   : > { %v1332_v54 = vadd.f32 %v1323_v0, %v2435_v18  ;;  %1248 = vst.msk [vmem:[#allocation3 + $0x18] sm:$0xff] %vm226_vm2, %v1239_v17 }
 0x1f1   : > { %v1030_v56 = vpop.f32.mrf.mxu1 }
 0x1f2   : > { %v1054_v59 = vadd.f32 %v1045_v57, %v1030_v56  ;;  %1341 = vst.msk [vmem:[#allocation3 + $0x10] sm:$0xff] %vm226_vm2, %v1332_v54 }
 0x1f3   : > { %v1138_v62 = vld [vmem:[#allocation3 + $0x28] sm:$0xff] }
 0x1f4   : > { %v1147_v6 = vadd.f32 %v1138_v62, %v2430_v9  ;;  %1063 = vst.msk [vmem:[#allocation3 + $0x30] sm:$0xff] %vm226_vm2, %v1054_v59  ;;  %v2525_v31 = vpop.f32.mrf.mxu2  ;;  %v1416_v59 = vld [vmem:[#allocation3 + $0x8] sm:$0xff] }
 0x1f5   : > { %v1231_v60 = vld [vmem:[#allocation3 + $0x20] sm:$0xff] }
 0x1f6   : > { %1156 = vst.msk [vmem:[#allocation3 + $0x28] sm:$0xff] %vm226_vm2, %v1147_v6  ;;  %v1240_v19 = vadd.f32 %v1231_v60, %v2376_v21 }
 0x1f7   : > { %v1324_v18 = vld [vmem:[#allocation3 + $0x18] sm:$0xff]  ;;  %v2512_v4 = vpop.f32.mrf.mxu0 }
 0x1f8   : > { %v1333_v8 = vadd.f32 %v1324_v18, %v2444_v27  ;;  %1249 = vst.msk [vmem:[#allocation3 + $0x20] sm:$0xff] %vm226_vm2, %v1240_v19 }
 0x1f9   : > { %v1032_v12 = vpop.f32.mrf.mxu1 }
 0x1fa   : > { %v1055_v13 = vadd.f32 %v1046_v15, %v1032_v12  ;;  %1342 = vst.msk [vmem:[#allocation3 + $0x18] sm:$0xff] %vm226_vm2, %v1333_v8  ;;  %v1417_v12 = vld [vmem:[#allocation3 + $0x10] sm:$0xff] }
 0x1fb   : > { %v1139_v9 = vld [vmem:[#allocation3 + $0x30] sm:$0xff] }
 0x1fc   : > { %v1148_v16 = vadd.f32 %v1139_v9, %v2440_v23  ;;  %1064 = vst.msk [vmem:[#allocation3 + $0x38] sm:$0xff] %vm226_vm2, %v1055_v13  ;;  %v2537_v44 = vpop.f32.mrf.mxu2 }
 0x1fd   : > { %v1232_v21 = vld [vmem:[#allocation3 + $0x28] sm:$0xff] }
 0x1fe   : > { %1157 = vst.msk [vmem:[#allocation3 + $0x30] sm:$0xff] %vm226_vm2, %v1148_v16  ;;  %v1241_v2 = vadd.f32 %v1232_v21, %v2379_v26 }
 0x1ff   : > { %v1325_v20 = vld [vmem:[#allocation3 + $0x20] sm:$0xff]  ;;  %v2521_v29 = vpop.f32.mrf.mxu0 }
 0x200   : > { %v1334_v27 = vadd.f32 %v1325_v20, %v2450_v33  ;;  %1250 = vst.msk [vmem:[#allocation3 + $0x28] sm:$0xff] %vm226_vm2, %v1241_v2 }
 0x201   : > { %v1035_v32 = vpop.f32.mrf.mxu1  ;;  %v1418_v20 = vld [vmem:[#allocation3 + $0x18] sm:$0xff] }
 0x202   : > { %v1056_v14 = vadd.f32 %v1047_v5, %v1035_v32  ;;  %1343 = vst.msk [vmem:[#allocation3 + $0x20] sm:$0xff] %vm226_vm2, %v1334_v27 }
 0x203   : > { %v1140_v23 = vld [vmem:[#allocation3 + $0x38] sm:$0xff] }
 0x204   : > { %v1149_v37 = vadd.f32 %v1140_v23, %v2446_v25  ;;  %1065 = vst.msk [vmem:[#allocation3 + $0x40] sm:$0xff] %vm226_vm2, %v1056_v14 }
 0x205   : > { %v1233_v26 = vld [vmem:[#allocation3 + $0x30] sm:$0xff] }
 0x206   : > { %1158 = vst.msk [vmem:[#allocation3 + $0x38] sm:$0xff] %vm226_vm2, %v1149_v37  ;;  %v1242_v7 = vadd.f32 %v1233_v26, %v2388_v11 }
 0x207   : > { %v1326_v33 = vld [vmem:[#allocation3 + $0x28] sm:$0xff]  ;;  %v2532_v39 = vpop.f32.mrf.mxu0 }
 0x208   : > { %v1335_v58 = vadd.f32 %v1326_v33, %v2458_v42  ;;  %1251 = vst.msk [vmem:[#allocation3 + $0x30] sm:$0xff] %vm226_vm2, %v1242_v7 }
 0x209   : > { %v1037_v43 = vpop.f32.mrf.mxu1  ;;  %v1419_v7 = vld [vmem:[#allocation3 + $0x20] sm:$0xff] }
 0x20a   : > { %1344 = vst.msk [vmem:[#allocation3 + $0x28] sm:$0xff] %vm226_vm2, %v1335_v58 }
 0x20b   : > { %v1141_v25 = vld [vmem:[#allocation3 + $0x40] sm:$0xff] }
 0x20c   : > { %v1150_v45 = vadd.f32 %v1141_v25, %v2454_v40  ;;  %v2548_v40 = vpop.f32.mrf.mxu2 }
 0x20d   : > { %v1234_v46 = vld [vmem:[#allocation3 + $0x38] sm:$0xff] }
 0x20e   : > { %1159 = vst.msk [vmem:[#allocation3 + $0x40] sm:$0xff] %vm226_vm2, %v1150_v45  ;;  %v1243_v11 = vadd.f32 %v1234_v46, %v2390_v36 }
 0x20f   : > { %v1327_v47 = vld [vmem:[#allocation3 + $0x30] sm:$0xff]  ;;  %v2542_v34 = vpop.f32.mrf.mxu0 }
 0x210   : > { %v1336_v42 = vadd.f32 %v1327_v47, %v2465_v50  ;;  %1252 = vst.msk [vmem:[#allocation3 + $0x38] sm:$0xff] %vm226_vm2, %v1243_v11 }
 0x211   : > { %v1391_v52 = vpop.f32.mrf.mxu1 }
 0x212   : > { %v1424_v17 = vadd.f32 %v1415_v51, %v1391_v52  ;;  %1345 = vst.msk [vmem:[#allocation3 + $0x30] sm:$0xff] %vm226_vm2, %v1336_v42  ;;  %v1420_v42 = vld [vmem:[#allocation3 + $0x28] sm:$0xff] }
 0x214   : > { %1433 = vst.msk [vmem:[#allocation3] sm:$0xff] %vm226_vm2, %v1424_v17 }
 0x215   : > { %v1235_v0 = vld [vmem:[#allocation3 + $0x40] sm:$0xff] }
 0x216   : > { %v1244_v54 = vadd.f32 %v1235_v0, %v2400_v30  ;;  %v2559_v30 = vpop.f32.mrf.mxu2 }
 0x217   : > { %v1328_v36 = vld [vmem:[#allocation3 + $0x38] sm:$0xff]  ;;  %v2551_v56 = vpop.f32.mrf.mxu0 }
 0x218   : > { %v1337_v57 = vadd.f32 %v1328_v36, %v2474_v1  ;;  %1253 = vst.msk [vmem:[#allocation3 + $0x40] sm:$0xff] %vm226_vm2, %v1244_v54 }
 0x219   : > { %v1393_v50 = vpop.f32.mrf.mxu1 }
 0x21a   : > { %v1425_v62 = vadd.f32 %v1416_v59, %v1393_v50  ;;  %1346 = vst.msk [vmem:[#allocation3 + $0x38] sm:$0xff] %vm226_vm2, %v1337_v57 }
 0x21b   : > { %v1509_v6 = vld [vmem:[#allocation3] sm:$0xff] }
 0x21c   : > { %v1518_v60 = vadd.f32 %v1509_v6, %v2486_v48  ;;  %1434 = vst.msk [vmem:[#allocation3 + $0x8] sm:$0xff] %vm226_vm2, %v1425_v62  ;;  %v1421_v62 = vld [vmem:[#allocation3 + $0x30] sm:$0xff] }
 0x21e   : > { %1527 = vst.msk [vmem:[#allocation3] sm:$0xff] %vm226_vm2, %v1518_v60 }
 0x21f   : > { %v1329_v19 = vld [vmem:[#allocation3 + $0x40] sm:$0xff]  ;;  %v2561_v18 = vpop.f32.mrf.mxu0 }
 0x220   : > { %v1338_v1 = vadd.f32 %v1329_v19, %v2481_v22  ;;  %v2572_v22 = vpop.f32.mrf.mxu2 }
 0x221   : > { %v1396_v8 = vpop.f32.mrf.mxu1 }
 0x222   : > { %v1426_v15 = vadd.f32 %v1417_v12, %v1396_v8  ;;  %1347 = vst.msk [vmem:[#allocation3 + $0x40] sm:$0xff] %vm226_vm2, %v1338_v1 }
 0x223   : > { %v1510_v13 = vld [vmem:[#allocation3 + $0x8] sm:$0xff] }
 0x224   : > { %v1519_v9 = vadd.f32 %v1510_v13, %v2497_v38  ;;  %1435 = vst.msk [vmem:[#allocation3 + $0x10] sm:$0xff] %vm226_vm2, %v1426_v15  ;;  %v1422_v13 = vld [vmem:[#allocation3 + $0x38] sm:$0xff] }
 0x225   : > { %v1603_v48 = vld [vmem:[#allocation3] sm:$0xff] }
 0x226   : > { %v1612_v16 = vadd.f32 %v1603_v48, %v2410_v49  ;;  %1528 = vst.msk [vmem:[#allocation3 + $0x8] sm:$0xff] %vm226_vm2, %v1519_v9 }
 0x227   : > { %v2570_v21 = vpop.f32.mrf.mxu0 }
 0x228   : > { %1621 = vst.msk [vmem:[#allocation3] sm:$0xff] %vm226_vm2, %v1612_v16  ;;  %v2582_v33 = vpop.f32.mrf.mxu2 }
 0x229   : > { %v1398_v2 = vpop.f32.mrf.mxu1 }
 0x22a   : > { %v1427_v27 = vadd.f32 %v1418_v20, %v1398_v2 }
 0x22b   : > { %v1511_v32 = vld [vmem:[#allocation3 + $0x10] sm:$0xff] }
 0x22c   : > { %v1520_v5 = vadd.f32 %v1511_v32, %v2510_v3  ;;  %1436 = vst.msk [vmem:[#allocation3 + $0x18] sm:$0xff] %vm226_vm2, %v1427_v27 }
 0x22d   : > { %v1604_v38 = vld [vmem:[#allocation3 + $0x8] sm:$0xff] }
 0x22e   : > { %v1613_v14 = vadd.f32 %v1604_v38, %v2416_v55  ;;  %1529 = vst.msk [vmem:[#allocation3 + $0x10] sm:$0xff] %vm226_vm2, %v1520_v5  ;;  %v1423_v38 = vld [vmem:[#allocation3 + $0x40] sm:$0xff] }
 0x22f   : > { %v1697_v49 = vld [vmem:[#allocation3] sm:$0xff]  ;;  %v2580_v37 = vpop.f32.mrf.mxu0 }
 0x230   : > { %v1706_v23 = vadd.f32 %v1697_v49, %v2501_v53  ;;  %1622 = vst.msk [vmem:[#allocation3 + $0x8] sm:$0xff] %vm226_vm2, %v1613_v14  ;;  %v2590_v53 = vld [vmem:[%s2674_s4] ss:$0 sm:$0xff]  ;;  %v1507_v52 = vpop.f32.mrf.mxu2 }
 0x231   : > { %v1401_v26 = vpop.f32.mrf.mxu1 }
 0x232   : > { %1715 = vst.msk [vmem:[#allocation3] sm:$0xff] %vm226_vm2, %v1706_v23  ;;  %v1428_v3 = vadd.f32 %v1419_v7, %v1401_v26 }
 0x233   : > { %v1512_v58 = vld [vmem:[#allocation3 + $0x18] sm:$0xff] }
 0x234   : > { %v1521_v55 = vadd.f32 %v1512_v58, %v2525_v31  ;;  %1437 = vst.msk [vmem:[#allocation3 + $0x20] sm:$0xff] %vm226_vm2, %v1428_v3 }
 0x235   : > { %v1605_v43 = vld [vmem:[#allocation3 + $0x10] sm:$0xff] }
 0x236   : > { %v1614_v25 = vadd.f32 %v1605_v43, %v2425_v63  ;;  %1530 = vst.msk [vmem:[#allocation3 + $0x18] sm:$0xff] %vm226_vm2, %v1521_v55 }
 0x237   : > { %v1698_v45 = vld [vmem:[#allocation3 + $0x8] sm:$0xff]  ;;  %v1695_v11 = vpop.f32.mrf.mxu0 }
 0x238   : > { %v1707_v46 = vadd.f32 %v1698_v45, %v2512_v4  ;;  %1623 = vst.msk [vmem:[#allocation3 + $0x10] sm:$0xff] %vm226_vm2, %v1614_v25 }
 0x239   : > { %v1725_v47 = vld [vmem:[#allocation3] sm:$0xff]  ;;  %v1403_v31 = vpop.f32.mrf.mxu1 }
 0x23a   : > { %v1729_v51 = vadd.f32 %v2590_v53, %v1725_v47  ;;  %1716 = vst.msk [vmem:[#allocation3 + $0x8] sm:$0xff] %vm226_vm2, %v1707_v46  ;;  %v1429_v17 = vadd.f32 %v1420_v42, %v1403_v31 }
 0x23b   : > { %v1513_v0 = vld [vmem:[#allocation3 + $0x20] sm:$0xff] }
 0x23c   : > { %v1730_v63 = vmax.f32 %v1729_v51, 0.0  ;;  %v1522_v54 = vadd.f32 %v1513_v0, %v2537_v44  ;;  %1438 = vst.msk [vmem:[#allocation3 + $0x28] sm:$0xff] %vm226_vm2, %v1429_v17 }
 0x23d   : > { %v1606_v4 = vld [vmem:[#allocation3 + $0x18] sm:$0xff] }
 0x23e   : > { %v1731_v36 = vpack.c.bf16 %v1730_v63, %v1730_v63  ;;  %v1615_v57 = vadd.f32 %v1606_v4, %v2433_v10  ;;  %1531 = vst.msk [vmem:[#allocation3 + $0x20] sm:$0xff] %vm226_vm2, %v1522_v54 }
 0x23f   : > { %v1699_v50 = vld [vmem:[#allocation3 + $0x10] sm:$0xff] }
 0x240   : > { %1733 = vst.msk [vmem:[%s2604_s28] sm:$0xf] %vm1732_vm5, %v1731_v36  ;;  %v1708_v44 = vadd.f32 %v1699_v50, %v2521_v29 }
 0x241   : > { %1624 = vst.msk [vmem:[#allocation3 + $0x18] sm:$0xff] %vm226_vm2, %v1615_v57  ;;  %v1406_v59 = vpop.f32.mrf.mxu1 }
 0x242   : > { %1717 = vst.msk [vmem:[#allocation3 + $0x10] sm:$0xff] %vm226_vm2, %v1708_v44  ;;  %v1430_v6 = vadd.f32 %v1421_v62, %v1406_v59 }
 0x243   : > { %v1514_v60 = vld [vmem:[#allocation3 + $0x28] sm:$0xff] }
 0x244   : > { %v1523_v19 = vadd.f32 %v1514_v60, %v2548_v40  ;;  %1439 = vst.msk [vmem:[#allocation3 + $0x30] sm:$0xff] %vm226_vm2, %v1430_v6 }
 0x245   : > { %v1607_v10 = vld [vmem:[#allocation3 + $0x20] sm:$0xff] }
 0x246   : > { %v1616_v1 = vadd.f32 %v1607_v10, %v2442_v24  ;;  %1532 = vst.msk [vmem:[#allocation3 + $0x28] sm:$0xff] %vm226_vm2, %v1523_v19 }
 0x248   : > { %v1700_v8 = vld [vmem:[#allocation3 + $0x18] sm:$0xff]  ;;  %1625 = vst.msk [vmem:[#allocation3 + $0x20] sm:$0xff] %vm226_vm2, %v1616_v1 }
 0x249   : > { %v1734_v29 = vld [vmem:[#allocation3 + $0x9] sm:$0xff]  ;;  %v1709_v12 = vadd.f32 %v1700_v8, %v2532_v39  ;;  %v1408_v15 = vpop.f32.mrf.mxu1 }
 0x24a   : > { %v1735_v9 = vadd.f32 %v2590_v53, %v1734_v29  ;;  %v1431_v48 = vadd.f32 %v1422_v13, %v1408_v15 }
 0x24b   : > { %1718 = vst.msk [vmem:[#allocation3 + $0x18] sm:$0xff] %vm226_vm2, %v1709_v12  ;;  %v1515_v40 = vld [vmem:[#allocation3 + $0x30] sm:$0xff] }
 0x24c   : > { %v1736_v16 = vmax.f32 %v1735_v9, 0.0  ;;  %v1524_v24 = vadd.f32 %v1515_v40, %v2559_v30  ;;  %1440 = vst.msk [vmem:[#allocation3 + $0x38] sm:$0xff] %vm226_vm2, %v1431_v48 }
 0x24d   : > { %v1608_v2 = vld [vmem:[#allocation3 + $0x28] sm:$0xff] }
 0x24e   : > { %v1737_v20 = vpack.c.bf16 %v1736_v16, %v1736_v16  ;;  %v1617_v27 = vadd.f32 %v1608_v2, %v2448_v28  ;;  %1533 = vst.msk [vmem:[#allocation3 + $0x30] sm:$0xff] %vm226_vm2, %v1524_v24 }
 0x24f   : > { %v1701_v39 = vld [vmem:[#allocation3 + $0x20] sm:$0xff] }
 0x250   : > { %1738 = vst.msk [vmem:[%s2604_s28 + $0x4] sm:$0xf] %vm1732_vm5, %v1737_v20  ;;  %v1710_v32 = vadd.f32 %v1701_v39, %v2542_v34 }
 0x251   : > { %1626 = vst.msk [vmem:[#allocation3 + $0x28] sm:$0xff] %vm226_vm2, %v1617_v27  ;;  %v1411_v5 = vpop.f32.mrf.mxu1 }
 0x252   : > { %v1739_v14 = vld [vmem:[#allocation3 + $0x12] sm:$0xff]  ;;  %1719 = vst.msk [vmem:[#allocation3 + $0x20] sm:$0xff] %vm226_vm2, %v1710_v32  ;;  %v1432_v30 = vadd.f32 %v1423_v38, %v1411_v5 }
 0x253   : > { %v1740_v49 = vadd.f32 %v2590_v53, %v1739_v14  ;;  %v1516_v23 = vld [vmem:[#allocation3 + $0x38] sm:$0xff] }
 0x254   : > { %v1525_v28 = vadd.f32 %v1516_v23, %v2572_v22  ;;  %1441 = vst.msk [vmem:[#allocation3 + $0x40] sm:$0xff] %vm226_vm2, %v1432_v30 }
 0x255   : > { %v1741_v26 = vmax.f32 %v1740_v49, 0.0  ;;  %v1609_v7 = vld [vmem:[#allocation3 + $0x30] sm:$0xff] }
 0x256   : > { %v1618_v34 = vadd.f32 %v1609_v7, %v2456_v41  ;;  %1534 = vst.msk [vmem:[#allocation3 + $0x38] sm:$0xff] %vm226_vm2, %v1525_v28 }
 0x257   : > { %v1742_v3 = vpack.c.bf16 %v1741_v26, %v1741_v26 }
 0x258   : > { %v1702_v58 = vld [vmem:[#allocation3 + $0x28] sm:$0xff]  ;;  %1627 = vst.msk [vmem:[#allocation3 + $0x30] sm:$0xff] %vm226_vm2, %v1618_v34 }
 0x259   : > { %1743 = vst.msk [vmem:[%s2604_s28 + $0x8] sm:$0xf] %vm1732_vm5, %v1742_v3  ;;  %v1744_v55 = vld [vmem:[#allocation3 + $0x1b] sm:$0xff]  ;;  %v1711_v43 = vadd.f32 %v1702_v58, %v2551_v56  ;;  %v1413_v25 = vpop.f32.mrf.mxu1 }
 0x25a   : > { %v1745_v22 = vadd.f32 %v2590_v53, %v1744_v55 }
 0x25b   : > { %1720 = vst.msk [vmem:[#allocation3 + $0x28] sm:$0xff] %vm226_vm2, %v1711_v43  ;;  %v1517_v45 = vld [vmem:[#allocation3 + $0x40] sm:$0xff] }
 0x25c   : > { %v1746_v46 = vmax.f32 %v1745_v22, 0.0  ;;  %v1526_v41 = vadd.f32 %v1517_v45, %v2582_v33 }
 0x25d   : > { %v1610_v11 = vld [vmem:[#allocation3 + $0x38] sm:$0xff] }
 0x25e   : > { %v1747_v47 = vpack.c.bf16 %v1746_v46, %v1746_v46  ;;  %v1619_v31 = vadd.f32 %v1610_v11, %v2463_v35  ;;  %1535 = vst.msk [vmem:[#allocation3 + $0x40] sm:$0xff] %vm226_vm2, %v1526_v41 }
 0x25f   : > { %v1703_v42 = vld [vmem:[#allocation3 + $0x30] sm:$0xff] }
 0x260   : > { %1748 = vst.msk [vmem:[%s2604_s28 + $0xc] sm:$0xf] %vm1732_vm5, %v1747_v47  ;;  %v1712_v56 = vadd.f32 %v1703_v42, %v2561_v18 }
 0x261   : > { %1628 = vst.msk [vmem:[#allocation3 + $0x38] sm:$0xff] %vm226_vm2, %v1619_v31 }
 0x262   : > { %v1749_v52 = vld [vmem:[#allocation3 + $0x24] sm:$0xff]  ;;  %1721 = vst.msk [vmem:[#allocation3 + $0x30] sm:$0xff] %vm226_vm2, %v1712_v56 }
 0x263   : > { %v1750_v33 = vadd.f32 %v2590_v53, %v1749_v52 }
 0x265   : > { %v1751_v51 = vmax.f32 %v1750_v33, 0.0  ;;  %v1611_v17 = vld [vmem:[#allocation3 + $0x40] sm:$0xff] }
 0x266   : > { %v1620_v0 = vadd.f32 %v1611_v17, %v2472_v61 }
 0x267   : > { %v1752_v35 = vpack.c.bf16 %v1751_v51, %v1751_v51 }
 0x268   : > { %v1704_v63 = vld [vmem:[#allocation3 + $0x38] sm:$0xff]  ;;  %1629 = vst.msk [vmem:[#allocation3 + $0x40] sm:$0xff] %vm226_vm2, %v1620_v0 }
 0x269   : > { %1753 = vst.msk [vmem:[%s2604_s28 + $0x10] sm:$0xf] %vm1732_vm5, %v1752_v35  ;;  %v1754_v18 = vld [vmem:[#allocation3 + $0x2d] sm:$0xff]  ;;  %v1713_v54 = vadd.f32 %v1704_v63, %v2570_v21 }
 0x26a   : > { %v1755_v4 = vadd.f32 %v2590_v53, %v1754_v18 }
 0x26b   : > { %1722 = vst.msk [vmem:[#allocation3 + $0x38] sm:$0xff] %vm226_vm2, %v1713_v54 }
 0x26c   : > { %v1756_v36 = vmax.f32 %v1755_v4, 0.0 }
 0x26e   : > { %v1757_v57 = vpack.c.bf16 %v1756_v36, %v1756_v36 }
 0x26f   : > { %v1705_v50 = vld [vmem:[#allocation3 + $0x40] sm:$0xff] }
 0x270   : > { %1758 = vst.msk [vmem:[%s2604_s28 + $0x14] sm:$0xf] %vm1732_vm5, %v1757_v57  ;;  %v1714_v61 = vadd.f32 %v1705_v50, %v2580_v37 }
 0x272   : > { %v1759_v44 = vld [vmem:[#allocation3 + $0x36] sm:$0xff]  ;;  %1723 = vst.msk [vmem:[#allocation3 + $0x40] sm:$0xff] %vm226_vm2, %v1714_v61 }
 0x273   : > { %v1760_v59 = vadd.f32 %v2590_v53, %v1759_v44 }
 0x275   : > { %v1761_v62 = vmax.f32 %v1760_v59, 0.0 }
 0x277   : > { %v1762_v6 = vpack.c.bf16 %v1761_v62, %v1761_v62 }
 0x279   : > { %1763 = vst.msk [vmem:[%s2604_s28 + $0x18] sm:$0xf] %vm1732_vm5, %v1762_v6  ;;  %v1764_v21 = vld [vmem:[#allocation3 + $0x3f] sm:$0xff] }
 0x27a   : > { %v1765_v60 = vadd.f32 %v2590_v53, %v1764_v21 }
 0x27c   : > { %v1766_v19 = vmax.f32 %v1765_v60, 0.0 }
 0x27e   : > { %v1767_v10 = vpack.c.bf16 %v1766_v19, %v1766_v19 }
 0x280   : > { %1768 = vst.msk [vmem:[%s2604_s28 + $0x1c] sm:$0xf] %vm1732_vm5, %v1767_v10 }
 0x281 PF: > { %s15_s18 = sadd.s32 1, %s1964_s18  }
 0x282   : > { %p12_p4 = scmp.ge.s32.totalorder %s15_s18, 4  }
 0x284   :  { %14 = sbr.rel (!%p12_p4) target bundleno = 1 (0x1), region = 84 }

</bundles_post_ra>
